<compile_context>
chip_gen: v6e
topology: v6e:2x2x1
jax: 0.10.0
libtpu: 0.0.40
codegen_flags: <defaults>
</compile_context>

<pallas_src>
import jax
import jax.numpy as jnp
from jax import lax
from jax.experimental import pallas as pl
from jax.experimental.pallas import tpu as pltpu


def _largest_divisor_leq(n, cap):
    t = min(n, cap)
    while n % t:
        t -= 1
    return t


# --------------------------------------------------------------------------------------------
# Kernel
# --------------------------------------------------------------------------------------------
def make_kernel(n_layers, n_hidden, n_out, batch_padded, t_tile):
    H = n_hidden
    L = n_layers
    Bp = batch_padded

    def kernel(*refs):
        idx = 0
        x_ref = refs[idx]; idx += 1                      # (t_tile, Bp, E) bf16
        w0x_ref = refs[idx]; idx += 1                    # (E, 7H) bf16: [LSTM W_ih | GRU W_ih]
        lstm_ih, gru_ih = [None], [None]                 # layer-0 input proj is fused in w0x
        for _ in range(1, L):
            lstm_ih.append(refs[idx]); idx += 1          # (H, 4H) bf16
            gru_ih.append(refs[idx]); idx += 1           # (H, 3H) bf16
        lstm_hh, lstm_b = [], []
        gru_hh, gru_bi, gru_bh = [], [], []
        for _ in range(L):
            lstm_hh.append(refs[idx]); idx += 1          # (H, 4H) bf16
            lstm_b.append(refs[idx]); idx += 1           # (1, 4H) f32  (= b_ih + b_hh)
            gru_hh.append(refs[idx]); idx += 1           # (H, 3H) bf16
            gru_bi.append(refs[idx]); idx += 1           # (1, 3H) f32
            gru_bh.append(refs[idx]); idx += 1           # (1, 3H) f32
        convpool_w_ref, convpool_b_ref, fc_w_ref, fc_b_ref = refs[idx:idx + 4]; idx += 4
        out_ref, sig_ref, lh_ref, lc_ref, gh_ref = refs[idx:idx + 5]

        tb = pl.program_id(0)

        @pl.when(tb == 0)
        def _init():
            lh_ref[...] = jnp.zeros_like(lh_ref)
            lc_ref[...] = jnp.zeros_like(lc_ref)
            gh_ref[...] = jnp.zeros_like(gh_ref)
            out_ref[...] = jnp.zeros_like(out_ref)       # never write back uninitialized blocks
            sig_ref[...] = jnp.zeros_like(sig_ref)

        # Pull the recurrent state (f32) out of the resident output blocks once per grid step.
        lh0 = tuple(lh_ref[l] for l in range(L))
        lc0 = tuple(lc_ref[l] for l in range(L))
        gh0 = tuple(gh_ref[l] for l in range(L))

        def lstm_cell(gates, c):                         # PyTorch gate order i, f, g, o
            i_g = jax.nn.sigmoid(gates[:, 0 * H:1 * H])
            f_g = jax.nn.sigmoid(gates[:, 1 * H:2 * H])
            g_g = jnp.tanh(gates[:, 2 * H:3 * H])
            o_g = jax.nn.sigmoid(gates[:, 3 * H:4 * H])
            c_new = f_g * c + i_g * g_g
            h_new = o_g * jnp.tanh(c_new)
            return h_new, c_new

        def gru_cell(gi, gl, h):                         # PyTorch gate order r, z, n
            r = jax.nn.sigmoid(gi[:, 0 * H:1 * H] + gl[:, 0 * H:1 * H])
            z = jax.nn.sigmoid(gi[:, 1 * H:2 * H] + gl[:, 1 * H:2 * H])
            n = jnp.tanh(gi[:, 2 * H:3 * H] + r * gl[:, 2 * H:3 * H])
            return (1.0 - z) * n + z * h

        def step(tt, carry):
            lh, lc, gh = carry
            x_t = x_ref[tt]                              # (Bp, E) bf16
            # Fused layer-0 input projection: one MXU pass feeds LSTM (4H) and GRU (3H) gates.
            xproj = jnp.dot(x_t, w0x_ref[...], preferred_element_type=jnp.float32)
            x_lstm = xproj[:, :4 * H]
            x_gru = xproj[:, 4 * H:]

            new_lh, new_lc, new_gh = [], [], []

            # ------------------- LSTM stack, one timestep -------------------
            inp = None
            for l in range(L):
                h, c = lh[l], lc[l]
                gates = jnp.dot(h.astype(jnp.bfloat16), lstm_hh[l][...],
                                preferred_element_type=jnp.float32)
                if l == 0:
                    gates = gates + x_lstm
                else:
                    gates = gates + jnp.dot(inp, lstm_ih[l][...],
                                            preferred_element_type=jnp.float32)
                gates = gates + lstm_b[l][...]
                h_new, c_new = lstm_cell(gates, c)
                new_lh.append(h_new)
                new_lc.append(c_new)
                inp = h_new.astype(jnp.bfloat16)         # inter-layer dropout: identity (eval)

            # ------------------- GRU stack, one timestep --------------------
            inp = None
            for l in range(L):
                h = gh[l]
                gl = jnp.dot(h.astype(jnp.bfloat16), gru_hh[l][...],
                             preferred_element_type=jnp.float32) + gru_bh[l][...]
                if l == 0:
                    gi = x_gru + gru_bi[l][...]
                else:
                    gi = jnp.dot(inp, gru_ih[l][...],
                                 preferred_element_type=jnp.float32) + gru_bi[l][...]
                h_new = gru_cell(gi, gl, h)
                new_gh.append(h_new)
                inp = h_new.astype(jnp.bfloat16)

            return (tuple(new_lh), tuple(new_lc), tuple(new_gh))

        lh, lc, gh = lax.fori_loop(0, t_tile, step, (lh0, lc0, gh0), unroll=True)

        for l in range(L):
            lh_ref[l] = lh[l]
            lc_ref[l] = lc[l]
            gh_ref[l] = gh[l]

        # ----- head on the last timestep only (matches the overwrite-in-loop semantics) -----
        @pl.when(tb == pl.num_programs(0) - 1)
        def _head():
            hq = H // 4
            # conv1d(k=1) on both stacks in one MXU pass (batch concat), with AvgPool1d(2)
            # pre-folded into the conv weight (exact linear fold).
            top = jnp.concatenate([lh[L - 1], gh[L - 1]], axis=0)            # (2Bp, H) f32
            pooled = (jnp.dot(top, convpool_w_ref[...],
                              preferred_element_type=jnp.float32)
                      + convpool_b_ref[...])                                 # (2Bp, H//4)
            l_pool = pooled[:Bp]
            g_pool = pooled[Bp:]
            # fc over concat([l_pool, g_pool], -1) expressed as two partial dots (avoids an
            # unaligned lane concat); dropout(p=0.3) x2 is identity in eval mode.
            logits = (jnp.dot(l_pool, fc_w_ref[0:hq, :], preferred_element_type=jnp.float32)
                      + jnp.dot(g_pool, fc_w_ref[hq:2 * hq, :],
                                preferred_element_type=jnp.float32)
                      + fc_b_ref[...])
            out_ref[...] = logits
            sig_ref[...] = jax.nn.sigmoid(logits)

    return kernel


# --------------------------------------------------------------------------------------------
# Parameter preparation (transpose / fuse / fold / cast) -- exact eval-mode refactoring
# --------------------------------------------------------------------------------------------
def prepare_params(params, n_layers, n_hidden):
    H = n_hidden
    bf = jnp.bfloat16
    prep = {
        "lstm_ih": [], "gru_ih": [],
        "lstm_hh": [], "lstm_b": [],
        "gru_hh": [], "gru_bi": [], "gru_bh": [],
    }
    # fused layer-0 input projection: [LSTM W_ih^T | GRU W_ih^T] -> (E, 7H), bf16
    prep["w0x"] = jnp.concatenate(
        [params["lstm"][0]["w_ih"].T, params["gru"][0]["w_ih"].T], axis=1).astype(bf)
    for l in range(n_layers):
        pls = params["lstm"][l]
        pgr = params["gru"][l]
        if l > 0:
            prep["lstm_ih"].append(pls["w_ih"].T.astype(bf))
            prep["gru_ih"].append(pgr["w_ih"].T.astype(bf))
        prep["lstm_hh"].append(pls["w_hh"].T.astype(bf))
        prep["lstm_b"].append((pls["b_ih"] + pls["b_hh"]).reshape(1, 4 * H))
        prep["gru_hh"].append(pgr["w_hh"].T.astype(bf))
        prep["gru_bi"].append(pgr["b_ih"].reshape(1, 3 * H))
        prep["gru_bh"].append(pgr["b_hh"].reshape(1, 3 * H))

    # Fold AvgPool1d(2) into the conv1d(k=1) weights: pooled = feat @ (Wc^T @ P) + bc @ P.
    pool = jnp.zeros((H // 2, H // 4), jnp.float32)
    j = jnp.arange(H // 4)
    pool = pool.at[2 * j, j].set(0.5).at[2 * j + 1, j].set(0.5)
    prep["convpool_w"] = params["conv_w"].T @ pool                 # (H, H//4) f32
    prep["convpool_b"] = params["conv_b"].reshape(1, -1) @ pool    # (1, H//4) f32
    prep["fc_w"] = params["fc_w"].T                                # (H//2, n_out) f32
    prep["fc_b"] = params["fc_b"].reshape(1, -1)                   # (1, n_out) f32
    return prep


# --------------------------------------------------------------------------------------------
# Wrapper
# --------------------------------------------------------------------------------------------
def sentiment_rnn_forward(tokens, params, *, n_layers, n_hidden, n_out, t_tile_cap=32):
    H = n_hidden
    seq_len, batch = tokens.shape
    E = params["embedding"].shape[1]

    # glue: embedding gather, sublane (batch) padding, bf16 cast for the streamed input
    x = jnp.take(params["embedding"], tokens, axis=0)              # (seq, B, E) f32
    Bp = max(8, -(-batch // 8) * 8)
    if Bp != batch:
        x = jnp.pad(x, ((0, 0), (0, Bp - batch), (0, 0)))
    x = x.astype(jnp.bfloat16)

    t_tile = _largest_divisor_leq(seq_len, t_tile_cap)
    n_blocks = seq_len // t_tile

    prep = prepare_params(params, n_layers, n_hidden)

    inputs = [x]
    in_specs = [pl.BlockSpec((t_tile, Bp, E), lambda tb: (tb, 0, 0))]

    def add_resident(arr):
        # grid-invariant operand: full block, constant index map (stays VMEM-resident)
        inputs.append(arr)
        nd = arr.ndim
        in_specs.append(pl.BlockSpec(arr.shape, lambda tb, _nd=nd: (0,) * _nd))

    add_resident(prep["w0x"])
    for l in range(1, n_layers):
        add_resident(prep["lstm_ih"][l - 1])
        add_resident(prep["gru_ih"][l - 1])
    for l in range(n_layers):
        add_resident(prep["lstm_hh"][l])
        add_resident(prep["lstm_b"][l])
        add_resident(prep["gru_hh"][l])
        add_resident(prep["gru_bi"][l])
        add_resident(prep["gru_bh"][l])
    add_resident(prep["convpool_w"])
    add_resident(prep["convpool_b"])
    add_resident(prep["fc_w"])
    add_resident(prep["fc_b"])

    out_shapes = (
        jax.ShapeDtypeStruct((Bp, n_out), jnp.float32),            # logits
        jax.ShapeDtypeStruct((Bp, n_out), jnp.float32),            # sigmoid(logits)
        jax.ShapeDtypeStruct((n_layers, Bp, H), jnp.float32),      # lstm h
        jax.ShapeDtypeStruct((n_layers, Bp, H), jnp.float32),      # lstm c
        jax.ShapeDtypeStruct((n_layers, Bp, H), jnp.float32),      # gru h
    )
    out_specs = (
        pl.BlockSpec((Bp, n_out), lambda tb: (0, 0)),
        pl.BlockSpec((Bp, n_out), lambda tb: (0, 0)),
        pl.BlockSpec((n_layers, Bp, H), lambda tb: (0, 0, 0)),
        pl.BlockSpec((n_layers, Bp, H), lambda tb: (0, 0, 0)),
        pl.BlockSpec((n_layers, Bp, H), lambda tb: (0, 0, 0)),
    )

    # explicit VMEM budget from the real footprint (double-buffered inputs + resident outputs)
    in_bytes = sum(a.size * a.dtype.itemsize for a in inputs)
    out_bytes = 2 * Bp * n_out * 4 + 3 * n_layers * Bp * H * 4
    vmem_limit = int(min(max(6 * (in_bytes + out_bytes), 16 * 1024 * 1024), 64 * 1024 * 1024))

    kernel = make_kernel(n_layers, n_hidden, n_out, Bp, t_tile)
    out, sig, lh, lc, gh = pl.pallas_call(
        kernel,
        out_shape=out_shapes,
        grid=(n_blocks,),
        in_specs=in_specs,
        out_specs=out_specs,
        compiler_params=pltpu.CompilerParams(
            dimension_semantics=("arbitrary",),       # recurrence: time axis is sequential
            vmem_limit_bytes=vmem_limit,
        ),
    )(*inputs)

    # un-pad batch
    return (out[:batch], sig[:batch], (lh[:, :batch], lc[:, :batch]), gh[:, :batch])


# --------------------------------------------------------------------------------------------
# Raw (PyTorch-shaped) parameters and a PyTorch-faithful reference (same mixed precision)
# --------------------------------------------------------------------------------------------
def init_params(key, vocab, E, H, n_layers, n_out):
    keys = iter(jax.random.split(key, 8 + 8 * n_layers))

    def u(shape, scale=0.1):
        return jax.random.uniform(next(keys), shape, jnp.float32, -scale, scale)

    params = {"embedding": u((vocab, E), 0.5), "lstm": [], "gru": []}
    for l in range(n_layers):
        in_dim = E if l == 0 else H
        params["lstm"].append(dict(w_ih=u((4 * H, in_dim)), w_hh=u((4 * H, H)),
                                   b_ih=u((4 * H,)), b_hh=u((4 * H,))))
        params["gru"].append(dict(w_ih=u((3 * H, in_dim)), w_hh=u((3 * H, H)),
                                  b_ih=u((3 * H,)), b_hh=u((3 * H,))))
    params["conv_w"] = u((H // 2, H))
    params["conv_b"] = u((H // 2,))
    params["fc_w"] = u((n_out, H // 2))
    params["fc_b"] = u((n_out,))
    return params


def reference_forward(tokens, params, *, n_layers, n_hidden, n_out):
    """Pure-JAX reference mirroring the PyTorch forward (eval mode) with the same mixed
    precision as the kernel: bf16 matmul operands / f32 accumulation for the RNN, f32 head."""
    H = n_hidden
    bf = jnp.bfloat16

    def mm(a, w_t):
        return jnp.dot(a.astype(bf), w_t.astype(bf), preferred_element_type=jnp.float32)

    x = jnp.take(params["embedding"], tokens, axis=0)
    seq_len, B, _ = x.shape
    lh = [jnp.zeros((B, H), jnp.float32) for _ in range(n_layers)]
    lc = [jnp.zeros((B, H), jnp.float32) for _ in range(n_layers)]
    gh = [jnp.zeros((B, H), jnp.float32) for _ in range(n_layers)]
    logits = sig = None
    for t in range(seq_len):
        inp = x[t]
        for l in range(n_layers):
            p = params["lstm"][l]
            gates = mm(inp, p["w_ih"].T) + mm(lh[l], p["w_hh"].T) + p["b_ih"] + p["b_hh"]
            i = jax.nn.sigmoid(gates[:, :H]); f = jax.nn.sigmoid(gates[:, H:2 * H])
            g = jnp.tanh(gates[:, 2 * H:3 * H]); o = jax.nn.sigmoid(gates[:, 3 * H:])
            lc[l] = f * lc[l] + i * g
            lh[l] = o * jnp.tanh(lc[l])
            inp = lh[l]
        lstm_top = inp
        inp = x[t]
        for l in range(n_layers):
            p = params["gru"][l]
            gi = mm(inp, p["w_ih"].T) + p["b_ih"]
            gl = mm(gh[l], p["w_hh"].T) + p["b_hh"]
            r = jax.nn.sigmoid(gi[:, :H] + gl[:, :H])
            z = jax.nn.sigmoid(gi[:, H:2 * H] + gl[:, H:2 * H])
            n = jnp.tanh(gi[:, 2 * H:] + r * gl[:, 2 * H:])
            gh[l] = (1.0 - z) * n + z * gh[l]
            inp = gh[l]
        gru_top = inp
        # head: conv1d(k=1) -> avgpool(2) -> cat -> dropout x2 (identity) -> fc -> sigmoid
        lf = lstm_top @ params["conv_w"].T + params["conv_b"]
        gf = gru_top @ params["conv_w"].T + params["conv_b"]
        lpool = lf.reshape(B, H // 4, 2).mean(-1)
        gpool = gf.reshape(B, H // 4, 2).mean(-1)
        cat = jnp.concatenate([lpool, gpool], axis=1)
        logits = cat @ params["fc_w"].T + params["fc_b"]
        sig = jax.nn.sigmoid(logits)
    return logits, sig, (jnp.stack(lh), jnp.stack(lc)), jnp.stack(gh)


# --------------------------------------------------------------------------------------------
if __name__ == "__main__":
    SEQ, BATCH, VOCAB, EMB, HID, LAYERS, NOUT = 8, 2, 50, 16, 32, 2, 2

    key = jax.random.PRNGKey(0)
    k_tok, k_par = jax.random.split(key)
    tokens = jax.random.randint(k_tok, (SEQ, BATCH), 0, VOCAB, dtype=jnp.int32)
    params = init_params(k_par, VOCAB, EMB, HID, LAYERS, NOUT)

    out, sig, (lh, lc), gh = sentiment_rnn_forward(
        tokens, params, n_layers=LAYERS, n_hidden=HID, n_out=NOUT)
    jax.block_until_ready((out, sig, lh, lc, gh))

    r_out, r_sig, (r_lh, r_lc), r_gh = reference_forward(
        tokens, params, n_layers=LAYERS, n_hidden=HID, n_out=NOUT)

    # tolerance covers f32 reassociation + the exact conv/pool fold (both sides use identical
    # bf16 weight values for the recurrent matmuls, so agreement is tight).
    for name, a, b in [("out", out, r_out), ("sig", sig, r_sig),
                       ("lstm_h", lh, r_lh), ("lstm_c", lc, r_lc), ("gru_h", gh, r_gh)]:
        assert jnp.allclose(a, b, atol=1e-3, rtol=1e-3), (
            name, float(jnp.max(jnp.abs(a - b))))

    print("KERNEL_OK")
</pallas_src>

<mosaic_0001>
module attributes {stable_mosaic.version = 11 : i64} {
  func.func @kernel(%arg0: i32, %arg1: memref<8x8x16xbf16, #tpu.memory_space<vmem>>, %arg2: memref<16x224xbf16, #tpu.memory_space<vmem>>, %arg3: memref<32x128xbf16, #tpu.memory_space<vmem>>, %arg4: memref<32x96xbf16, #tpu.memory_space<vmem>>, %arg5: memref<32x128xbf16, #tpu.memory_space<vmem>>, %arg6: memref<1x128xf32, #tpu.memory_space<vmem>>, %arg7: memref<32x96xbf16, #tpu.memory_space<vmem>>, %arg8: memref<1x96xf32, #tpu.memory_space<vmem>>, %arg9: memref<1x96xf32, #tpu.memory_space<vmem>>, %arg10: memref<32x128xbf16, #tpu.memory_space<vmem>>, %arg11: memref<1x128xf32, #tpu.memory_space<vmem>>, %arg12: memref<32x96xbf16, #tpu.memory_space<vmem>>, %arg13: memref<1x96xf32, #tpu.memory_space<vmem>>, %arg14: memref<1x96xf32, #tpu.memory_space<vmem>>, %arg15: memref<32x8xf32, #tpu.memory_space<vmem>>, %arg16: memref<1x8xf32, #tpu.memory_space<vmem>>, %arg17: memref<16x2xf32, #tpu.memory_space<vmem>>, %arg18: memref<1x2xf32, #tpu.memory_space<vmem>>, %arg19: memref<8x2xf32, #tpu.memory_space<vmem>>, %arg20: memref<8x2xf32, #tpu.memory_space<vmem>>, %arg21: memref<2x8x32xf32, #tpu.memory_space<vmem>>, %arg22: memref<2x8x32xf32, #tpu.memory_space<vmem>>, %arg23: memref<2x8x32xf32, #tpu.memory_space<vmem>>) attributes {dimension_semantics = [#tpu.dimension_semantics<arbitrary>], iteration_bounds = array<i64: 1>, scalar_prefetch = 0 : i64, scratch_operands = 0 : i64, tpu.core_type = #tpu.core_type<tc>, window_params = [{transform_indices = @transform_0, window_bounds = array<i64: 8, 8, 16>}, {pipeline_mode = #tpu.pipeline_mode<synchronous>, transform_indices = @transform_1, window_bounds = array<i64: 16, 224>}, {pipeline_mode = #tpu.pipeline_mode<synchronous>, transform_indices = @transform_2, window_bounds = array<i64: 32, 128>}, {pipeline_mode = #tpu.pipeline_mode<synchronous>, transform_indices = @transform_3, window_bounds = array<i64: 32, 96>}, {pipeline_mode = #tpu.pipeline_mode<synchronous>, transform_indices = @transform_4, window_bounds = array<i64: 32, 128>}, {pipeline_mode = #tpu.pipeline_mode<synchronous>, transform_indices = @transform_5, window_bounds = array<i64: 1, 128>}, {pipeline_mode = #tpu.pipeline_mode<synchronous>, transform_indices = @transform_6, window_bounds = array<i64: 32, 96>}, {pipeline_mode = #tpu.pipeline_mode<synchronous>, transform_indices = @transform_7, window_bounds = array<i64: 1, 96>}, {pipeline_mode = #tpu.pipeline_mode<synchronous>, transform_indices = @transform_8, window_bounds = array<i64: 1, 96>}, {pipeline_mode = #tpu.pipeline_mode<synchronous>, transform_indices = @transform_9, window_bounds = array<i64: 32, 128>}, {pipeline_mode = #tpu.pipeline_mode<synchronous>, transform_indices = @transform_10, window_bounds = array<i64: 1, 128>}, {pipeline_mode = #tpu.pipeline_mode<synchronous>, transform_indices = @transform_11, window_bounds = array<i64: 32, 96>}, {pipeline_mode = #tpu.pipeline_mode<synchronous>, transform_indices = @transform_12, window_bounds = array<i64: 1, 96>}, {pipeline_mode = #tpu.pipeline_mode<synchronous>, transform_indices = @transform_13, window_bounds = array<i64: 1, 96>}, {pipeline_mode = #tpu.pipeline_mode<synchronous>, transform_indices = @transform_14, window_bounds = array<i64: 32, 8>}, {pipeline_mode = #tpu.pipeline_mode<synchronous>, transform_indices = @transform_15, window_bounds = array<i64: 1, 8>}, {pipeline_mode = #tpu.pipeline_mode<synchronous>, transform_indices = @transform_16, window_bounds = array<i64: 16, 2>}, {pipeline_mode = #tpu.pipeline_mode<synchronous>, transform_indices = @transform_17, window_bounds = array<i64: 1, 2>}, {pipeline_mode = #tpu.pipeline_mode<synchronous>, transform_indices = @transform_18, window_bounds = array<i64: 8, 2>}, {pipeline_mode = #tpu.pipeline_mode<synchronous>, transform_indices = @transform_19, window_bounds = array<i64: 8, 2>}, {pipeline_mode = #tpu.pipeline_mode<synchronous>, transform_indices = @transform_20, window_bounds = array<i64: 2, 8, 32>}, {pipeline_mode = #tpu.pipeline_mode<synchronous>, transform_indices = @transform_21, window_bounds = array<i64: 2, 8, 32>}, {pipeline_mode = #tpu.pipeline_mode<synchronous>, transform_indices = @transform_22, window_bounds = array<i64: 2, 8, 32>}]} {
    %c0_i32 = arith.constant 0 : i32
    %0 = arith.cmpi eq, %arg0, %c0_i32 : i32
    %1 = arith.extui %0 : i1 to i32
    %c0_i32_0 = arith.constant 0 : i32
    %2 = arith.cmpi ne, %1, %c0_i32_0 : i32
    scf.if %2 {
      %cst_413 = arith.constant 0.000000e+00 : f32
      %1212 = vector.broadcast %cst_413 : f32 to vector<2x8x32xf32>
      %c0_414 = arith.constant 0 : index
      %c0_415 = arith.constant 0 : index
      %c0_416 = arith.constant 0 : index
      %1213 = vector.load %arg21[%c0_414, %c0_415, %c0_416] : memref<2x8x32xf32, #tpu.memory_space<vmem>>, vector<2x8x32xf32>
      tpu.vector_store %arg21[%c0_414, %c0_415, %c0_416], %1212 {strides = array<i32>} : memref<2x8x32xf32, #tpu.memory_space<vmem>>, vector<2x8x32xf32>,
      %cst_417 = arith.constant 0.000000e+00 : f32
      %1214 = vector.broadcast %cst_417 : f32 to vector<2x8x32xf32>
      %c0_418 = arith.constant 0 : index
      %c0_419 = arith.constant 0 : index
      %c0_420 = arith.constant 0 : index
      %1215 = vector.load %arg22[%c0_418, %c0_419, %c0_420] : memref<2x8x32xf32, #tpu.memory_space<vmem>>, vector<2x8x32xf32>
      tpu.vector_store %arg22[%c0_418, %c0_419, %c0_420], %1214 {strides = array<i32>} : memref<2x8x32xf32, #tpu.memory_space<vmem>>, vector<2x8x32xf32>,
      %cst_421 = arith.constant 0.000000e+00 : f32
      %1216 = vector.broadcast %cst_421 : f32 to vector<2x8x32xf32>
      %c0_422 = arith.constant 0 : index
      %c0_423 = arith.constant 0 : index
      %c0_424 = arith.constant 0 : index
      %1217 = vector.load %arg23[%c0_422, %c0_423, %c0_424] : memref<2x8x32xf32, #tpu.memory_space<vmem>>, vector<2x8x32xf32>
      tpu.vector_store %arg23[%c0_422, %c0_423, %c0_424], %1216 {strides = array<i32>} : memref<2x8x32xf32, #tpu.memory_space<vmem>>, vector<2x8x32xf32>,
      %cst_425 = arith.constant 0.000000e+00 : f32
      %1218 = vector.broadcast %cst_425 : f32 to vector<8x2xf32>
      %c0_426 = arith.constant 0 : index
      %c0_427 = arith.constant 0 : index
      %1219 = vector.load %arg19[%c0_426, %c0_427] : memref<8x2xf32, #tpu.memory_space<vmem>>, vector<8x2xf32>
      tpu.vector_store %arg19[%c0_426, %c0_427], %1218 {strides = array<i32>} : memref<8x2xf32, #tpu.memory_space<vmem>>, vector<8x2xf32>,
      %cst_428 = arith.constant 0.000000e+00 : f32
      %1220 = vector.broadcast %cst_428 : f32 to vector<8x2xf32>
      %c0_429 = arith.constant 0 : index
      %c0_430 = arith.constant 0 : index
      %1221 = vector.load %arg20[%c0_429, %c0_430] : memref<8x2xf32, #tpu.memory_space<vmem>>, vector<8x2xf32>
      tpu.vector_store %arg20[%c0_429, %c0_430], %1220 {strides = array<i32>} : memref<8x2xf32, #tpu.memory_space<vmem>>, vector<8x2xf32>,
    } else {
    }
    %c0 = arith.constant 0 : index
    %c0_1 = arith.constant 0 : index
    %c0_2 = arith.constant 0 : index
    %3 = vector.load %arg21[%c0, %c0_1, %c0_2] : memref<2x8x32xf32, #tpu.memory_space<vmem>>, vector<1x8x32xf32>
    %4 = vector.shape_cast %3 : vector<1x8x32xf32> to vector<8x32xf32>
    %c1 = arith.constant 1 : index
    %c0_3 = arith.constant 0 : index
    %c0_4 = arith.constant 0 : index
    %5 = vector.load %arg21[%c1, %c0_3, %c0_4] : memref<2x8x32xf32, #tpu.memory_space<vmem>>, vector<1x8x32xf32>
    %6 = vector.shape_cast %5 : vector<1x8x32xf32> to vector<8x32xf32>
    %c0_5 = arith.constant 0 : index
    %c0_6 = arith.constant 0 : index
    %c0_7 = arith.constant 0 : index
    %7 = vector.load %arg22[%c0_5, %c0_6, %c0_7] : memref<2x8x32xf32, #tpu.memory_space<vmem>>, vector<1x8x32xf32>
    %8 = vector.shape_cast %7 : vector<1x8x32xf32> to vector<8x32xf32>
    %c1_8 = arith.constant 1 : index
    %c0_9 = arith.constant 0 : index
    %c0_10 = arith.constant 0 : index
    %9 = vector.load %arg22[%c1_8, %c0_9, %c0_10] : memref<2x8x32xf32, #tpu.memory_space<vmem>>, vector<1x8x32xf32>
    %10 = vector.shape_cast %9 : vector<1x8x32xf32> to vector<8x32xf32>
    %c0_11 = arith.constant 0 : index
    %c0_12 = arith.constant 0 : index
    %c0_13 = arith.constant 0 : index
    %11 = vector.load %arg23[%c0_11, %c0_12, %c0_13] : memref<2x8x32xf32, #tpu.memory_space<vmem>>, vector<1x8x32xf32>
    %12 = vector.shape_cast %11 : vector<1x8x32xf32> to vector<8x32xf32>
    %c1_14 = arith.constant 1 : index
    %c0_15 = arith.constant 0 : index
    %c0_16 = arith.constant 0 : index
    %13 = vector.load %arg23[%c1_14, %c0_15, %c0_16] : memref<2x8x32xf32, #tpu.memory_space<vmem>>, vector<1x8x32xf32>
    %14 = vector.shape_cast %13 : vector<1x8x32xf32> to vector<8x32xf32>
    %c0_i32_17 = arith.constant 0 : i32
    %15 = arith.index_cast %c0_i32_17 : i32 to index
    %c0_18 = arith.constant 0 : index
    %c0_19 = arith.constant 0 : index
    %16 = vector.load %arg1[%15, %c0_18, %c0_19] : memref<8x8x16xbf16, #tpu.memory_space<vmem>>, vector<1x8x16xbf16>
    %17 = vector.shape_cast %16 : vector<1x8x16xbf16> to vector<8x16xbf16>
    %c0_20 = arith.constant 0 : index
    %c0_21 = arith.constant 0 : index
    %18 = vector.load %arg2[%c0_20, %c0_21] : memref<16x224xbf16, #tpu.memory_space<vmem>>, vector<16x224xbf16>
    %cst = arith.constant dense<0.000000e+00> : vector<8x224xf32>
    %19 = tpu.matmul %17, %18, %cst {dimension_numbers = #tpu.dot_dimension_numbers<[1], [0], [0], [1], [0, 0, 1, 1], [], []>} : vector<8x16xbf16>, vector<16x224xbf16>, vector<8x224xf32> -> vector<8x224xf32>
    %20 = vector.extract_strided_slice %19 {offsets = [0, 0], sizes = [8, 128], strides = [1, 1]} : vector<8x224xf32> to vector<8x128xf32>
    %21 = vector.extract_strided_slice %19 {offsets = [0, 128], sizes = [8, 96], strides = [1, 1]} : vector<8x224xf32> to vector<8x96xf32>
    %22 = arith.truncf %4 : vector<8x32xf32> to vector<8x32xbf16>
    %c0_22 = arith.constant 0 : index
    %c0_23 = arith.constant 0 : index
    %23 = vector.load %arg5[%c0_22, %c0_23] : memref<32x128xbf16, #tpu.memory_space<vmem>>, vector<32x128xbf16>
    %cst_24 = arith.constant dense<0.000000e+00> : vector<8x128xf32>
    %24 = tpu.matmul %22, %23, %cst_24 {dimension_numbers = #tpu.dot_dimension_numbers<[1], [0], [0], [1], [0, 0, 1, 1], [], []>} : vector<8x32xbf16>, vector<32x128xbf16>, vector<8x128xf32> -> vector<8x128xf32>
    %25 = arith.addf %24, %20 : vector<8x128xf32>
    %c0_25 = arith.constant 0 : index
    %c0_26 = arith.constant 0 : index
    %26 = vector.load %arg6[%c0_25, %c0_26] : memref<1x128xf32, #tpu.memory_space<vmem>>, vector<1x128xf32>
    %27 = vector.broadcast %26 : vector<1x128xf32> to vector<8x128xf32>
    %28 = arith.addf %25, %27 : vector<8x128xf32>
    %29 = vector.extract_strided_slice %28 {offsets = [0, 0], sizes = [8, 32], strides = [1, 1]} : vector<8x128xf32> to vector<8x32xf32>
    %30 = arith.negf %29 : vector<8x32xf32>
    %31 = math.exp %30 : vector<8x32xf32>
    %cst_27 = arith.constant 1.000000e+00 : f32
    %32 = vector.broadcast %cst_27 : f32 to vector<8x32xf32>
    %33 = arith.addf %32, %31 : vector<8x32xf32>
    %34 = arith.divf %32, %33 : vector<8x32xf32>
    %35 = vector.extract_strided_slice %28 {offsets = [0, 32], sizes = [8, 32], strides = [1, 1]} : vector<8x128xf32> to vector<8x32xf32>
    %36 = arith.negf %35 : vector<8x32xf32>
    %37 = math.exp %36 : vector<8x32xf32>
    %cst_28 = arith.constant 1.000000e+00 : f32
    %38 = vector.broadcast %cst_28 : f32 to vector<8x32xf32>
    %39 = arith.addf %38, %37 : vector<8x32xf32>
    %40 = arith.divf %38, %39 : vector<8x32xf32>
    %41 = vector.extract_strided_slice %28 {offsets = [0, 64], sizes = [8, 32], strides = [1, 1]} : vector<8x128xf32> to vector<8x32xf32>
    %42 = math.tanh %41 : vector<8x32xf32>
    %43 = vector.extract_strided_slice %28 {offsets = [0, 96], sizes = [8, 32], strides = [1, 1]} : vector<8x128xf32> to vector<8x32xf32>
    %44 = arith.negf %43 : vector<8x32xf32>
    %45 = math.exp %44 : vector<8x32xf32>
    %cst_29 = arith.constant 1.000000e+00 : f32
    %46 = vector.broadcast %cst_29 : f32 to vector<8x32xf32>
    %47 = arith.addf %46, %45 : vector<8x32xf32>
    %48 = arith.divf %46, %47 : vector<8x32xf32>
    %49 = arith.mulf %40, %8 : vector<8x32xf32>
    %50 = arith.mulf %34, %42 : vector<8x32xf32>
    %51 = arith.addf %49, %50 : vector<8x32xf32>
    %52 = math.tanh %51 : vector<8x32xf32>
    %53 = arith.mulf %48, %52 : vector<8x32xf32>
    %54 = arith.truncf %53 : vector<8x32xf32> to vector<8x32xbf16>
    %55 = arith.truncf %6 : vector<8x32xf32> to vector<8x32xbf16>
    %c0_30 = arith.constant 0 : index
    %c0_31 = arith.constant 0 : index
    %56 = vector.load %arg10[%c0_30, %c0_31] : memref<32x128xbf16, #tpu.memory_space<vmem>>, vector<32x128xbf16>
    %cst_32 = arith.constant dense<0.000000e+00> : vector<8x128xf32>
    %57 = tpu.matmul %55, %56, %cst_32 {dimension_numbers = #tpu.dot_dimension_numbers<[1], [0], [0], [1], [0, 0, 1, 1], [], []>} : vector<8x32xbf16>, vector<32x128xbf16>, vector<8x128xf32> -> vector<8x128xf32>
    %c0_33 = arith.constant 0 : index
    %c0_34 = arith.constant 0 : index
    %58 = vector.load %arg3[%c0_33, %c0_34] : memref<32x128xbf16, #tpu.memory_space<vmem>>, vector<32x128xbf16>
    %cst_35 = arith.constant dense<0.000000e+00> : vector<8x128xf32>
    %59 = tpu.matmul %54, %58, %cst_35 {dimension_numbers = #tpu.dot_dimension_numbers<[1], [0], [0], [1], [0, 0, 1, 1], [], []>} : vector<8x32xbf16>, vector<32x128xbf16>, vector<8x128xf32> -> vector<8x128xf32>
    %60 = arith.addf %57, %59 : vector<8x128xf32>
    %c0_36 = arith.constant 0 : index
    %c0_37 = arith.constant 0 : index
    %61 = vector.load %arg11[%c0_36, %c0_37] : memref<1x128xf32, #tpu.memory_space<vmem>>, vector<1x128xf32>
    %62 = vector.broadcast %61 : vector<1x128xf32> to vector<8x128xf32>
    %63 = arith.addf %60, %62 : vector<8x128xf32>
    %64 = vector.extract_strided_slice %63 {offsets = [0, 0], sizes = [8, 32], strides = [1, 1]} : vector<8x128xf32> to vector<8x32xf32>
    %65 = arith.negf %64 : vector<8x32xf32>
    %66 = math.exp %65 : vector<8x32xf32>
    %cst_38 = arith.constant 1.000000e+00 : f32
    %67 = vector.broadcast %cst_38 : f32 to vector<8x32xf32>
    %68 = arith.addf %67, %66 : vector<8x32xf32>
    %69 = arith.divf %67, %68 : vector<8x32xf32>
    %70 = vector.extract_strided_slice %63 {offsets = [0, 32], sizes = [8, 32], strides = [1, 1]} : vector<8x128xf32> to vector<8x32xf32>
    %71 = arith.negf %70 : vector<8x32xf32>
    %72 = math.exp %71 : vector<8x32xf32>
    %cst_39 = arith.constant 1.000000e+00 : f32
    %73 = vector.broadcast %cst_39 : f32 to vector<8x32xf32>
    %74 = arith.addf %73, %72 : vector<8x32xf32>
    %75 = arith.divf %73, %74 : vector<8x32xf32>
    %76 = vector.extract_strided_slice %63 {offsets = [0, 64], sizes = [8, 32], strides = [1, 1]} : vector<8x128xf32> to vector<8x32xf32>
    %77 = math.tanh %76 : vector<8x32xf32>
    %78 = vector.extract_strided_slice %63 {offsets = [0, 96], sizes = [8, 32], strides = [1, 1]} : vector<8x128xf32> to vector<8x32xf32>
    %79 = arith.negf %78 : vector<8x32xf32>
    %80 = math.exp %79 : vector<8x32xf32>
    %cst_40 = arith.constant 1.000000e+00 : f32
    %81 = vector.broadcast %cst_40 : f32 to vector<8x32xf32>
    %82 = arith.addf %81, %80 : vector<8x32xf32>
    %83 = arith.divf %81, %82 : vector<8x32xf32>
    %84 = arith.mulf %75, %10 : vector<8x32xf32>
    %85 = arith.mulf %69, %77 : vector<8x32xf32>
    %86 = arith.addf %84, %85 : vector<8x32xf32>
    %87 = math.tanh %86 : vector<8x32xf32>
    %88 = arith.mulf %83, %87 : vector<8x32xf32>
    %89 = arith.truncf %12 : vector<8x32xf32> to vector<8x32xbf16>
    %c0_41 = arith.constant 0 : index
    %c0_42 = arith.constant 0 : index
    %90 = vector.load %arg7[%c0_41, %c0_42] : memref<32x96xbf16, #tpu.memory_space<vmem>>, vector<32x96xbf16>
    %cst_43 = arith.constant dense<0.000000e+00> : vector<8x96xf32>
    %91 = tpu.matmul %89, %90, %cst_43 {dimension_numbers = #tpu.dot_dimension_numbers<[1], [0], [0], [1], [0, 0, 1, 1], [], []>} : vector<8x32xbf16>, vector<32x96xbf16>, vector<8x96xf32> -> vector<8x96xf32>
    %c0_44 = arith.constant 0 : index
    %c0_45 = arith.constant 0 : index
    %92 = vector.load %arg9[%c0_44, %c0_45] : memref<1x96xf32, #tpu.memory_space<vmem>>, vector<1x96xf32>
    %93 = vector.broadcast %92 : vector<1x96xf32> to vector<8x96xf32>
    %94 = arith.addf %91, %93 : vector<8x96xf32>
    %c0_46 = arith.constant 0 : index
    %c0_47 = arith.constant 0 : index
    %95 = vector.load %arg8[%c0_46, %c0_47] : memref<1x96xf32, #tpu.memory_space<vmem>>, vector<1x96xf32>
    %96 = vector.broadcast %95 : vector<1x96xf32> to vector<8x96xf32>
    %97 = arith.addf %21, %96 : vector<8x96xf32>
    %98 = vector.extract_strided_slice %97 {offsets = [0, 0], sizes = [8, 32], strides = [1, 1]} : vector<8x96xf32> to vector<8x32xf32>
    %99 = vector.extract_strided_slice %94 {offsets = [0, 0], sizes = [8, 32], strides = [1, 1]} : vector<8x96xf32> to vector<8x32xf32>
    %100 = arith.addf %98, %99 : vector<8x32xf32>
    %101 = arith.negf %100 : vector<8x32xf32>
    %102 = math.exp %101 : vector<8x32xf32>
    %cst_48 = arith.constant 1.000000e+00 : f32
    %103 = vector.broadcast %cst_48 : f32 to vector<8x32xf32>
    %104 = arith.addf %103, %102 : vector<8x32xf32>
    %105 = arith.divf %103, %104 : vector<8x32xf32>
    %106 = vector.extract_strided_slice %97 {offsets = [0, 32], sizes = [8, 32], strides = [1, 1]} : vector<8x96xf32> to vector<8x32xf32>
    %107 = vector.extract_strided_slice %94 {offsets = [0, 32], sizes = [8, 32], strides = [1, 1]} : vector<8x96xf32> to vector<8x32xf32>
    %108 = arith.addf %106, %107 : vector<8x32xf32>
    %109 = arith.negf %108 : vector<8x32xf32>
    %110 = math.exp %109 : vector<8x32xf32>
    %cst_49 = arith.constant 1.000000e+00 : f32
    %111 = vector.broadcast %cst_49 : f32 to vector<8x32xf32>
    %112 = arith.addf %111, %110 : vector<8x32xf32>
    %113 = arith.divf %111, %112 : vector<8x32xf32>
    %114 = vector.extract_strided_slice %97 {offsets = [0, 64], sizes = [8, 32], strides = [1, 1]} : vector<8x96xf32> to vector<8x32xf32>
    %115 = vector.extract_strided_slice %94 {offsets = [0, 64], sizes = [8, 32], strides = [1, 1]} : vector<8x96xf32> to vector<8x32xf32>
    %116 = arith.mulf %105, %115 : vector<8x32xf32>
    %117 = arith.addf %114, %116 : vector<8x32xf32>
    %118 = math.tanh %117 : vector<8x32xf32>
    %cst_50 = arith.constant 1.000000e+00 : f32
    %119 = vector.broadcast %cst_50 : f32 to vector<8x32xf32>
    %120 = arith.subf %119, %113 : vector<8x32xf32>
    %121 = arith.mulf %120, %118 : vector<8x32xf32>
    %122 = arith.mulf %113, %12 : vector<8x32xf32>
    %123 = arith.addf %121, %122 : vector<8x32xf32>
    %124 = arith.truncf %123 : vector<8x32xf32> to vector<8x32xbf16>
    %125 = arith.truncf %14 : vector<8x32xf32> to vector<8x32xbf16>
    %c0_51 = arith.constant 0 : index
    %c0_52 = arith.constant 0 : index
    %126 = vector.load %arg12[%c0_51, %c0_52] : memref<32x96xbf16, #tpu.memory_space<vmem>>, vector<32x96xbf16>
    %cst_53 = arith.constant dense<0.000000e+00> : vector<8x96xf32>
    %127 = tpu.matmul %125, %126, %cst_53 {dimension_numbers = #tpu.dot_dimension_numbers<[1], [0], [0], [1], [0, 0, 1, 1], [], []>} : vector<8x32xbf16>, vector<32x96xbf16>, vector<8x96xf32> -> vector<8x96xf32>
    %c0_54 = arith.constant 0 : index
    %c0_55 = arith.constant 0 : index
    %128 = vector.load %arg14[%c0_54, %c0_55] : memref<1x96xf32, #tpu.memory_space<vmem>>, vector<1x96xf32>
    %129 = vector.broadcast %128 : vector<1x96xf32> to vector<8x96xf32>
    %130 = arith.addf %127, %129 : vector<8x96xf32>
    %c0_56 = arith.constant 0 : index
    %c0_57 = arith.constant 0 : index
    %131 = vector.load %arg4[%c0_56, %c0_57] : memref<32x96xbf16, #tpu.memory_space<vmem>>, vector<32x96xbf16>
    %cst_58 = arith.constant dense<0.000000e+00> : vector<8x96xf32>
    %132 = tpu.matmul %124, %131, %cst_58 {dimension_numbers = #tpu.dot_dimension_numbers<[1], [0], [0], [1], [0, 0, 1, 1], [], []>} : vector<8x32xbf16>, vector<32x96xbf16>, vector<8x96xf32> -> vector<8x96xf32>
    %c0_59 = arith.constant 0 : index
    %c0_60 = arith.constant 0 : index
    %133 = vector.load %arg13[%c0_59, %c0_60] : memref<1x96xf32, #tpu.memory_space<vmem>>, vector<1x96xf32>
    %134 = vector.broadcast %133 : vector<1x96xf32> to vector<8x96xf32>
    %135 = arith.addf %132, %134 : vector<8x96xf32>
    %136 = vector.extract_strided_slice %135 {offsets = [0, 0], sizes = [8, 32], strides = [1, 1]} : vector<8x96xf32> to vector<8x32xf32>
    %137 = vector.extract_strided_slice %130 {offsets = [0, 0], sizes = [8, 32], strides = [1, 1]} : vector<8x96xf32> to vector<8x32xf32>
    %138 = arith.addf %136, %137 : vector<8x32xf32>
    %139 = arith.negf %138 : vector<8x32xf32>
    %140 = math.exp %139 : vector<8x32xf32>
    %cst_61 = arith.constant 1.000000e+00 : f32
    %141 = vector.broadcast %cst_61 : f32 to vector<8x32xf32>
    %142 = arith.addf %141, %140 : vector<8x32xf32>
    %143 = arith.divf %141, %142 : vector<8x32xf32>
    %144 = vector.extract_strided_slice %135 {offsets = [0, 32], sizes = [8, 32], strides = [1, 1]} : vector<8x96xf32> to vector<8x32xf32>
    %145 = vector.extract_strided_slice %130 {offsets = [0, 32], sizes = [8, 32], strides = [1, 1]} : vector<8x96xf32> to vector<8x32xf32>
    %146 = arith.addf %144, %145 : vector<8x32xf32>
    %147 = arith.negf %146 : vector<8x32xf32>
    %148 = math.exp %147 : vector<8x32xf32>
    %cst_62 = arith.constant 1.000000e+00 : f32
    %149 = vector.broadcast %cst_62 : f32 to vector<8x32xf32>
    %150 = arith.addf %149, %148 : vector<8x32xf32>
    %151 = arith.divf %149, %150 : vector<8x32xf32>
    %152 = vector.extract_strided_slice %135 {offsets = [0, 64], sizes = [8, 32], strides = [1, 1]} : vector<8x96xf32> to vector<8x32xf32>
    %153 = vector.extract_strided_slice %130 {offsets = [0, 64], sizes = [8, 32], strides = [1, 1]} : vector<8x96xf32> to vector<8x32xf32>
    %154 = arith.mulf %143, %153 : vector<8x32xf32>
    %155 = arith.addf %152, %154 : vector<8x32xf32>
    %156 = math.tanh %155 : vector<8x32xf32>
    %cst_63 = arith.constant 1.000000e+00 : f32
    %157 = vector.broadcast %cst_63 : f32 to vector<8x32xf32>
    %158 = arith.subf %157, %151 : vector<8x32xf32>
    %159 = arith.mulf %158, %156 : vector<8x32xf32>
    %160 = arith.mulf %151, %14 : vector<8x32xf32>
    %161 = arith.addf %159, %160 : vector<8x32xf32>
    %c1_i32 = arith.constant 1 : i32
    %162 = arith.index_cast %c1_i32 : i32 to index
    %c0_64 = arith.constant 0 : index
    %c0_65 = arith.constant 0 : index
    %163 = vector.load %arg1[%162, %c0_64, %c0_65] : memref<8x8x16xbf16, #tpu.memory_space<vmem>>, vector<1x8x16xbf16>
    %164 = vector.shape_cast %163 : vector<1x8x16xbf16> to vector<8x16xbf16>
    %c0_66 = arith.constant 0 : index
    %c0_67 = arith.constant 0 : index
    %165 = vector.load %arg2[%c0_66, %c0_67] : memref<16x224xbf16, #tpu.memory_space<vmem>>, vector<16x224xbf16>
    %cst_68 = arith.constant dense<0.000000e+00> : vector<8x224xf32>
    %166 = tpu.matmul %164, %165, %cst_68 {dimension_numbers = #tpu.dot_dimension_numbers<[1], [0], [0], [1], [0, 0, 1, 1], [], []>} : vector<8x16xbf16>, vector<16x224xbf16>, vector<8x224xf32> -> vector<8x224xf32>
    %167 = vector.extract_strided_slice %166 {offsets = [0, 0], sizes = [8, 128], strides = [1, 1]} : vector<8x224xf32> to vector<8x128xf32>
    %168 = vector.extract_strided_slice %166 {offsets = [0, 128], sizes = [8, 96], strides = [1, 1]} : vector<8x224xf32> to vector<8x96xf32>
    %169 = arith.truncf %53 : vector<8x32xf32> to vector<8x32xbf16>
    %c0_69 = arith.constant 0 : index
    %c0_70 = arith.constant 0 : index
    %170 = vector.load %arg5[%c0_69, %c0_70] : memref<32x128xbf16, #tpu.memory_space<vmem>>, vector<32x128xbf16>
    %cst_71 = arith.constant dense<0.000000e+00> : vector<8x128xf32>
    %171 = tpu.matmul %169, %170, %cst_71 {dimension_numbers = #tpu.dot_dimension_numbers<[1], [0], [0], [1], [0, 0, 1, 1], [], []>} : vector<8x32xbf16>, vector<32x128xbf16>, vector<8x128xf32> -> vector<8x128xf32>
    %172 = arith.addf %171, %167 : vector<8x128xf32>
    %c0_72 = arith.constant 0 : index
    %c0_73 = arith.constant 0 : index
    %173 = vector.load %arg6[%c0_72, %c0_73] : memref<1x128xf32, #tpu.memory_space<vmem>>, vector<1x128xf32>
    %174 = vector.broadcast %173 : vector<1x128xf32> to vector<8x128xf32>
    %175 = arith.addf %172, %174 : vector<8x128xf32>
    %176 = vector.extract_strided_slice %175 {offsets = [0, 0], sizes = [8, 32], strides = [1, 1]} : vector<8x128xf32> to vector<8x32xf32>
    %177 = arith.negf %176 : vector<8x32xf32>
    %178 = math.exp %177 : vector<8x32xf32>
    %cst_74 = arith.constant 1.000000e+00 : f32
    %179 = vector.broadcast %cst_74 : f32 to vector<8x32xf32>
    %180 = arith.addf %179, %178 : vector<8x32xf32>
    %181 = arith.divf %179, %180 : vector<8x32xf32>
    %182 = vector.extract_strided_slice %175 {offsets = [0, 32], sizes = [8, 32], strides = [1, 1]} : vector<8x128xf32> to vector<8x32xf32>
    %183 = arith.negf %182 : vector<8x32xf32>
    %184 = math.exp %183 : vector<8x32xf32>
    %cst_75 = arith.constant 1.000000e+00 : f32
    %185 = vector.broadcast %cst_75 : f32 to vector<8x32xf32>
    %186 = arith.addf %185, %184 : vector<8x32xf32>
    %187 = arith.divf %185, %186 : vector<8x32xf32>
    %188 = vector.extract_strided_slice %175 {offsets = [0, 64], sizes = [8, 32], strides = [1, 1]} : vector<8x128xf32> to vector<8x32xf32>
    %189 = math.tanh %188 : vector<8x32xf32>
    %190 = vector.extract_strided_slice %175 {offsets = [0, 96], sizes = [8, 32], strides = [1, 1]} : vector<8x128xf32> to vector<8x32xf32>
    %191 = arith.negf %190 : vector<8x32xf32>
    %192 = math.exp %191 : vector<8x32xf32>
    %cst_76 = arith.constant 1.000000e+00 : f32
    %193 = vector.broadcast %cst_76 : f32 to vector<8x32xf32>
    %194 = arith.addf %193, %192 : vector<8x32xf32>
    %195 = arith.divf %193, %194 : vector<8x32xf32>
    %196 = arith.mulf %187, %51 : vector<8x32xf32>
    %197 = arith.mulf %181, %189 : vector<8x32xf32>
    %198 = arith.addf %196, %197 : vector<8x32xf32>
    %199 = math.tanh %198 : vector<8x32xf32>
    %200 = arith.mulf %195, %199 : vector<8x32xf32>
    %201 = arith.truncf %200 : vector<8x32xf32> to vector<8x32xbf16>
    %202 = arith.truncf %88 : vector<8x32xf32> to vector<8x32xbf16>
    %c0_77 = arith.constant 0 : index
    %c0_78 = arith.constant 0 : index
    %203 = vector.load %arg10[%c0_77, %c0_78] : memref<32x128xbf16, #tpu.memory_space<vmem>>, vector<32x128xbf16>
    %cst_79 = arith.constant dense<0.000000e+00> : vector<8x128xf32>
    %204 = tpu.matmul %202, %203, %cst_79 {dimension_numbers = #tpu.dot_dimension_numbers<[1], [0], [0], [1], [0, 0, 1, 1], [], []>} : vector<8x32xbf16>, vector<32x128xbf16>, vector<8x128xf32> -> vector<8x128xf32>
    %c0_80 = arith.constant 0 : index
    %c0_81 = arith.constant 0 : index
    %205 = vector.load %arg3[%c0_80, %c0_81] : memref<32x128xbf16, #tpu.memory_space<vmem>>, vector<32x128xbf16>
    %cst_82 = arith.constant dense<0.000000e+00> : vector<8x128xf32>
    %206 = tpu.matmul %201, %205, %cst_82 {dimension_numbers = #tpu.dot_dimension_numbers<[1], [0], [0], [1], [0, 0, 1, 1], [], []>} : vector<8x32xbf16>, vector<32x128xbf16>, vector<8x128xf32> -> vector<8x128xf32>
    %207 = arith.addf %204, %206 : vector<8x128xf32>
    %c0_83 = arith.constant 0 : index
    %c0_84 = arith.constant 0 : index
    %208 = vector.load %arg11[%c0_83, %c0_84] : memref<1x128xf32, #tpu.memory_space<vmem>>, vector<1x128xf32>
    %209 = vector.broadcast %208 : vector<1x128xf32> to vector<8x128xf32>
    %210 = arith.addf %207, %209 : vector<8x128xf32>
    %211 = vector.extract_strided_slice %210 {offsets = [0, 0], sizes = [8, 32], strides = [1, 1]} : vector<8x128xf32> to vector<8x32xf32>
    %212 = arith.negf %211 : vector<8x32xf32>
    %213 = math.exp %212 : vector<8x32xf32>
    %cst_85 = arith.constant 1.000000e+00 : f32
    %214 = vector.broadcast %cst_85 : f32 to vector<8x32xf32>
    %215 = arith.addf %214, %213 : vector<8x32xf32>
    %216 = arith.divf %214, %215 : vector<8x32xf32>
    %217 = vector.extract_strided_slice %210 {offsets = [0, 32], sizes = [8, 32], strides = [1, 1]} : vector<8x128xf32> to vector<8x32xf32>
    %218 = arith.negf %217 : vector<8x32xf32>
    %219 = math.exp %218 : vector<8x32xf32>
    %cst_86 = arith.constant 1.000000e+00 : f32
    %220 = vector.broadcast %cst_86 : f32 to vector<8x32xf32>
    %221 = arith.addf %220, %219 : vector<8x32xf32>
    %222 = arith.divf %220, %221 : vector<8x32xf32>
    %223 = vector.extract_strided_slice %210 {offsets = [0, 64], sizes = [8, 32], strides = [1, 1]} : vector<8x128xf32> to vector<8x32xf32>
    %224 = math.tanh %223 : vector<8x32xf32>
    %225 = vector.extract_strided_slice %210 {offsets = [0, 96], sizes = [8, 32], strides = [1, 1]} : vector<8x128xf32> to vector<8x32xf32>
    %226 = arith.negf %225 : vector<8x32xf32>
    %227 = math.exp %226 : vector<8x32xf32>
    %cst_87 = arith.constant 1.000000e+00 : f32
    %228 = vector.broadcast %cst_87 : f32 to vector<8x32xf32>
    %229 = arith.addf %228, %227 : vector<8x32xf32>
    %230 = arith.divf %228, %229 : vector<8x32xf32>
    %231 = arith.mulf %222, %86 : vector<8x32xf32>
    %232 = arith.mulf %216, %224 : vector<8x32xf32>
    %233 = arith.addf %231, %232 : vector<8x32xf32>
    %234 = math.tanh %233 : vector<8x32xf32>
    %235 = arith.mulf %230, %234 : vector<8x32xf32>
    %236 = arith.truncf %123 : vector<8x32xf32> to vector<8x32xbf16>
    %c0_88 = arith.constant 0 : index
    %c0_89 = arith.constant 0 : index
    %237 = vector.load %arg7[%c0_88, %c0_89] : memref<32x96xbf16, #tpu.memory_space<vmem>>, vector<32x96xbf16>
    %cst_90 = arith.constant dense<0.000000e+00> : vector<8x96xf32>
    %238 = tpu.matmul %236, %237, %cst_90 {dimension_numbers = #tpu.dot_dimension_numbers<[1], [0], [0], [1], [0, 0, 1, 1], [], []>} : vector<8x32xbf16>, vector<32x96xbf16>, vector<8x96xf32> -> vector<8x96xf32>
    %c0_91 = arith.constant 0 : index
    %c0_92 = arith.constant 0 : index
    %239 = vector.load %arg9[%c0_91, %c0_92] : memref<1x96xf32, #tpu.memory_space<vmem>>, vector<1x96xf32>
    %240 = vector.broadcast %239 : vector<1x96xf32> to vector<8x96xf32>
    %241 = arith.addf %238, %240 : vector<8x96xf32>
    %c0_93 = arith.constant 0 : index
    %c0_94 = arith.constant 0 : index
    %242 = vector.load %arg8[%c0_93, %c0_94] : memref<1x96xf32, #tpu.memory_space<vmem>>, vector<1x96xf32>
    %243 = vector.broadcast %242 : vector<1x96xf32> to vector<8x96xf32>
    %244 = arith.addf %168, %243 : vector<8x96xf32>
    %245 = vector.extract_strided_slice %244 {offsets = [0, 0], sizes = [8, 32], strides = [1, 1]} : vector<8x96xf32> to vector<8x32xf32>
    %246 = vector.extract_strided_slice %241 {offsets = [0, 0], sizes = [8, 32], strides = [1, 1]} : vector<8x96xf32> to vector<8x32xf32>
    %247 = arith.addf %245, %246 : vector<8x32xf32>
    %248 = arith.negf %247 : vector<8x32xf32>
    %249 = math.exp %248 : vector<8x32xf32>
    %cst_95 = arith.constant 1.000000e+00 : f32
    %250 = vector.broadcast %cst_95 : f32 to vector<8x32xf32>
    %251 = arith.addf %250, %249 : vector<8x32xf32>
    %252 = arith.divf %250, %251 : vector<8x32xf32>
    %253 = vector.extract_strided_slice %244 {offsets = [0, 32], sizes = [8, 32], strides = [1, 1]} : vector<8x96xf32> to vector<8x32xf32>
    %254 = vector.extract_strided_slice %241 {offsets = [0, 32], sizes = [8, 32], strides = [1, 1]} : vector<8x96xf32> to vector<8x32xf32>
    %255 = arith.addf %253, %254 : vector<8x32xf32>
    %256 = arith.negf %255 : vector<8x32xf32>
    %257 = math.exp %256 : vector<8x32xf32>
    %cst_96 = arith.constant 1.000000e+00 : f32
    %258 = vector.broadcast %cst_96 : f32 to vector<8x32xf32>
    %259 = arith.addf %258, %257 : vector<8x32xf32>
    %260 = arith.divf %258, %259 : vector<8x32xf32>
    %261 = vector.extract_strided_slice %244 {offsets = [0, 64], sizes = [8, 32], strides = [1, 1]} : vector<8x96xf32> to vector<8x32xf32>
    %262 = vector.extract_strided_slice %241 {offsets = [0, 64], sizes = [8, 32], strides = [1, 1]} : vector<8x96xf32> to vector<8x32xf32>
    %263 = arith.mulf %252, %262 : vector<8x32xf32>
    %264 = arith.addf %261, %263 : vector<8x32xf32>
    %265 = math.tanh %264 : vector<8x32xf32>
    %cst_97 = arith.constant 1.000000e+00 : f32
    %266 = vector.broadcast %cst_97 : f32 to vector<8x32xf32>
    %267 = arith.subf %266, %260 : vector<8x32xf32>
    %268 = arith.mulf %267, %265 : vector<8x32xf32>
    %269 = arith.mulf %260, %123 : vector<8x32xf32>
    %270 = arith.addf %268, %269 : vector<8x32xf32>
    %271 = arith.truncf %270 : vector<8x32xf32> to vector<8x32xbf16>
    %272 = arith.truncf %161 : vector<8x32xf32> to vector<8x32xbf16>
    %c0_98 = arith.constant 0 : index
    %c0_99 = arith.constant 0 : index
    %273 = vector.load %arg12[%c0_98, %c0_99] : memref<32x96xbf16, #tpu.memory_space<vmem>>, vector<32x96xbf16>
    %cst_100 = arith.constant dense<0.000000e+00> : vector<8x96xf32>
    %274 = tpu.matmul %272, %273, %cst_100 {dimension_numbers = #tpu.dot_dimension_numbers<[1], [0], [0], [1], [0, 0, 1, 1], [], []>} : vector<8x32xbf16>, vector<32x96xbf16>, vector<8x96xf32> -> vector<8x96xf32>
    %c0_101 = arith.constant 0 : index
    %c0_102 = arith.constant 0 : index
    %275 = vector.load %arg14[%c0_101, %c0_102] : memref<1x96xf32, #tpu.memory_space<vmem>>, vector<1x96xf32>
    %276 = vector.broadcast %275 : vector<1x96xf32> to vector<8x96xf32>
    %277 = arith.addf %274, %276 : vector<8x96xf32>
    %c0_103 = arith.constant 0 : index
    %c0_104 = arith.constant 0 : index
    %278 = vector.load %arg4[%c0_103, %c0_104] : memref<32x96xbf16, #tpu.memory_space<vmem>>, vector<32x96xbf16>
    %cst_105 = arith.constant dense<0.000000e+00> : vector<8x96xf32>
    %279 = tpu.matmul %271, %278, %cst_105 {dimension_numbers = #tpu.dot_dimension_numbers<[1], [0], [0], [1], [0, 0, 1, 1], [], []>} : vector<8x32xbf16>, vector<32x96xbf16>, vector<8x96xf32> -> vector<8x96xf32>
    %c0_106 = arith.constant 0 : index
    %c0_107 = arith.constant 0 : index
    %280 = vector.load %arg13[%c0_106, %c0_107] : memref<1x96xf32, #tpu.memory_space<vmem>>, vector<1x96xf32>
    %281 = vector.broadcast %280 : vector<1x96xf32> to vector<8x96xf32>
    %282 = arith.addf %279, %281 : vector<8x96xf32>
    %283 = vector.extract_strided_slice %282 {offsets = [0, 0], sizes = [8, 32], strides = [1, 1]} : vector<8x96xf32> to vector<8x32xf32>
    %284 = vector.extract_strided_slice %277 {offsets = [0, 0], sizes = [8, 32], strides = [1, 1]} : vector<8x96xf32> to vector<8x32xf32>
    %285 = arith.addf %283, %284 : vector<8x32xf32>
    %286 = arith.negf %285 : vector<8x32xf32>
    %287 = math.exp %286 : vector<8x32xf32>
    %cst_108 = arith.constant 1.000000e+00 : f32
    %288 = vector.broadcast %cst_108 : f32 to vector<8x32xf32>
    %289 = arith.addf %288, %287 : vector<8x32xf32>
    %290 = arith.divf %288, %289 : vector<8x32xf32>
    %291 = vector.extract_strided_slice %282 {offsets = [0, 32], sizes = [8, 32], strides = [1, 1]} : vector<8x96xf32> to vector<8x32xf32>
    %292 = vector.extract_strided_slice %277 {offsets = [0, 32], sizes = [8, 32], strides = [1, 1]} : vector<8x96xf32> to vector<8x32xf32>
    %293 = arith.addf %291, %292 : vector<8x32xf32>
    %294 = arith.negf %293 : vector<8x32xf32>
    %295 = math.exp %294 : vector<8x32xf32>
    %cst_109 = arith.constant 1.000000e+00 : f32
    %296 = vector.broadcast %cst_109 : f32 to vector<8x32xf32>
    %297 = arith.addf %296, %295 : vector<8x32xf32>
    %298 = arith.divf %296, %297 : vector<8x32xf32>
    %299 = vector.extract_strided_slice %282 {offsets = [0, 64], sizes = [8, 32], strides = [1, 1]} : vector<8x96xf32> to vector<8x32xf32>
    %300 = vector.extract_strided_slice %277 {offsets = [0, 64], sizes = [8, 32], strides = [1, 1]} : vector<8x96xf32> to vector<8x32xf32>
    %301 = arith.mulf %290, %300 : vector<8x32xf32>
    %302 = arith.addf %299, %301 : vector<8x32xf32>
    %303 = math.tanh %302 : vector<8x32xf32>
    %cst_110 = arith.constant 1.000000e+00 : f32
    %304 = vector.broadcast %cst_110 : f32 to vector<8x32xf32>
    %305 = arith.subf %304, %298 : vector<8x32xf32>
    %306 = arith.mulf %305, %303 : vector<8x32xf32>
    %307 = arith.mulf %298, %161 : vector<8x32xf32>
    %308 = arith.addf %306, %307 : vector<8x32xf32>
    %c2_i32 = arith.constant 2 : i32
    %309 = arith.index_cast %c2_i32 : i32 to index
    %c0_111 = arith.constant 0 : index
    %c0_112 = arith.constant 0 : index
    %310 = vector.load %arg1[%309, %c0_111, %c0_112] : memref<8x8x16xbf16, #tpu.memory_space<vmem>>, vector<1x8x16xbf16>
    %311 = vector.shape_cast %310 : vector<1x8x16xbf16> to vector<8x16xbf16>
    %c0_113 = arith.constant 0 : index
    %c0_114 = arith.constant 0 : index
    %312 = vector.load %arg2[%c0_113, %c0_114] : memref<16x224xbf16, #tpu.memory_space<vmem>>, vector<16x224xbf16>
    %cst_115 = arith.constant dense<0.000000e+00> : vector<8x224xf32>
    %313 = tpu.matmul %311, %312, %cst_115 {dimension_numbers = #tpu.dot_dimension_numbers<[1], [0], [0], [1], [0, 0, 1, 1], [], []>} : vector<8x16xbf16>, vector<16x224xbf16>, vector<8x224xf32> -> vector<8x224xf32>
    %314 = vector.extract_strided_slice %313 {offsets = [0, 0], sizes = [8, 128], strides = [1, 1]} : vector<8x224xf32> to vector<8x128xf32>
    %315 = vector.extract_strided_slice %313 {offsets = [0, 128], sizes = [8, 96], strides = [1, 1]} : vector<8x224xf32> to vector<8x96xf32>
    %316 = arith.truncf %200 : vector<8x32xf32> to vector<8x32xbf16>
    %c0_116 = arith.constant 0 : index
    %c0_117 = arith.constant 0 : index
    %317 = vector.load %arg5[%c0_116, %c0_117] : memref<32x128xbf16, #tpu.memory_space<vmem>>, vector<32x128xbf16>
    %cst_118 = arith.constant dense<0.000000e+00> : vector<8x128xf32>
    %318 = tpu.matmul %316, %317, %cst_118 {dimension_numbers = #tpu.dot_dimension_numbers<[1], [0], [0], [1], [0, 0, 1, 1], [], []>} : vector<8x32xbf16>, vector<32x128xbf16>, vector<8x128xf32> -> vector<8x128xf32>
    %319 = arith.addf %318, %314 : vector<8x128xf32>
    %c0_119 = arith.constant 0 : index
    %c0_120 = arith.constant 0 : index
    %320 = vector.load %arg6[%c0_119, %c0_120] : memref<1x128xf32, #tpu.memory_space<vmem>>, vector<1x128xf32>
    %321 = vector.broadcast %320 : vector<1x128xf32> to vector<8x128xf32>
    %322 = arith.addf %319, %321 : vector<8x128xf32>
    %323 = vector.extract_strided_slice %322 {offsets = [0, 0], sizes = [8, 32], strides = [1, 1]} : vector<8x128xf32> to vector<8x32xf32>
    %324 = arith.negf %323 : vector<8x32xf32>
    %325 = math.exp %324 : vector<8x32xf32>
    %cst_121 = arith.constant 1.000000e+00 : f32
    %326 = vector.broadcast %cst_121 : f32 to vector<8x32xf32>
    %327 = arith.addf %326, %325 : vector<8x32xf32>
    %328 = arith.divf %326, %327 : vector<8x32xf32>
    %329 = vector.extract_strided_slice %322 {offsets = [0, 32], sizes = [8, 32], strides = [1, 1]} : vector<8x128xf32> to vector<8x32xf32>
    %330 = arith.negf %329 : vector<8x32xf32>
    %331 = math.exp %330 : vector<8x32xf32>
    %cst_122 = arith.constant 1.000000e+00 : f32
    %332 = vector.broadcast %cst_122 : f32 to vector<8x32xf32>
    %333 = arith.addf %332, %331 : vector<8x32xf32>
    %334 = arith.divf %332, %333 : vector<8x32xf32>
    %335 = vector.extract_strided_slice %322 {offsets = [0, 64], sizes = [8, 32], strides = [1, 1]} : vector<8x128xf32> to vector<8x32xf32>
    %336 = math.tanh %335 : vector<8x32xf32>
    %337 = vector.extract_strided_slice %322 {offsets = [0, 96], sizes = [8, 32], strides = [1, 1]} : vector<8x128xf32> to vector<8x32xf32>
    %338 = arith.negf %337 : vector<8x32xf32>
    %339 = math.exp %338 : vector<8x32xf32>
    %cst_123 = arith.constant 1.000000e+00 : f32
    %340 = vector.broadcast %cst_123 : f32 to vector<8x32xf32>
    %341 = arith.addf %340, %339 : vector<8x32xf32>
    %342 = arith.divf %340, %341 : vector<8x32xf32>
    %343 = arith.mulf %334, %198 : vector<8x32xf32>
    %344 = arith.mulf %328, %336 : vector<8x32xf32>
    %345 = arith.addf %343, %344 : vector<8x32xf32>
    %346 = math.tanh %345 : vector<8x32xf32>
    %347 = arith.mulf %342, %346 : vector<8x32xf32>
    %348 = arith.truncf %347 : vector<8x32xf32> to vector<8x32xbf16>
    %349 = arith.truncf %235 : vector<8x32xf32> to vector<8x32xbf16>
    %c0_124 = arith.constant 0 : index
    %c0_125 = arith.constant 0 : index
    %350 = vector.load %arg10[%c0_124, %c0_125] : memref<32x128xbf16, #tpu.memory_space<vmem>>, vector<32x128xbf16>
    %cst_126 = arith.constant dense<0.000000e+00> : vector<8x128xf32>
    %351 = tpu.matmul %349, %350, %cst_126 {dimension_numbers = #tpu.dot_dimension_numbers<[1], [0], [0], [1], [0, 0, 1, 1], [], []>} : vector<8x32xbf16>, vector<32x128xbf16>, vector<8x128xf32> -> vector<8x128xf32>
    %c0_127 = arith.constant 0 : index
    %c0_128 = arith.constant 0 : index
    %352 = vector.load %arg3[%c0_127, %c0_128] : memref<32x128xbf16, #tpu.memory_space<vmem>>, vector<32x128xbf16>
    %cst_129 = arith.constant dense<0.000000e+00> : vector<8x128xf32>
    %353 = tpu.matmul %348, %352, %cst_129 {dimension_numbers = #tpu.dot_dimension_numbers<[1], [0], [0], [1], [0, 0, 1, 1], [], []>} : vector<8x32xbf16>, vector<32x128xbf16>, vector<8x128xf32> -> vector<8x128xf32>
    %354 = arith.addf %351, %353 : vector<8x128xf32>
    %c0_130 = arith.constant 0 : index
    %c0_131 = arith.constant 0 : index
    %355 = vector.load %arg11[%c0_130, %c0_131] : memref<1x128xf32, #tpu.memory_space<vmem>>, vector<1x128xf32>
    %356 = vector.broadcast %355 : vector<1x128xf32> to vector<8x128xf32>
    %357 = arith.addf %354, %356 : vector<8x128xf32>
    %358 = vector.extract_strided_slice %357 {offsets = [0, 0], sizes = [8, 32], strides = [1, 1]} : vector<8x128xf32> to vector<8x32xf32>
    %359 = arith.negf %358 : vector<8x32xf32>
    %360 = math.exp %359 : vector<8x32xf32>
    %cst_132 = arith.constant 1.000000e+00 : f32
    %361 = vector.broadcast %cst_132 : f32 to vector<8x32xf32>
    %362 = arith.addf %361, %360 : vector<8x32xf32>
    %363 = arith.divf %361, %362 : vector<8x32xf32>
    %364 = vector.extract_strided_slice %357 {offsets = [0, 32], sizes = [8, 32], strides = [1, 1]} : vector<8x128xf32> to vector<8x32xf32>
    %365 = arith.negf %364 : vector<8x32xf32>
    %366 = math.exp %365 : vector<8x32xf32>
    %cst_133 = arith.constant 1.000000e+00 : f32
    %367 = vector.broadcast %cst_133 : f32 to vector<8x32xf32>
    %368 = arith.addf %367, %366 : vector<8x32xf32>
    %369 = arith.divf %367, %368 : vector<8x32xf32>
    %370 = vector.extract_strided_slice %357 {offsets = [0, 64], sizes = [8, 32], strides = [1, 1]} : vector<8x128xf32> to vector<8x32xf32>
    %371 = math.tanh %370 : vector<8x32xf32>
    %372 = vector.extract_strided_slice %357 {offsets = [0, 96], sizes = [8, 32], strides = [1, 1]} : vector<8x128xf32> to vector<8x32xf32>
    %373 = arith.negf %372 : vector<8x32xf32>
    %374 = math.exp %373 : vector<8x32xf32>
    %cst_134 = arith.constant 1.000000e+00 : f32
    %375 = vector.broadcast %cst_134 : f32 to vector<8x32xf32>
    %376 = arith.addf %375, %374 : vector<8x32xf32>
    %377 = arith.divf %375, %376 : vector<8x32xf32>
    %378 = arith.mulf %369, %233 : vector<8x32xf32>
    %379 = arith.mulf %363, %371 : vector<8x32xf32>
    %380 = arith.addf %378, %379 : vector<8x32xf32>
    %381 = math.tanh %380 : vector<8x32xf32>
    %382 = arith.mulf %377, %381 : vector<8x32xf32>
    %383 = arith.truncf %270 : vector<8x32xf32> to vector<8x32xbf16>
    %c0_135 = arith.constant 0 : index
    %c0_136 = arith.constant 0 : index
    %384 = vector.load %arg7[%c0_135, %c0_136] : memref<32x96xbf16, #tpu.memory_space<vmem>>, vector<32x96xbf16>
    %cst_137 = arith.constant dense<0.000000e+00> : vector<8x96xf32>
    %385 = tpu.matmul %383, %384, %cst_137 {dimension_numbers = #tpu.dot_dimension_numbers<[1], [0], [0], [1], [0, 0, 1, 1], [], []>} : vector<8x32xbf16>, vector<32x96xbf16>, vector<8x96xf32> -> vector<8x96xf32>
    %c0_138 = arith.constant 0 : index
    %c0_139 = arith.constant 0 : index
    %386 = vector.load %arg9[%c0_138, %c0_139] : memref<1x96xf32, #tpu.memory_space<vmem>>, vector<1x96xf32>
    %387 = vector.broadcast %386 : vector<1x96xf32> to vector<8x96xf32>
    %388 = arith.addf %385, %387 : vector<8x96xf32>
    %c0_140 = arith.constant 0 : index
    %c0_141 = arith.constant 0 : index
    %389 = vector.load %arg8[%c0_140, %c0_141] : memref<1x96xf32, #tpu.memory_space<vmem>>, vector<1x96xf32>
    %390 = vector.broadcast %389 : vector<1x96xf32> to vector<8x96xf32>
    %391 = arith.addf %315, %390 : vector<8x96xf32>
    %392 = vector.extract_strided_slice %391 {offsets = [0, 0], sizes = [8, 32], strides = [1, 1]} : vector<8x96xf32> to vector<8x32xf32>
    %393 = vector.extract_strided_slice %388 {offsets = [0, 0], sizes = [8, 32], strides = [1, 1]} : vector<8x96xf32> to vector<8x32xf32>
    %394 = arith.addf %392, %393 : vector<8x32xf32>
    %395 = arith.negf %394 : vector<8x32xf32>
    %396 = math.exp %395 : vector<8x32xf32>
    %cst_142 = arith.constant 1.000000e+00 : f32
    %397 = vector.broadcast %cst_142 : f32 to vector<8x32xf32>
    %398 = arith.addf %397, %396 : vector<8x32xf32>
    %399 = arith.divf %397, %398 : vector<8x32xf32>
    %400 = vector.extract_strided_slice %391 {offsets = [0, 32], sizes = [8, 32], strides = [1, 1]} : vector<8x96xf32> to vector<8x32xf32>
    %401 = vector.extract_strided_slice %388 {offsets = [0, 32], sizes = [8, 32], strides = [1, 1]} : vector<8x96xf32> to vector<8x32xf32>
    %402 = arith.addf %400, %401 : vector<8x32xf32>
    %403 = arith.negf %402 : vector<8x32xf32>
    %404 = math.exp %403 : vector<8x32xf32>
    %cst_143 = arith.constant 1.000000e+00 : f32
    %405 = vector.broadcast %cst_143 : f32 to vector<8x32xf32>
    %406 = arith.addf %405, %404 : vector<8x32xf32>
    %407 = arith.divf %405, %406 : vector<8x32xf32>
    %408 = vector.extract_strided_slice %391 {offsets = [0, 64], sizes = [8, 32], strides = [1, 1]} : vector<8x96xf32> to vector<8x32xf32>
    %409 = vector.extract_strided_slice %388 {offsets = [0, 64], sizes = [8, 32], strides = [1, 1]} : vector<8x96xf32> to vector<8x32xf32>
    %410 = arith.mulf %399, %409 : vector<8x32xf32>
    %411 = arith.addf %408, %410 : vector<8x32xf32>
    %412 = math.tanh %411 : vector<8x32xf32>
    %cst_144 = arith.constant 1.000000e+00 : f32
    %413 = vector.broadcast %cst_144 : f32 to vector<8x32xf32>
    %414 = arith.subf %413, %407 : vector<8x32xf32>
    %415 = arith.mulf %414, %412 : vector<8x32xf32>
    %416 = arith.mulf %407, %270 : vector<8x32xf32>
    %417 = arith.addf %415, %416 : vector<8x32xf32>
    %418 = arith.truncf %417 : vector<8x32xf32> to vector<8x32xbf16>
    %419 = arith.truncf %308 : vector<8x32xf32> to vector<8x32xbf16>
    %c0_145 = arith.constant 0 : index
    %c0_146 = arith.constant 0 : index
    %420 = vector.load %arg12[%c0_145, %c0_146] : memref<32x96xbf16, #tpu.memory_space<vmem>>, vector<32x96xbf16>
    %cst_147 = arith.constant dense<0.000000e+00> : vector<8x96xf32>
    %421 = tpu.matmul %419, %420, %cst_147 {dimension_numbers = #tpu.dot_dimension_numbers<[1], [0], [0], [1], [0, 0, 1, 1], [], []>} : vector<8x32xbf16>, vector<32x96xbf16>, vector<8x96xf32> -> vector<8x96xf32>
    %c0_148 = arith.constant 0 : index
    %c0_149 = arith.constant 0 : index
    %422 = vector.load %arg14[%c0_148, %c0_149] : memref<1x96xf32, #tpu.memory_space<vmem>>, vector<1x96xf32>
    %423 = vector.broadcast %422 : vector<1x96xf32> to vector<8x96xf32>
    %424 = arith.addf %421, %423 : vector<8x96xf32>
    %c0_150 = arith.constant 0 : index
    %c0_151 = arith.constant 0 : index
    %425 = vector.load %arg4[%c0_150, %c0_151] : memref<32x96xbf16, #tpu.memory_space<vmem>>, vector<32x96xbf16>
    %cst_152 = arith.constant dense<0.000000e+00> : vector<8x96xf32>
    %426 = tpu.matmul %418, %425, %cst_152 {dimension_numbers = #tpu.dot_dimension_numbers<[1], [0], [0], [1], [0, 0, 1, 1], [], []>} : vector<8x32xbf16>, vector<32x96xbf16>, vector<8x96xf32> -> vector<8x96xf32>
    %c0_153 = arith.constant 0 : index
    %c0_154 = arith.constant 0 : index
    %427 = vector.load %arg13[%c0_153, %c0_154] : memref<1x96xf32, #tpu.memory_space<vmem>>, vector<1x96xf32>
    %428 = vector.broadcast %427 : vector<1x96xf32> to vector<8x96xf32>
    %429 = arith.addf %426, %428 : vector<8x96xf32>
    %430 = vector.extract_strided_slice %429 {offsets = [0, 0], sizes = [8, 32], strides = [1, 1]} : vector<8x96xf32> to vector<8x32xf32>
    %431 = vector.extract_strided_slice %424 {offsets = [0, 0], sizes = [8, 32], strides = [1, 1]} : vector<8x96xf32> to vector<8x32xf32>
    %432 = arith.addf %430, %431 : vector<8x32xf32>
    %433 = arith.negf %432 : vector<8x32xf32>
    %434 = math.exp %433 : vector<8x32xf32>
    %cst_155 = arith.constant 1.000000e+00 : f32
    %435 = vector.broadcast %cst_155 : f32 to vector<8x32xf32>
    %436 = arith.addf %435, %434 : vector<8x32xf32>
    %437 = arith.divf %435, %436 : vector<8x32xf32>
    %438 = vector.extract_strided_slice %429 {offsets = [0, 32], sizes = [8, 32], strides = [1, 1]} : vector<8x96xf32> to vector<8x32xf32>
    %439 = vector.extract_strided_slice %424 {offsets = [0, 32], sizes = [8, 32], strides = [1, 1]} : vector<8x96xf32> to vector<8x32xf32>
    %440 = arith.addf %438, %439 : vector<8x32xf32>
    %441 = arith.negf %440 : vector<8x32xf32>
    %442 = math.exp %441 : vector<8x32xf32>
    %cst_156 = arith.constant 1.000000e+00 : f32
    %443 = vector.broadcast %cst_156 : f32 to vector<8x32xf32>
    %444 = arith.addf %443, %442 : vector<8x32xf32>
    %445 = arith.divf %443, %444 : vector<8x32xf32>
    %446 = vector.extract_strided_slice %429 {offsets = [0, 64], sizes = [8, 32], strides = [1, 1]} : vector<8x96xf32> to vector<8x32xf32>
    %447 = vector.extract_strided_slice %424 {offsets = [0, 64], sizes = [8, 32], strides = [1, 1]} : vector<8x96xf32> to vector<8x32xf32>
    %448 = arith.mulf %437, %447 : vector<8x32xf32>
    %449 = arith.addf %446, %448 : vector<8x32xf32>
    %450 = math.tanh %449 : vector<8x32xf32>
    %cst_157 = arith.constant 1.000000e+00 : f32
    %451 = vector.broadcast %cst_157 : f32 to vector<8x32xf32>
    %452 = arith.subf %451, %445 : vector<8x32xf32>
    %453 = arith.mulf %452, %450 : vector<8x32xf32>
    %454 = arith.mulf %445, %308 : vector<8x32xf32>
    %455 = arith.addf %453, %454 : vector<8x32xf32>
    %c3_i32 = arith.constant 3 : i32
    %456 = arith.index_cast %c3_i32 : i32 to index
    %c0_158 = arith.constant 0 : index
    %c0_159 = arith.constant 0 : index
    %457 = vector.load %arg1[%456, %c0_158, %c0_159] : memref<8x8x16xbf16, #tpu.memory_space<vmem>>, vector<1x8x16xbf16>
    %458 = vector.shape_cast %457 : vector<1x8x16xbf16> to vector<8x16xbf16>
    %c0_160 = arith.constant 0 : index
    %c0_161 = arith.constant 0 : index
    %459 = vector.load %arg2[%c0_160, %c0_161] : memref<16x224xbf16, #tpu.memory_space<vmem>>, vector<16x224xbf16>
    %cst_162 = arith.constant dense<0.000000e+00> : vector<8x224xf32>
    %460 = tpu.matmul %458, %459, %cst_162 {dimension_numbers = #tpu.dot_dimension_numbers<[1], [0], [0], [1], [0, 0, 1, 1], [], []>} : vector<8x16xbf16>, vector<16x224xbf16>, vector<8x224xf32> -> vector<8x224xf32>
    %461 = vector.extract_strided_slice %460 {offsets = [0, 0], sizes = [8, 128], strides = [1, 1]} : vector<8x224xf32> to vector<8x128xf32>
    %462 = vector.extract_strided_slice %460 {offsets = [0, 128], sizes = [8, 96], strides = [1, 1]} : vector<8x224xf32> to vector<8x96xf32>
    %463 = arith.truncf %347 : vector<8x32xf32> to vector<8x32xbf16>
    %c0_163 = arith.constant 0 : index
    %c0_164 = arith.constant 0 : index
    %464 = vector.load %arg5[%c0_163, %c0_164] : memref<32x128xbf16, #tpu.memory_space<vmem>>, vector<32x128xbf16>
    %cst_165 = arith.constant dense<0.000000e+00> : vector<8x128xf32>
    %465 = tpu.matmul %463, %464, %cst_165 {dimension_numbers = #tpu.dot_dimension_numbers<[1], [0], [0], [1], [0, 0, 1, 1], [], []>} : vector<8x32xbf16>, vector<32x128xbf16>, vector<8x128xf32> -> vector<8x128xf32>
    %466 = arith.addf %465, %461 : vector<8x128xf32>
    %c0_166 = arith.constant 0 : index
    %c0_167 = arith.constant 0 : index
    %467 = vector.load %arg6[%c0_166, %c0_167] : memref<1x128xf32, #tpu.memory_space<vmem>>, vector<1x128xf32>
    %468 = vector.broadcast %467 : vector<1x128xf32> to vector<8x128xf32>
    %469 = arith.addf %466, %468 : vector<8x128xf32>
    %470 = vector.extract_strided_slice %469 {offsets = [0, 0], sizes = [8, 32], strides = [1, 1]} : vector<8x128xf32> to vector<8x32xf32>
    %471 = arith.negf %470 : vector<8x32xf32>
    %472 = math.exp %471 : vector<8x32xf32>
    %cst_168 = arith.constant 1.000000e+00 : f32
    %473 = vector.broadcast %cst_168 : f32 to vector<8x32xf32>
    %474 = arith.addf %473, %472 : vector<8x32xf32>
    %475 = arith.divf %473, %474 : vector<8x32xf32>
    %476 = vector.extract_strided_slice %469 {offsets = [0, 32], sizes = [8, 32], strides = [1, 1]} : vector<8x128xf32> to vector<8x32xf32>
    %477 = arith.negf %476 : vector<8x32xf32>
    %478 = math.exp %477 : vector<8x32xf32>
    %cst_169 = arith.constant 1.000000e+00 : f32
    %479 = vector.broadcast %cst_169 : f32 to vector<8x32xf32>
    %480 = arith.addf %479, %478 : vector<8x32xf32>
    %481 = arith.divf %479, %480 : vector<8x32xf32>
    %482 = vector.extract_strided_slice %469 {offsets = [0, 64], sizes = [8, 32], strides = [1, 1]} : vector<8x128xf32> to vector<8x32xf32>
    %483 = math.tanh %482 : vector<8x32xf32>
    %484 = vector.extract_strided_slice %469 {offsets = [0, 96], sizes = [8, 32], strides = [1, 1]} : vector<8x128xf32> to vector<8x32xf32>
    %485 = arith.negf %484 : vector<8x32xf32>
    %486 = math.exp %485 : vector<8x32xf32>
    %cst_170 = arith.constant 1.000000e+00 : f32
    %487 = vector.broadcast %cst_170 : f32 to vector<8x32xf32>
    %488 = arith.addf %487, %486 : vector<8x32xf32>
    %489 = arith.divf %487, %488 : vector<8x32xf32>
    %490 = arith.mulf %481, %345 : vector<8x32xf32>
    %491 = arith.mulf %475, %483 : vector<8x32xf32>
    %492 = arith.addf %490, %491 : vector<8x32xf32>
    %493 = math.tanh %492 : vector<8x32xf32>
    %494 = arith.mulf %489, %493 : vector<8x32xf32>
    %495 = arith.truncf %494 : vector<8x32xf32> to vector<8x32xbf16>
    %496 = arith.truncf %382 : vector<8x32xf32> to vector<8x32xbf16>
    %c0_171 = arith.constant 0 : index
    %c0_172 = arith.constant 0 : index
    %497 = vector.load %arg10[%c0_171, %c0_172] : memref<32x128xbf16, #tpu.memory_space<vmem>>, vector<32x128xbf16>
    %cst_173 = arith.constant dense<0.000000e+00> : vector<8x128xf32>
    %498 = tpu.matmul %496, %497, %cst_173 {dimension_numbers = #tpu.dot_dimension_numbers<[1], [0], [0], [1], [0, 0, 1, 1], [], []>} : vector<8x32xbf16>, vector<32x128xbf16>, vector<8x128xf32> -> vector<8x128xf32>
    %c0_174 = arith.constant 0 : index
    %c0_175 = arith.constant 0 : index
    %499 = vector.load %arg3[%c0_174, %c0_175] : memref<32x128xbf16, #tpu.memory_space<vmem>>, vector<32x128xbf16>
    %cst_176 = arith.constant dense<0.000000e+00> : vector<8x128xf32>
    %500 = tpu.matmul %495, %499, %cst_176 {dimension_numbers = #tpu.dot_dimension_numbers<[1], [0], [0], [1], [0, 0, 1, 1], [], []>} : vector<8x32xbf16>, vector<32x128xbf16>, vector<8x128xf32> -> vector<8x128xf32>
    %501 = arith.addf %498, %500 : vector<8x128xf32>
    %c0_177 = arith.constant 0 : index
    %c0_178 = arith.constant 0 : index
    %502 = vector.load %arg11[%c0_177, %c0_178] : memref<1x128xf32, #tpu.memory_space<vmem>>, vector<1x128xf32>
    %503 = vector.broadcast %502 : vector<1x128xf32> to vector<8x128xf32>
    %504 = arith.addf %501, %503 : vector<8x128xf32>
    %505 = vector.extract_strided_slice %504 {offsets = [0, 0], sizes = [8, 32], strides = [1, 1]} : vector<8x128xf32> to vector<8x32xf32>
    %506 = arith.negf %505 : vector<8x32xf32>
    %507 = math.exp %506 : vector<8x32xf32>
    %cst_179 = arith.constant 1.000000e+00 : f32
    %508 = vector.broadcast %cst_179 : f32 to vector<8x32xf32>
    %509 = arith.addf %508, %507 : vector<8x32xf32>
    %510 = arith.divf %508, %509 : vector<8x32xf32>
    %511 = vector.extract_strided_slice %504 {offsets = [0, 32], sizes = [8, 32], strides = [1, 1]} : vector<8x128xf32> to vector<8x32xf32>
    %512 = arith.negf %511 : vector<8x32xf32>
    %513 = math.exp %512 : vector<8x32xf32>
    %cst_180 = arith.constant 1.000000e+00 : f32
    %514 = vector.broadcast %cst_180 : f32 to vector<8x32xf32>
    %515 = arith.addf %514, %513 : vector<8x32xf32>
    %516 = arith.divf %514, %515 : vector<8x32xf32>
    %517 = vector.extract_strided_slice %504 {offsets = [0, 64], sizes = [8, 32], strides = [1, 1]} : vector<8x128xf32> to vector<8x32xf32>
    %518 = math.tanh %517 : vector<8x32xf32>
    %519 = vector.extract_strided_slice %504 {offsets = [0, 96], sizes = [8, 32], strides = [1, 1]} : vector<8x128xf32> to vector<8x32xf32>
    %520 = arith.negf %519 : vector<8x32xf32>
    %521 = math.exp %520 : vector<8x32xf32>
    %cst_181 = arith.constant 1.000000e+00 : f32
    %522 = vector.broadcast %cst_181 : f32 to vector<8x32xf32>
    %523 = arith.addf %522, %521 : vector<8x32xf32>
    %524 = arith.divf %522, %523 : vector<8x32xf32>
    %525 = arith.mulf %516, %380 : vector<8x32xf32>
    %526 = arith.mulf %510, %518 : vector<8x32xf32>
    %527 = arith.addf %525, %526 : vector<8x32xf32>
    %528 = math.tanh %527 : vector<8x32xf32>
    %529 = arith.mulf %524, %528 : vector<8x32xf32>
    %530 = arith.truncf %417 : vector<8x32xf32> to vector<8x32xbf16>
    %c0_182 = arith.constant 0 : index
    %c0_183 = arith.constant 0 : index
    %531 = vector.load %arg7[%c0_182, %c0_183] : memref<32x96xbf16, #tpu.memory_space<vmem>>, vector<32x96xbf16>
    %cst_184 = arith.constant dense<0.000000e+00> : vector<8x96xf32>
    %532 = tpu.matmul %530, %531, %cst_184 {dimension_numbers = #tpu.dot_dimension_numbers<[1], [0], [0], [1], [0, 0, 1, 1], [], []>} : vector<8x32xbf16>, vector<32x96xbf16>, vector<8x96xf32> -> vector<8x96xf32>
    %c0_185 = arith.constant 0 : index
    %c0_186 = arith.constant 0 : index
    %533 = vector.load %arg9[%c0_185, %c0_186] : memref<1x96xf32, #tpu.memory_space<vmem>>, vector<1x96xf32>
    %534 = vector.broadcast %533 : vector<1x96xf32> to vector<8x96xf32>
    %535 = arith.addf %532, %534 : vector<8x96xf32>
    %c0_187 = arith.constant 0 : index
    %c0_188 = arith.constant 0 : index
    %536 = vector.load %arg8[%c0_187, %c0_188] : memref<1x96xf32, #tpu.memory_space<vmem>>, vector<1x96xf32>
    %537 = vector.broadcast %536 : vector<1x96xf32> to vector<8x96xf32>
    %538 = arith.addf %462, %537 : vector<8x96xf32>
    %539 = vector.extract_strided_slice %538 {offsets = [0, 0], sizes = [8, 32], strides = [1, 1]} : vector<8x96xf32> to vector<8x32xf32>
    %540 = vector.extract_strided_slice %535 {offsets = [0, 0], sizes = [8, 32], strides = [1, 1]} : vector<8x96xf32> to vector<8x32xf32>
    %541 = arith.addf %539, %540 : vector<8x32xf32>
    %542 = arith.negf %541 : vector<8x32xf32>
    %543 = math.exp %542 : vector<8x32xf32>
    %cst_189 = arith.constant 1.000000e+00 : f32
    %544 = vector.broadcast %cst_189 : f32 to vector<8x32xf32>
    %545 = arith.addf %544, %543 : vector<8x32xf32>
    %546 = arith.divf %544, %545 : vector<8x32xf32>
    %547 = vector.extract_strided_slice %538 {offsets = [0, 32], sizes = [8, 32], strides = [1, 1]} : vector<8x96xf32> to vector<8x32xf32>
    %548 = vector.extract_strided_slice %535 {offsets = [0, 32], sizes = [8, 32], strides = [1, 1]} : vector<8x96xf32> to vector<8x32xf32>
    %549 = arith.addf %547, %548 : vector<8x32xf32>
    %550 = arith.negf %549 : vector<8x32xf32>
    %551 = math.exp %550 : vector<8x32xf32>
    %cst_190 = arith.constant 1.000000e+00 : f32
    %552 = vector.broadcast %cst_190 : f32 to vector<8x32xf32>
    %553 = arith.addf %552, %551 : vector<8x32xf32>
    %554 = arith.divf %552, %553 : vector<8x32xf32>
    %555 = vector.extract_strided_slice %538 {offsets = [0, 64], sizes = [8, 32], strides = [1, 1]} : vector<8x96xf32> to vector<8x32xf32>
    %556 = vector.extract_strided_slice %535 {offsets = [0, 64], sizes = [8, 32], strides = [1, 1]} : vector<8x96xf32> to vector<8x32xf32>
    %557 = arith.mulf %546, %556 : vector<8x32xf32>
    %558 = arith.addf %555, %557 : vector<8x32xf32>
    %559 = math.tanh %558 : vector<8x32xf32>
    %cst_191 = arith.constant 1.000000e+00 : f32
    %560 = vector.broadcast %cst_191 : f32 to vector<8x32xf32>
    %561 = arith.subf %560, %554 : vector<8x32xf32>
    %562 = arith.mulf %561, %559 : vector<8x32xf32>
    %563 = arith.mulf %554, %417 : vector<8x32xf32>
    %564 = arith.addf %562, %563 : vector<8x32xf32>
    %565 = arith.truncf %564 : vector<8x32xf32> to vector<8x32xbf16>
    %566 = arith.truncf %455 : vector<8x32xf32> to vector<8x32xbf16>
    %c0_192 = arith.constant 0 : index
    %c0_193 = arith.constant 0 : index
    %567 = vector.load %arg12[%c0_192, %c0_193] : memref<32x96xbf16, #tpu.memory_space<vmem>>, vector<32x96xbf16>
    %cst_194 = arith.constant dense<0.000000e+00> : vector<8x96xf32>
    %568 = tpu.matmul %566, %567, %cst_194 {dimension_numbers = #tpu.dot_dimension_numbers<[1], [0], [0], [1], [0, 0, 1, 1], [], []>} : vector<8x32xbf16>, vector<32x96xbf16>, vector<8x96xf32> -> vector<8x96xf32>
    %c0_195 = arith.constant 0 : index
    %c0_196 = arith.constant 0 : index
    %569 = vector.load %arg14[%c0_195, %c0_196] : memref<1x96xf32, #tpu.memory_space<vmem>>, vector<1x96xf32>
    %570 = vector.broadcast %569 : vector<1x96xf32> to vector<8x96xf32>
    %571 = arith.addf %568, %570 : vector<8x96xf32>
    %c0_197 = arith.constant 0 : index
    %c0_198 = arith.constant 0 : index
    %572 = vector.load %arg4[%c0_197, %c0_198] : memref<32x96xbf16, #tpu.memory_space<vmem>>, vector<32x96xbf16>
    %cst_199 = arith.constant dense<0.000000e+00> : vector<8x96xf32>
    %573 = tpu.matmul %565, %572, %cst_199 {dimension_numbers = #tpu.dot_dimension_numbers<[1], [0], [0], [1], [0, 0, 1, 1], [], []>} : vector<8x32xbf16>, vector<32x96xbf16>, vector<8x96xf32> -> vector<8x96xf32>
    %c0_200 = arith.constant 0 : index
    %c0_201 = arith.constant 0 : index
    %574 = vector.load %arg13[%c0_200, %c0_201] : memref<1x96xf32, #tpu.memory_space<vmem>>, vector<1x96xf32>
    %575 = vector.broadcast %574 : vector<1x96xf32> to vector<8x96xf32>
    %576 = arith.addf %573, %575 : vector<8x96xf32>
    %577 = vector.extract_strided_slice %576 {offsets = [0, 0], sizes = [8, 32], strides = [1, 1]} : vector<8x96xf32> to vector<8x32xf32>
    %578 = vector.extract_strided_slice %571 {offsets = [0, 0], sizes = [8, 32], strides = [1, 1]} : vector<8x96xf32> to vector<8x32xf32>
    %579 = arith.addf %577, %578 : vector<8x32xf32>
    %580 = arith.negf %579 : vector<8x32xf32>
    %581 = math.exp %580 : vector<8x32xf32>
    %cst_202 = arith.constant 1.000000e+00 : f32
    %582 = vector.broadcast %cst_202 : f32 to vector<8x32xf32>
    %583 = arith.addf %582, %581 : vector<8x32xf32>
    %584 = arith.divf %582, %583 : vector<8x32xf32>
    %585 = vector.extract_strided_slice %576 {offsets = [0, 32], sizes = [8, 32], strides = [1, 1]} : vector<8x96xf32> to vector<8x32xf32>
    %586 = vector.extract_strided_slice %571 {offsets = [0, 32], sizes = [8, 32], strides = [1, 1]} : vector<8x96xf32> to vector<8x32xf32>
    %587 = arith.addf %585, %586 : vector<8x32xf32>
    %588 = arith.negf %587 : vector<8x32xf32>
    %589 = math.exp %588 : vector<8x32xf32>
    %cst_203 = arith.constant 1.000000e+00 : f32
    %590 = vector.broadcast %cst_203 : f32 to vector<8x32xf32>
    %591 = arith.addf %590, %589 : vector<8x32xf32>
    %592 = arith.divf %590, %591 : vector<8x32xf32>
    %593 = vector.extract_strided_slice %576 {offsets = [0, 64], sizes = [8, 32], strides = [1, 1]} : vector<8x96xf32> to vector<8x32xf32>
    %594 = vector.extract_strided_slice %571 {offsets = [0, 64], sizes = [8, 32], strides = [1, 1]} : vector<8x96xf32> to vector<8x32xf32>
    %595 = arith.mulf %584, %594 : vector<8x32xf32>
    %596 = arith.addf %593, %595 : vector<8x32xf32>
    %597 = math.tanh %596 : vector<8x32xf32>
    %cst_204 = arith.constant 1.000000e+00 : f32
    %598 = vector.broadcast %cst_204 : f32 to vector<8x32xf32>
    %599 = arith.subf %598, %592 : vector<8x32xf32>
    %600 = arith.mulf %599, %597 : vector<8x32xf32>
    %601 = arith.mulf %592, %455 : vector<8x32xf32>
    %602 = arith.addf %600, %601 : vector<8x32xf32>
    %c4_i32 = arith.constant 4 : i32
    %603 = arith.index_cast %c4_i32 : i32 to index
    %c0_205 = arith.constant 0 : index
    %c0_206 = arith.constant 0 : index
    %604 = vector.load %arg1[%603, %c0_205, %c0_206] : memref<8x8x16xbf16, #tpu.memory_space<vmem>>, vector<1x8x16xbf16>
    %605 = vector.shape_cast %604 : vector<1x8x16xbf16> to vector<8x16xbf16>
    %c0_207 = arith.constant 0 : index
    %c0_208 = arith.constant 0 : index
    %606 = vector.load %arg2[%c0_207, %c0_208] : memref<16x224xbf16, #tpu.memory_space<vmem>>, vector<16x224xbf16>
    %cst_209 = arith.constant dense<0.000000e+00> : vector<8x224xf32>
    %607 = tpu.matmul %605, %606, %cst_209 {dimension_numbers = #tpu.dot_dimension_numbers<[1], [0], [0], [1], [0, 0, 1, 1], [], []>} : vector<8x16xbf16>, vector<16x224xbf16>, vector<8x224xf32> -> vector<8x224xf32>
    %608 = vector.extract_strided_slice %607 {offsets = [0, 0], sizes = [8, 128], strides = [1, 1]} : vector<8x224xf32> to vector<8x128xf32>
    %609 = vector.extract_strided_slice %607 {offsets = [0, 128], sizes = [8, 96], strides = [1, 1]} : vector<8x224xf32> to vector<8x96xf32>
    %610 = arith.truncf %494 : vector<8x32xf32> to vector<8x32xbf16>
    %c0_210 = arith.constant 0 : index
    %c0_211 = arith.constant 0 : index
    %611 = vector.load %arg5[%c0_210, %c0_211] : memref<32x128xbf16, #tpu.memory_space<vmem>>, vector<32x128xbf16>
    %cst_212 = arith.constant dense<0.000000e+00> : vector<8x128xf32>
    %612 = tpu.matmul %610, %611, %cst_212 {dimension_numbers = #tpu.dot_dimension_numbers<[1], [0], [0], [1], [0, 0, 1, 1], [], []>} : vector<8x32xbf16>, vector<32x128xbf16>, vector<8x128xf32> -> vector<8x128xf32>
    %613 = arith.addf %612, %608 : vector<8x128xf32>
    %c0_213 = arith.constant 0 : index
    %c0_214 = arith.constant 0 : index
    %614 = vector.load %arg6[%c0_213, %c0_214] : memref<1x128xf32, #tpu.memory_space<vmem>>, vector<1x128xf32>
    %615 = vector.broadcast %614 : vector<1x128xf32> to vector<8x128xf32>
    %616 = arith.addf %613, %615 : vector<8x128xf32>
    %617 = vector.extract_strided_slice %616 {offsets = [0, 0], sizes = [8, 32], strides = [1, 1]} : vector<8x128xf32> to vector<8x32xf32>
    %618 = arith.negf %617 : vector<8x32xf32>
    %619 = math.exp %618 : vector<8x32xf32>
    %cst_215 = arith.constant 1.000000e+00 : f32
    %620 = vector.broadcast %cst_215 : f32 to vector<8x32xf32>
    %621 = arith.addf %620, %619 : vector<8x32xf32>
    %622 = arith.divf %620, %621 : vector<8x32xf32>
    %623 = vector.extract_strided_slice %616 {offsets = [0, 32], sizes = [8, 32], strides = [1, 1]} : vector<8x128xf32> to vector<8x32xf32>
    %624 = arith.negf %623 : vector<8x32xf32>
    %625 = math.exp %624 : vector<8x32xf32>
    %cst_216 = arith.constant 1.000000e+00 : f32
    %626 = vector.broadcast %cst_216 : f32 to vector<8x32xf32>
    %627 = arith.addf %626, %625 : vector<8x32xf32>
    %628 = arith.divf %626, %627 : vector<8x32xf32>
    %629 = vector.extract_strided_slice %616 {offsets = [0, 64], sizes = [8, 32], strides = [1, 1]} : vector<8x128xf32> to vector<8x32xf32>
    %630 = math.tanh %629 : vector<8x32xf32>
    %631 = vector.extract_strided_slice %616 {offsets = [0, 96], sizes = [8, 32], strides = [1, 1]} : vector<8x128xf32> to vector<8x32xf32>
    %632 = arith.negf %631 : vector<8x32xf32>
    %633 = math.exp %632 : vector<8x32xf32>
    %cst_217 = arith.constant 1.000000e+00 : f32
    %634 = vector.broadcast %cst_217 : f32 to vector<8x32xf32>
    %635 = arith.addf %634, %633 : vector<8x32xf32>
    %636 = arith.divf %634, %635 : vector<8x32xf32>
    %637 = arith.mulf %628, %492 : vector<8x32xf32>
    %638 = arith.mulf %622, %630 : vector<8x32xf32>
    %639 = arith.addf %637, %638 : vector<8x32xf32>
    %640 = math.tanh %639 : vector<8x32xf32>
    %641 = arith.mulf %636, %640 : vector<8x32xf32>
    %642 = arith.truncf %641 : vector<8x32xf32> to vector<8x32xbf16>
    %643 = arith.truncf %529 : vector<8x32xf32> to vector<8x32xbf16>
    %c0_218 = arith.constant 0 : index
    %c0_219 = arith.constant 0 : index
    %644 = vector.load %arg10[%c0_218, %c0_219] : memref<32x128xbf16, #tpu.memory_space<vmem>>, vector<32x128xbf16>
    %cst_220 = arith.constant dense<0.000000e+00> : vector<8x128xf32>
    %645 = tpu.matmul %643, %644, %cst_220 {dimension_numbers = #tpu.dot_dimension_numbers<[1], [0], [0], [1], [0, 0, 1, 1], [], []>} : vector<8x32xbf16>, vector<32x128xbf16>, vector<8x128xf32> -> vector<8x128xf32>
    %c0_221 = arith.constant 0 : index
    %c0_222 = arith.constant 0 : index
    %646 = vector.load %arg3[%c0_221, %c0_222] : memref<32x128xbf16, #tpu.memory_space<vmem>>, vector<32x128xbf16>
    %cst_223 = arith.constant dense<0.000000e+00> : vector<8x128xf32>
    %647 = tpu.matmul %642, %646, %cst_223 {dimension_numbers = #tpu.dot_dimension_numbers<[1], [0], [0], [1], [0, 0, 1, 1], [], []>} : vector<8x32xbf16>, vector<32x128xbf16>, vector<8x128xf32> -> vector<8x128xf32>
    %648 = arith.addf %645, %647 : vector<8x128xf32>
    %c0_224 = arith.constant 0 : index
    %c0_225 = arith.constant 0 : index
    %649 = vector.load %arg11[%c0_224, %c0_225] : memref<1x128xf32, #tpu.memory_space<vmem>>, vector<1x128xf32>
    %650 = vector.broadcast %649 : vector<1x128xf32> to vector<8x128xf32>
    %651 = arith.addf %648, %650 : vector<8x128xf32>
    %652 = vector.extract_strided_slice %651 {offsets = [0, 0], sizes = [8, 32], strides = [1, 1]} : vector<8x128xf32> to vector<8x32xf32>
    %653 = arith.negf %652 : vector<8x32xf32>
    %654 = math.exp %653 : vector<8x32xf32>
    %cst_226 = arith.constant 1.000000e+00 : f32
    %655 = vector.broadcast %cst_226 : f32 to vector<8x32xf32>
    %656 = arith.addf %655, %654 : vector<8x32xf32>
    %657 = arith.divf %655, %656 : vector<8x32xf32>
    %658 = vector.extract_strided_slice %651 {offsets = [0, 32], sizes = [8, 32], strides = [1, 1]} : vector<8x128xf32> to vector<8x32xf32>
    %659 = arith.negf %658 : vector<8x32xf32>
    %660 = math.exp %659 : vector<8x32xf32>
    %cst_227 = arith.constant 1.000000e+00 : f32
    %661 = vector.broadcast %cst_227 : f32 to vector<8x32xf32>
    %662 = arith.addf %661, %660 : vector<8x32xf32>
    %663 = arith.divf %661, %662 : vector<8x32xf32>
    %664 = vector.extract_strided_slice %651 {offsets = [0, 64], sizes = [8, 32], strides = [1, 1]} : vector<8x128xf32> to vector<8x32xf32>
    %665 = math.tanh %664 : vector<8x32xf32>
    %666 = vector.extract_strided_slice %651 {offsets = [0, 96], sizes = [8, 32], strides = [1, 1]} : vector<8x128xf32> to vector<8x32xf32>
    %667 = arith.negf %666 : vector<8x32xf32>
    %668 = math.exp %667 : vector<8x32xf32>
    %cst_228 = arith.constant 1.000000e+00 : f32
    %669 = vector.broadcast %cst_228 : f32 to vector<8x32xf32>
    %670 = arith.addf %669, %668 : vector<8x32xf32>
    %671 = arith.divf %669, %670 : vector<8x32xf32>
    %672 = arith.mulf %663, %527 : vector<8x32xf32>
    %673 = arith.mulf %657, %665 : vector<8x32xf32>
    %674 = arith.addf %672, %673 : vector<8x32xf32>
    %675 = math.tanh %674 : vector<8x32xf32>
    %676 = arith.mulf %671, %675 : vector<8x32xf32>
    %677 = arith.truncf %564 : vector<8x32xf32> to vector<8x32xbf16>
    %c0_229 = arith.constant 0 : index
    %c0_230 = arith.constant 0 : index
    %678 = vector.load %arg7[%c0_229, %c0_230] : memref<32x96xbf16, #tpu.memory_space<vmem>>, vector<32x96xbf16>
    %cst_231 = arith.constant dense<0.000000e+00> : vector<8x96xf32>
    %679 = tpu.matmul %677, %678, %cst_231 {dimension_numbers = #tpu.dot_dimension_numbers<[1], [0], [0], [1], [0, 0, 1, 1], [], []>} : vector<8x32xbf16>, vector<32x96xbf16>, vector<8x96xf32> -> vector<8x96xf32>
    %c0_232 = arith.constant 0 : index
    %c0_233 = arith.constant 0 : index
    %680 = vector.load %arg9[%c0_232, %c0_233] : memref<1x96xf32, #tpu.memory_space<vmem>>, vector<1x96xf32>
    %681 = vector.broadcast %680 : vector<1x96xf32> to vector<8x96xf32>
    %682 = arith.addf %679, %681 : vector<8x96xf32>
    %c0_234 = arith.constant 0 : index
    %c0_235 = arith.constant 0 : index
    %683 = vector.load %arg8[%c0_234, %c0_235] : memref<1x96xf32, #tpu.memory_space<vmem>>, vector<1x96xf32>
    %684 = vector.broadcast %683 : vector<1x96xf32> to vector<8x96xf32>
    %685 = arith.addf %609, %684 : vector<8x96xf32>
    %686 = vector.extract_strided_slice %685 {offsets = [0, 0], sizes = [8, 32], strides = [1, 1]} : vector<8x96xf32> to vector<8x32xf32>
    %687 = vector.extract_strided_slice %682 {offsets = [0, 0], sizes = [8, 32], strides = [1, 1]} : vector<8x96xf32> to vector<8x32xf32>
    %688 = arith.addf %686, %687 : vector<8x32xf32>
    %689 = arith.negf %688 : vector<8x32xf32>
    %690 = math.exp %689 : vector<8x32xf32>
    %cst_236 = arith.constant 1.000000e+00 : f32
    %691 = vector.broadcast %cst_236 : f32 to vector<8x32xf32>
    %692 = arith.addf %691, %690 : vector<8x32xf32>
    %693 = arith.divf %691, %692 : vector<8x32xf32>
    %694 = vector.extract_strided_slice %685 {offsets = [0, 32], sizes = [8, 32], strides = [1, 1]} : vector<8x96xf32> to vector<8x32xf32>
    %695 = vector.extract_strided_slice %682 {offsets = [0, 32], sizes = [8, 32], strides = [1, 1]} : vector<8x96xf32> to vector<8x32xf32>
    %696 = arith.addf %694, %695 : vector<8x32xf32>
    %697 = arith.negf %696 : vector<8x32xf32>
    %698 = math.exp %697 : vector<8x32xf32>
    %cst_237 = arith.constant 1.000000e+00 : f32
    %699 = vector.broadcast %cst_237 : f32 to vector<8x32xf32>
    %700 = arith.addf %699, %698 : vector<8x32xf32>
    %701 = arith.divf %699, %700 : vector<8x32xf32>
    %702 = vector.extract_strided_slice %685 {offsets = [0, 64], sizes = [8, 32], strides = [1, 1]} : vector<8x96xf32> to vector<8x32xf32>
    %703 = vector.extract_strided_slice %682 {offsets = [0, 64], sizes = [8, 32], strides = [1, 1]} : vector<8x96xf32> to vector<8x32xf32>
    %704 = arith.mulf %693, %703 : vector<8x32xf32>
    %705 = arith.addf %702, %704 : vector<8x32xf32>
    %706 = math.tanh %705 : vector<8x32xf32>
    %cst_238 = arith.constant 1.000000e+00 : f32
    %707 = vector.broadcast %cst_238 : f32 to vector<8x32xf32>
    %708 = arith.subf %707, %701 : vector<8x32xf32>
    %709 = arith.mulf %708, %706 : vector<8x32xf32>
    %710 = arith.mulf %701, %564 : vector<8x32xf32>
    %711 = arith.addf %709, %710 : vector<8x32xf32>
    %712 = arith.truncf %711 : vector<8x32xf32> to vector<8x32xbf16>
    %713 = arith.truncf %602 : vector<8x32xf32> to vector<8x32xbf16>
    %c0_239 = arith.constant 0 : index
    %c0_240 = arith.constant 0 : index
    %714 = vector.load %arg12[%c0_239, %c0_240] : memref<32x96xbf16, #tpu.memory_space<vmem>>, vector<32x96xbf16>
    %cst_241 = arith.constant dense<0.000000e+00> : vector<8x96xf32>
    %715 = tpu.matmul %713, %714, %cst_241 {dimension_numbers = #tpu.dot_dimension_numbers<[1], [0], [0], [1], [0, 0, 1, 1], [], []>} : vector<8x32xbf16>, vector<32x96xbf16>, vector<8x96xf32> -> vector<8x96xf32>
    %c0_242 = arith.constant 0 : index
    %c0_243 = arith.constant 0 : index
    %716 = vector.load %arg14[%c0_242, %c0_243] : memref<1x96xf32, #tpu.memory_space<vmem>>, vector<1x96xf32>
    %717 = vector.broadcast %716 : vector<1x96xf32> to vector<8x96xf32>
    %718 = arith.addf %715, %717 : vector<8x96xf32>
    %c0_244 = arith.constant 0 : index
    %c0_245 = arith.constant 0 : index
    %719 = vector.load %arg4[%c0_244, %c0_245] : memref<32x96xbf16, #tpu.memory_space<vmem>>, vector<32x96xbf16>
    %cst_246 = arith.constant dense<0.000000e+00> : vector<8x96xf32>
    %720 = tpu.matmul %712, %719, %cst_246 {dimension_numbers = #tpu.dot_dimension_numbers<[1], [0], [0], [1], [0, 0, 1, 1], [], []>} : vector<8x32xbf16>, vector<32x96xbf16>, vector<8x96xf32> -> vector<8x96xf32>
    %c0_247 = arith.constant 0 : index
    %c0_248 = arith.constant 0 : index
    %721 = vector.load %arg13[%c0_247, %c0_248] : memref<1x96xf32, #tpu.memory_space<vmem>>, vector<1x96xf32>
    %722 = vector.broadcast %721 : vector<1x96xf32> to vector<8x96xf32>
    %723 = arith.addf %720, %722 : vector<8x96xf32>
    %724 = vector.extract_strided_slice %723 {offsets = [0, 0], sizes = [8, 32], strides = [1, 1]} : vector<8x96xf32> to vector<8x32xf32>
    %725 = vector.extract_strided_slice %718 {offsets = [0, 0], sizes = [8, 32], strides = [1, 1]} : vector<8x96xf32> to vector<8x32xf32>
    %726 = arith.addf %724, %725 : vector<8x32xf32>
    %727 = arith.negf %726 : vector<8x32xf32>
    %728 = math.exp %727 : vector<8x32xf32>
    %cst_249 = arith.constant 1.000000e+00 : f32
    %729 = vector.broadcast %cst_249 : f32 to vector<8x32xf32>
    %730 = arith.addf %729, %728 : vector<8x32xf32>
    %731 = arith.divf %729, %730 : vector<8x32xf32>
    %732 = vector.extract_strided_slice %723 {offsets = [0, 32], sizes = [8, 32], strides = [1, 1]} : vector<8x96xf32> to vector<8x32xf32>
    %733 = vector.extract_strided_slice %718 {offsets = [0, 32], sizes = [8, 32], strides = [1, 1]} : vector<8x96xf32> to vector<8x32xf32>
    %734 = arith.addf %732, %733 : vector<8x32xf32>
    %735 = arith.negf %734 : vector<8x32xf32>
    %736 = math.exp %735 : vector<8x32xf32>
    %cst_250 = arith.constant 1.000000e+00 : f32
    %737 = vector.broadcast %cst_250 : f32 to vector<8x32xf32>
    %738 = arith.addf %737, %736 : vector<8x32xf32>
    %739 = arith.divf %737, %738 : vector<8x32xf32>
    %740 = vector.extract_strided_slice %723 {offsets = [0, 64], sizes = [8, 32], strides = [1, 1]} : vector<8x96xf32> to vector<8x32xf32>
    %741 = vector.extract_strided_slice %718 {offsets = [0, 64], sizes = [8, 32], strides = [1, 1]} : vector<8x96xf32> to vector<8x32xf32>
    %742 = arith.mulf %731, %741 : vector<8x32xf32>
    %743 = arith.addf %740, %742 : vector<8x32xf32>
    %744 = math.tanh %743 : vector<8x32xf32>
    %cst_251 = arith.constant 1.000000e+00 : f32
    %745 = vector.broadcast %cst_251 : f32 to vector<8x32xf32>
    %746 = arith.subf %745, %739 : vector<8x32xf32>
    %747 = arith.mulf %746, %744 : vector<8x32xf32>
    %748 = arith.mulf %739, %602 : vector<8x32xf32>
    %749 = arith.addf %747, %748 : vector<8x32xf32>
    %c5_i32 = arith.constant 5 : i32
    %750 = arith.index_cast %c5_i32 : i32 to index
    %c0_252 = arith.constant 0 : index
    %c0_253 = arith.constant 0 : index
    %751 = vector.load %arg1[%750, %c0_252, %c0_253] : memref<8x8x16xbf16, #tpu.memory_space<vmem>>, vector<1x8x16xbf16>
    %752 = vector.shape_cast %751 : vector<1x8x16xbf16> to vector<8x16xbf16>
    %c0_254 = arith.constant 0 : index
    %c0_255 = arith.constant 0 : index
    %753 = vector.load %arg2[%c0_254, %c0_255] : memref<16x224xbf16, #tpu.memory_space<vmem>>, vector<16x224xbf16>
    %cst_256 = arith.constant dense<0.000000e+00> : vector<8x224xf32>
    %754 = tpu.matmul %752, %753, %cst_256 {dimension_numbers = #tpu.dot_dimension_numbers<[1], [0], [0], [1], [0, 0, 1, 1], [], []>} : vector<8x16xbf16>, vector<16x224xbf16>, vector<8x224xf32> -> vector<8x224xf32>
    %755 = vector.extract_strided_slice %754 {offsets = [0, 0], sizes = [8, 128], strides = [1, 1]} : vector<8x224xf32> to vector<8x128xf32>
    %756 = vector.extract_strided_slice %754 {offsets = [0, 128], sizes = [8, 96], strides = [1, 1]} : vector<8x224xf32> to vector<8x96xf32>
    %757 = arith.truncf %641 : vector<8x32xf32> to vector<8x32xbf16>
    %c0_257 = arith.constant 0 : index
    %c0_258 = arith.constant 0 : index
    %758 = vector.load %arg5[%c0_257, %c0_258] : memref<32x128xbf16, #tpu.memory_space<vmem>>, vector<32x128xbf16>
    %cst_259 = arith.constant dense<0.000000e+00> : vector<8x128xf32>
    %759 = tpu.matmul %757, %758, %cst_259 {dimension_numbers = #tpu.dot_dimension_numbers<[1], [0], [0], [1], [0, 0, 1, 1], [], []>} : vector<8x32xbf16>, vector<32x128xbf16>, vector<8x128xf32> -> vector<8x128xf32>
    %760 = arith.addf %759, %755 : vector<8x128xf32>
    %c0_260 = arith.constant 0 : index
    %c0_261 = arith.constant 0 : index
    %761 = vector.load %arg6[%c0_260, %c0_261] : memref<1x128xf32, #tpu.memory_space<vmem>>, vector<1x128xf32>
    %762 = vector.broadcast %761 : vector<1x128xf32> to vector<8x128xf32>
    %763 = arith.addf %760, %762 : vector<8x128xf32>
    %764 = vector.extract_strided_slice %763 {offsets = [0, 0], sizes = [8, 32], strides = [1, 1]} : vector<8x128xf32> to vector<8x32xf32>
    %765 = arith.negf %764 : vector<8x32xf32>
    %766 = math.exp %765 : vector<8x32xf32>
    %cst_262 = arith.constant 1.000000e+00 : f32
    %767 = vector.broadcast %cst_262 : f32 to vector<8x32xf32>
    %768 = arith.addf %767, %766 : vector<8x32xf32>
    %769 = arith.divf %767, %768 : vector<8x32xf32>
    %770 = vector.extract_strided_slice %763 {offsets = [0, 32], sizes = [8, 32], strides = [1, 1]} : vector<8x128xf32> to vector<8x32xf32>
    %771 = arith.negf %770 : vector<8x32xf32>
    %772 = math.exp %771 : vector<8x32xf32>
    %cst_263 = arith.constant 1.000000e+00 : f32
    %773 = vector.broadcast %cst_263 : f32 to vector<8x32xf32>
    %774 = arith.addf %773, %772 : vector<8x32xf32>
    %775 = arith.divf %773, %774 : vector<8x32xf32>
    %776 = vector.extract_strided_slice %763 {offsets = [0, 64], sizes = [8, 32], strides = [1, 1]} : vector<8x128xf32> to vector<8x32xf32>
    %777 = math.tanh %776 : vector<8x32xf32>
    %778 = vector.extract_strided_slice %763 {offsets = [0, 96], sizes = [8, 32], strides = [1, 1]} : vector<8x128xf32> to vector<8x32xf32>
    %779 = arith.negf %778 : vector<8x32xf32>
    %780 = math.exp %779 : vector<8x32xf32>
    %cst_264 = arith.constant 1.000000e+00 : f32
    %781 = vector.broadcast %cst_264 : f32 to vector<8x32xf32>
    %782 = arith.addf %781, %780 : vector<8x32xf32>
    %783 = arith.divf %781, %782 : vector<8x32xf32>
    %784 = arith.mulf %775, %639 : vector<8x32xf32>
    %785 = arith.mulf %769, %777 : vector<8x32xf32>
    %786 = arith.addf %784, %785 : vector<8x32xf32>
    %787 = math.tanh %786 : vector<8x32xf32>
    %788 = arith.mulf %783, %787 : vector<8x32xf32>
    %789 = arith.truncf %788 : vector<8x32xf32> to vector<8x32xbf16>
    %790 = arith.truncf %676 : vector<8x32xf32> to vector<8x32xbf16>
    %c0_265 = arith.constant 0 : index
    %c0_266 = arith.constant 0 : index
    %791 = vector.load %arg10[%c0_265, %c0_266] : memref<32x128xbf16, #tpu.memory_space<vmem>>, vector<32x128xbf16>
    %cst_267 = arith.constant dense<0.000000e+00> : vector<8x128xf32>
    %792 = tpu.matmul %790, %791, %cst_267 {dimension_numbers = #tpu.dot_dimension_numbers<[1], [0], [0], [1], [0, 0, 1, 1], [], []>} : vector<8x32xbf16>, vector<32x128xbf16>, vector<8x128xf32> -> vector<8x128xf32>
    %c0_268 = arith.constant 0 : index
    %c0_269 = arith.constant 0 : index
    %793 = vector.load %arg3[%c0_268, %c0_269] : memref<32x128xbf16, #tpu.memory_space<vmem>>, vector<32x128xbf16>
    %cst_270 = arith.constant dense<0.000000e+00> : vector<8x128xf32>
    %794 = tpu.matmul %789, %793, %cst_270 {dimension_numbers = #tpu.dot_dimension_numbers<[1], [0], [0], [1], [0, 0, 1, 1], [], []>} : vector<8x32xbf16>, vector<32x128xbf16>, vector<8x128xf32> -> vector<8x128xf32>
    %795 = arith.addf %792, %794 : vector<8x128xf32>
    %c0_271 = arith.constant 0 : index
    %c0_272 = arith.constant 0 : index
    %796 = vector.load %arg11[%c0_271, %c0_272] : memref<1x128xf32, #tpu.memory_space<vmem>>, vector<1x128xf32>
    %797 = vector.broadcast %796 : vector<1x128xf32> to vector<8x128xf32>
    %798 = arith.addf %795, %797 : vector<8x128xf32>
    %799 = vector.extract_strided_slice %798 {offsets = [0, 0], sizes = [8, 32], strides = [1, 1]} : vector<8x128xf32> to vector<8x32xf32>
    %800 = arith.negf %799 : vector<8x32xf32>
    %801 = math.exp %800 : vector<8x32xf32>
    %cst_273 = arith.constant 1.000000e+00 : f32
    %802 = vector.broadcast %cst_273 : f32 to vector<8x32xf32>
    %803 = arith.addf %802, %801 : vector<8x32xf32>
    %804 = arith.divf %802, %803 : vector<8x32xf32>
    %805 = vector.extract_strided_slice %798 {offsets = [0, 32], sizes = [8, 32], strides = [1, 1]} : vector<8x128xf32> to vector<8x32xf32>
    %806 = arith.negf %805 : vector<8x32xf32>
    %807 = math.exp %806 : vector<8x32xf32>
    %cst_274 = arith.constant 1.000000e+00 : f32
    %808 = vector.broadcast %cst_274 : f32 to vector<8x32xf32>
    %809 = arith.addf %808, %807 : vector<8x32xf32>
    %810 = arith.divf %808, %809 : vector<8x32xf32>
    %811 = vector.extract_strided_slice %798 {offsets = [0, 64], sizes = [8, 32], strides = [1, 1]} : vector<8x128xf32> to vector<8x32xf32>
    %812 = math.tanh %811 : vector<8x32xf32>
    %813 = vector.extract_strided_slice %798 {offsets = [0, 96], sizes = [8, 32], strides = [1, 1]} : vector<8x128xf32> to vector<8x32xf32>
    %814 = arith.negf %813 : vector<8x32xf32>
    %815 = math.exp %814 : vector<8x32xf32>
    %cst_275 = arith.constant 1.000000e+00 : f32
    %816 = vector.broadcast %cst_275 : f32 to vector<8x32xf32>
    %817 = arith.addf %816, %815 : vector<8x32xf32>
    %818 = arith.divf %816, %817 : vector<8x32xf32>
    %819 = arith.mulf %810, %674 : vector<8x32xf32>
    %820 = arith.mulf %804, %812 : vector<8x32xf32>
    %821 = arith.addf %819, %820 : vector<8x32xf32>
    %822 = math.tanh %821 : vector<8x32xf32>
    %823 = arith.mulf %818, %822 : vector<8x32xf32>
    %824 = arith.truncf %711 : vector<8x32xf32> to vector<8x32xbf16>
    %c0_276 = arith.constant 0 : index
    %c0_277 = arith.constant 0 : index
    %825 = vector.load %arg7[%c0_276, %c0_277] : memref<32x96xbf16, #tpu.memory_space<vmem>>, vector<32x96xbf16>
    %cst_278 = arith.constant dense<0.000000e+00> : vector<8x96xf32>
    %826 = tpu.matmul %824, %825, %cst_278 {dimension_numbers = #tpu.dot_dimension_numbers<[1], [0], [0], [1], [0, 0, 1, 1], [], []>} : vector<8x32xbf16>, vector<32x96xbf16>, vector<8x96xf32> -> vector<8x96xf32>
    %c0_279 = arith.constant 0 : index
    %c0_280 = arith.constant 0 : index
    %827 = vector.load %arg9[%c0_279, %c0_280] : memref<1x96xf32, #tpu.memory_space<vmem>>, vector<1x96xf32>
    %828 = vector.broadcast %827 : vector<1x96xf32> to vector<8x96xf32>
    %829 = arith.addf %826, %828 : vector<8x96xf32>
    %c0_281 = arith.constant 0 : index
    %c0_282 = arith.constant 0 : index
    %830 = vector.load %arg8[%c0_281, %c0_282] : memref<1x96xf32, #tpu.memory_space<vmem>>, vector<1x96xf32>
    %831 = vector.broadcast %830 : vector<1x96xf32> to vector<8x96xf32>
    %832 = arith.addf %756, %831 : vector<8x96xf32>
    %833 = vector.extract_strided_slice %832 {offsets = [0, 0], sizes = [8, 32], strides = [1, 1]} : vector<8x96xf32> to vector<8x32xf32>
    %834 = vector.extract_strided_slice %829 {offsets = [0, 0], sizes = [8, 32], strides = [1, 1]} : vector<8x96xf32> to vector<8x32xf32>
    %835 = arith.addf %833, %834 : vector<8x32xf32>
    %836 = arith.negf %835 : vector<8x32xf32>
    %837 = math.exp %836 : vector<8x32xf32>
    %cst_283 = arith.constant 1.000000e+00 : f32
    %838 = vector.broadcast %cst_283 : f32 to vector<8x32xf32>
    %839 = arith.addf %838, %837 : vector<8x32xf32>
    %840 = arith.divf %838, %839 : vector<8x32xf32>
    %841 = vector.extract_strided_slice %832 {offsets = [0, 32], sizes = [8, 32], strides = [1, 1]} : vector<8x96xf32> to vector<8x32xf32>
    %842 = vector.extract_strided_slice %829 {offsets = [0, 32], sizes = [8, 32], strides = [1, 1]} : vector<8x96xf32> to vector<8x32xf32>
    %843 = arith.addf %841, %842 : vector<8x32xf32>
    %844 = arith.negf %843 : vector<8x32xf32>
    %845 = math.exp %844 : vector<8x32xf32>
    %cst_284 = arith.constant 1.000000e+00 : f32
    %846 = vector.broadcast %cst_284 : f32 to vector<8x32xf32>
    %847 = arith.addf %846, %845 : vector<8x32xf32>
    %848 = arith.divf %846, %847 : vector<8x32xf32>
    %849 = vector.extract_strided_slice %832 {offsets = [0, 64], sizes = [8, 32], strides = [1, 1]} : vector<8x96xf32> to vector<8x32xf32>
    %850 = vector.extract_strided_slice %829 {offsets = [0, 64], sizes = [8, 32], strides = [1, 1]} : vector<8x96xf32> to vector<8x32xf32>
    %851 = arith.mulf %840, %850 : vector<8x32xf32>
    %852 = arith.addf %849, %851 : vector<8x32xf32>
    %853 = math.tanh %852 : vector<8x32xf32>
    %cst_285 = arith.constant 1.000000e+00 : f32
    %854 = vector.broadcast %cst_285 : f32 to vector<8x32xf32>
    %855 = arith.subf %854, %848 : vector<8x32xf32>
    %856 = arith.mulf %855, %853 : vector<8x32xf32>
    %857 = arith.mulf %848, %711 : vector<8x32xf32>
    %858 = arith.addf %856, %857 : vector<8x32xf32>
    %859 = arith.truncf %858 : vector<8x32xf32> to vector<8x32xbf16>
    %860 = arith.truncf %749 : vector<8x32xf32> to vector<8x32xbf16>
    %c0_286 = arith.constant 0 : index
    %c0_287 = arith.constant 0 : index
    %861 = vector.load %arg12[%c0_286, %c0_287] : memref<32x96xbf16, #tpu.memory_space<vmem>>, vector<32x96xbf16>
    %cst_288 = arith.constant dense<0.000000e+00> : vector<8x96xf32>
    %862 = tpu.matmul %860, %861, %cst_288 {dimension_numbers = #tpu.dot_dimension_numbers<[1], [0], [0], [1], [0, 0, 1, 1], [], []>} : vector<8x32xbf16>, vector<32x96xbf16>, vector<8x96xf32> -> vector<8x96xf32>
    %c0_289 = arith.constant 0 : index
    %c0_290 = arith.constant 0 : index
    %863 = vector.load %arg14[%c0_289, %c0_290] : memref<1x96xf32, #tpu.memory_space<vmem>>, vector<1x96xf32>
    %864 = vector.broadcast %863 : vector<1x96xf32> to vector<8x96xf32>
    %865 = arith.addf %862, %864 : vector<8x96xf32>
    %c0_291 = arith.constant 0 : index
    %c0_292 = arith.constant 0 : index
    %866 = vector.load %arg4[%c0_291, %c0_292] : memref<32x96xbf16, #tpu.memory_space<vmem>>, vector<32x96xbf16>
    %cst_293 = arith.constant dense<0.000000e+00> : vector<8x96xf32>
    %867 = tpu.matmul %859, %866, %cst_293 {dimension_numbers = #tpu.dot_dimension_numbers<[1], [0], [0], [1], [0, 0, 1, 1], [], []>} : vector<8x32xbf16>, vector<32x96xbf16>, vector<8x96xf32> -> vector<8x96xf32>
    %c0_294 = arith.constant 0 : index
    %c0_295 = arith.constant 0 : index
    %868 = vector.load %arg13[%c0_294, %c0_295] : memref<1x96xf32, #tpu.memory_space<vmem>>, vector<1x96xf32>
    %869 = vector.broadcast %868 : vector<1x96xf32> to vector<8x96xf32>
    %870 = arith.addf %867, %869 : vector<8x96xf32>
    %871 = vector.extract_strided_slice %870 {offsets = [0, 0], sizes = [8, 32], strides = [1, 1]} : vector<8x96xf32> to vector<8x32xf32>
    %872 = vector.extract_strided_slice %865 {offsets = [0, 0], sizes = [8, 32], strides = [1, 1]} : vector<8x96xf32> to vector<8x32xf32>
    %873 = arith.addf %871, %872 : vector<8x32xf32>
    %874 = arith.negf %873 : vector<8x32xf32>
    %875 = math.exp %874 : vector<8x32xf32>
    %cst_296 = arith.constant 1.000000e+00 : f32
    %876 = vector.broadcast %cst_296 : f32 to vector<8x32xf32>
    %877 = arith.addf %876, %875 : vector<8x32xf32>
    %878 = arith.divf %876, %877 : vector<8x32xf32>
    %879 = vector.extract_strided_slice %870 {offsets = [0, 32], sizes = [8, 32], strides = [1, 1]} : vector<8x96xf32> to vector<8x32xf32>
    %880 = vector.extract_strided_slice %865 {offsets = [0, 32], sizes = [8, 32], strides = [1, 1]} : vector<8x96xf32> to vector<8x32xf32>
    %881 = arith.addf %879, %880 : vector<8x32xf32>
    %882 = arith.negf %881 : vector<8x32xf32>
    %883 = math.exp %882 : vector<8x32xf32>
    %cst_297 = arith.constant 1.000000e+00 : f32
    %884 = vector.broadcast %cst_297 : f32 to vector<8x32xf32>
    %885 = arith.addf %884, %883 : vector<8x32xf32>
    %886 = arith.divf %884, %885 : vector<8x32xf32>
    %887 = vector.extract_strided_slice %870 {offsets = [0, 64], sizes = [8, 32], strides = [1, 1]} : vector<8x96xf32> to vector<8x32xf32>
    %888 = vector.extract_strided_slice %865 {offsets = [0, 64], sizes = [8, 32], strides = [1, 1]} : vector<8x96xf32> to vector<8x32xf32>
    %889 = arith.mulf %878, %888 : vector<8x32xf32>
    %890 = arith.addf %887, %889 : vector<8x32xf32>
    %891 = math.tanh %890 : vector<8x32xf32>
    %cst_298 = arith.constant 1.000000e+00 : f32
    %892 = vector.broadcast %cst_298 : f32 to vector<8x32xf32>
    %893 = arith.subf %892, %886 : vector<8x32xf32>
    %894 = arith.mulf %893, %891 : vector<8x32xf32>
    %895 = arith.mulf %886, %749 : vector<8x32xf32>
    %896 = arith.addf %894, %895 : vector<8x32xf32>
    %c6_i32 = arith.constant 6 : i32
    %897 = arith.index_cast %c6_i32 : i32 to index
    %c0_299 = arith.constant 0 : index
    %c0_300 = arith.constant 0 : index
    %898 = vector.load %arg1[%897, %c0_299, %c0_300] : memref<8x8x16xbf16, #tpu.memory_space<vmem>>, vector<1x8x16xbf16>
    %899 = vector.shape_cast %898 : vector<1x8x16xbf16> to vector<8x16xbf16>
    %c0_301 = arith.constant 0 : index
    %c0_302 = arith.constant 0 : index
    %900 = vector.load %arg2[%c0_301, %c0_302] : memref<16x224xbf16, #tpu.memory_space<vmem>>, vector<16x224xbf16>
    %cst_303 = arith.constant dense<0.000000e+00> : vector<8x224xf32>
    %901 = tpu.matmul %899, %900, %cst_303 {dimension_numbers = #tpu.dot_dimension_numbers<[1], [0], [0], [1], [0, 0, 1, 1], [], []>} : vector<8x16xbf16>, vector<16x224xbf16>, vector<8x224xf32> -> vector<8x224xf32>
    %902 = vector.extract_strided_slice %901 {offsets = [0, 0], sizes = [8, 128], strides = [1, 1]} : vector<8x224xf32> to vector<8x128xf32>
    %903 = vector.extract_strided_slice %901 {offsets = [0, 128], sizes = [8, 96], strides = [1, 1]} : vector<8x224xf32> to vector<8x96xf32>
    %904 = arith.truncf %788 : vector<8x32xf32> to vector<8x32xbf16>
    %c0_304 = arith.constant 0 : index
    %c0_305 = arith.constant 0 : index
    %905 = vector.load %arg5[%c0_304, %c0_305] : memref<32x128xbf16, #tpu.memory_space<vmem>>, vector<32x128xbf16>
    %cst_306 = arith.constant dense<0.000000e+00> : vector<8x128xf32>
    %906 = tpu.matmul %904, %905, %cst_306 {dimension_numbers = #tpu.dot_dimension_numbers<[1], [0], [0], [1], [0, 0, 1, 1], [], []>} : vector<8x32xbf16>, vector<32x128xbf16>, vector<8x128xf32> -> vector<8x128xf32>
    %907 = arith.addf %906, %902 : vector<8x128xf32>
    %c0_307 = arith.constant 0 : index
    %c0_308 = arith.constant 0 : index
    %908 = vector.load %arg6[%c0_307, %c0_308] : memref<1x128xf32, #tpu.memory_space<vmem>>, vector<1x128xf32>
    %909 = vector.broadcast %908 : vector<1x128xf32> to vector<8x128xf32>
    %910 = arith.addf %907, %909 : vector<8x128xf32>
    %911 = vector.extract_strided_slice %910 {offsets = [0, 0], sizes = [8, 32], strides = [1, 1]} : vector<8x128xf32> to vector<8x32xf32>
    %912 = arith.negf %911 : vector<8x32xf32>
    %913 = math.exp %912 : vector<8x32xf32>
    %cst_309 = arith.constant 1.000000e+00 : f32
    %914 = vector.broadcast %cst_309 : f32 to vector<8x32xf32>
    %915 = arith.addf %914, %913 : vector<8x32xf32>
    %916 = arith.divf %914, %915 : vector<8x32xf32>
    %917 = vector.extract_strided_slice %910 {offsets = [0, 32], sizes = [8, 32], strides = [1, 1]} : vector<8x128xf32> to vector<8x32xf32>
    %918 = arith.negf %917 : vector<8x32xf32>
    %919 = math.exp %918 : vector<8x32xf32>
    %cst_310 = arith.constant 1.000000e+00 : f32
    %920 = vector.broadcast %cst_310 : f32 to vector<8x32xf32>
    %921 = arith.addf %920, %919 : vector<8x32xf32>
    %922 = arith.divf %920, %921 : vector<8x32xf32>
    %923 = vector.extract_strided_slice %910 {offsets = [0, 64], sizes = [8, 32], strides = [1, 1]} : vector<8x128xf32> to vector<8x32xf32>
    %924 = math.tanh %923 : vector<8x32xf32>
    %925 = vector.extract_strided_slice %910 {offsets = [0, 96], sizes = [8, 32], strides = [1, 1]} : vector<8x128xf32> to vector<8x32xf32>
    %926 = arith.negf %925 : vector<8x32xf32>
    %927 = math.exp %926 : vector<8x32xf32>
    %cst_311 = arith.constant 1.000000e+00 : f32
    %928 = vector.broadcast %cst_311 : f32 to vector<8x32xf32>
    %929 = arith.addf %928, %927 : vector<8x32xf32>
    %930 = arith.divf %928, %929 : vector<8x32xf32>
    %931 = arith.mulf %922, %786 : vector<8x32xf32>
    %932 = arith.mulf %916, %924 : vector<8x32xf32>
    %933 = arith.addf %931, %932 : vector<8x32xf32>
    %934 = math.tanh %933 : vector<8x32xf32>
    %935 = arith.mulf %930, %934 : vector<8x32xf32>
    %936 = arith.truncf %935 : vector<8x32xf32> to vector<8x32xbf16>
    %937 = arith.truncf %823 : vector<8x32xf32> to vector<8x32xbf16>
    %c0_312 = arith.constant 0 : index
    %c0_313 = arith.constant 0 : index
    %938 = vector.load %arg10[%c0_312, %c0_313] : memref<32x128xbf16, #tpu.memory_space<vmem>>, vector<32x128xbf16>
    %cst_314 = arith.constant dense<0.000000e+00> : vector<8x128xf32>
    %939 = tpu.matmul %937, %938, %cst_314 {dimension_numbers = #tpu.dot_dimension_numbers<[1], [0], [0], [1], [0, 0, 1, 1], [], []>} : vector<8x32xbf16>, vector<32x128xbf16>, vector<8x128xf32> -> vector<8x128xf32>
    %c0_315 = arith.constant 0 : index
    %c0_316 = arith.constant 0 : index
    %940 = vector.load %arg3[%c0_315, %c0_316] : memref<32x128xbf16, #tpu.memory_space<vmem>>, vector<32x128xbf16>
    %cst_317 = arith.constant dense<0.000000e+00> : vector<8x128xf32>
    %941 = tpu.matmul %936, %940, %cst_317 {dimension_numbers = #tpu.dot_dimension_numbers<[1], [0], [0], [1], [0, 0, 1, 1], [], []>} : vector<8x32xbf16>, vector<32x128xbf16>, vector<8x128xf32> -> vector<8x128xf32>
    %942 = arith.addf %939, %941 : vector<8x128xf32>
    %c0_318 = arith.constant 0 : index
    %c0_319 = arith.constant 0 : index
    %943 = vector.load %arg11[%c0_318, %c0_319] : memref<1x128xf32, #tpu.memory_space<vmem>>, vector<1x128xf32>
    %944 = vector.broadcast %943 : vector<1x128xf32> to vector<8x128xf32>
    %945 = arith.addf %942, %944 : vector<8x128xf32>
    %946 = vector.extract_strided_slice %945 {offsets = [0, 0], sizes = [8, 32], strides = [1, 1]} : vector<8x128xf32> to vector<8x32xf32>
    %947 = arith.negf %946 : vector<8x32xf32>
    %948 = math.exp %947 : vector<8x32xf32>
    %cst_320 = arith.constant 1.000000e+00 : f32
    %949 = vector.broadcast %cst_320 : f32 to vector<8x32xf32>
    %950 = arith.addf %949, %948 : vector<8x32xf32>
    %951 = arith.divf %949, %950 : vector<8x32xf32>
    %952 = vector.extract_strided_slice %945 {offsets = [0, 32], sizes = [8, 32], strides = [1, 1]} : vector<8x128xf32> to vector<8x32xf32>
    %953 = arith.negf %952 : vector<8x32xf32>
    %954 = math.exp %953 : vector<8x32xf32>
    %cst_321 = arith.constant 1.000000e+00 : f32
    %955 = vector.broadcast %cst_321 : f32 to vector<8x32xf32>
    %956 = arith.addf %955, %954 : vector<8x32xf32>
    %957 = arith.divf %955, %956 : vector<8x32xf32>
    %958 = vector.extract_strided_slice %945 {offsets = [0, 64], sizes = [8, 32], strides = [1, 1]} : vector<8x128xf32> to vector<8x32xf32>
    %959 = math.tanh %958 : vector<8x32xf32>
    %960 = vector.extract_strided_slice %945 {offsets = [0, 96], sizes = [8, 32], strides = [1, 1]} : vector<8x128xf32> to vector<8x32xf32>
    %961 = arith.negf %960 : vector<8x32xf32>
    %962 = math.exp %961 : vector<8x32xf32>
    %cst_322 = arith.constant 1.000000e+00 : f32
    %963 = vector.broadcast %cst_322 : f32 to vector<8x32xf32>
    %964 = arith.addf %963, %962 : vector<8x32xf32>
    %965 = arith.divf %963, %964 : vector<8x32xf32>
    %966 = arith.mulf %957, %821 : vector<8x32xf32>
    %967 = arith.mulf %951, %959 : vector<8x32xf32>
    %968 = arith.addf %966, %967 : vector<8x32xf32>
    %969 = math.tanh %968 : vector<8x32xf32>
    %970 = arith.mulf %965, %969 : vector<8x32xf32>
    %971 = arith.truncf %858 : vector<8x32xf32> to vector<8x32xbf16>
    %c0_323 = arith.constant 0 : index
    %c0_324 = arith.constant 0 : index
    %972 = vector.load %arg7[%c0_323, %c0_324] : memref<32x96xbf16, #tpu.memory_space<vmem>>, vector<32x96xbf16>
    %cst_325 = arith.constant dense<0.000000e+00> : vector<8x96xf32>
    %973 = tpu.matmul %971, %972, %cst_325 {dimension_numbers = #tpu.dot_dimension_numbers<[1], [0], [0], [1], [0, 0, 1, 1], [], []>} : vector<8x32xbf16>, vector<32x96xbf16>, vector<8x96xf32> -> vector<8x96xf32>
    %c0_326 = arith.constant 0 : index
    %c0_327 = arith.constant 0 : index
    %974 = vector.load %arg9[%c0_326, %c0_327] : memref<1x96xf32, #tpu.memory_space<vmem>>, vector<1x96xf32>
    %975 = vector.broadcast %974 : vector<1x96xf32> to vector<8x96xf32>
    %976 = arith.addf %973, %975 : vector<8x96xf32>
    %c0_328 = arith.constant 0 : index
    %c0_329 = arith.constant 0 : index
    %977 = vector.load %arg8[%c0_328, %c0_329] : memref<1x96xf32, #tpu.memory_space<vmem>>, vector<1x96xf32>
    %978 = vector.broadcast %977 : vector<1x96xf32> to vector<8x96xf32>
    %979 = arith.addf %903, %978 : vector<8x96xf32>
    %980 = vector.extract_strided_slice %979 {offsets = [0, 0], sizes = [8, 32], strides = [1, 1]} : vector<8x96xf32> to vector<8x32xf32>
    %981 = vector.extract_strided_slice %976 {offsets = [0, 0], sizes = [8, 32], strides = [1, 1]} : vector<8x96xf32> to vector<8x32xf32>
    %982 = arith.addf %980, %981 : vector<8x32xf32>
    %983 = arith.negf %982 : vector<8x32xf32>
    %984 = math.exp %983 : vector<8x32xf32>
    %cst_330 = arith.constant 1.000000e+00 : f32
    %985 = vector.broadcast %cst_330 : f32 to vector<8x32xf32>
    %986 = arith.addf %985, %984 : vector<8x32xf32>
    %987 = arith.divf %985, %986 : vector<8x32xf32>
    %988 = vector.extract_strided_slice %979 {offsets = [0, 32], sizes = [8, 32], strides = [1, 1]} : vector<8x96xf32> to vector<8x32xf32>
    %989 = vector.extract_strided_slice %976 {offsets = [0, 32], sizes = [8, 32], strides = [1, 1]} : vector<8x96xf32> to vector<8x32xf32>
    %990 = arith.addf %988, %989 : vector<8x32xf32>
    %991 = arith.negf %990 : vector<8x32xf32>
    %992 = math.exp %991 : vector<8x32xf32>
    %cst_331 = arith.constant 1.000000e+00 : f32
    %993 = vector.broadcast %cst_331 : f32 to vector<8x32xf32>
    %994 = arith.addf %993, %992 : vector<8x32xf32>
    %995 = arith.divf %993, %994 : vector<8x32xf32>
    %996 = vector.extract_strided_slice %979 {offsets = [0, 64], sizes = [8, 32], strides = [1, 1]} : vector<8x96xf32> to vector<8x32xf32>
    %997 = vector.extract_strided_slice %976 {offsets = [0, 64], sizes = [8, 32], strides = [1, 1]} : vector<8x96xf32> to vector<8x32xf32>
    %998 = arith.mulf %987, %997 : vector<8x32xf32>
    %999 = arith.addf %996, %998 : vector<8x32xf32>
    %1000 = math.tanh %999 : vector<8x32xf32>
    %cst_332 = arith.constant 1.000000e+00 : f32
    %1001 = vector.broadcast %cst_332 : f32 to vector<8x32xf32>
    %1002 = arith.subf %1001, %995 : vector<8x32xf32>
    %1003 = arith.mulf %1002, %1000 : vector<8x32xf32>
    %1004 = arith.mulf %995, %858 : vector<8x32xf32>
    %1005 = arith.addf %1003, %1004 : vector<8x32xf32>
    %1006 = arith.truncf %1005 : vector<8x32xf32> to vector<8x32xbf16>
    %1007 = arith.truncf %896 : vector<8x32xf32> to vector<8x32xbf16>
    %c0_333 = arith.constant 0 : index
    %c0_334 = arith.constant 0 : index
    %1008 = vector.load %arg12[%c0_333, %c0_334] : memref<32x96xbf16, #tpu.memory_space<vmem>>, vector<32x96xbf16>
    %cst_335 = arith.constant dense<0.000000e+00> : vector<8x96xf32>
    %1009 = tpu.matmul %1007, %1008, %cst_335 {dimension_numbers = #tpu.dot_dimension_numbers<[1], [0], [0], [1], [0, 0, 1, 1], [], []>} : vector<8x32xbf16>, vector<32x96xbf16>, vector<8x96xf32> -> vector<8x96xf32>
    %c0_336 = arith.constant 0 : index
    %c0_337 = arith.constant 0 : index
    %1010 = vector.load %arg14[%c0_336, %c0_337] : memref<1x96xf32, #tpu.memory_space<vmem>>, vector<1x96xf32>
    %1011 = vector.broadcast %1010 : vector<1x96xf32> to vector<8x96xf32>
    %1012 = arith.addf %1009, %1011 : vector<8x96xf32>
    %c0_338 = arith.constant 0 : index
    %c0_339 = arith.constant 0 : index
    %1013 = vector.load %arg4[%c0_338, %c0_339] : memref<32x96xbf16, #tpu.memory_space<vmem>>, vector<32x96xbf16>
    %cst_340 = arith.constant dense<0.000000e+00> : vector<8x96xf32>
    %1014 = tpu.matmul %1006, %1013, %cst_340 {dimension_numbers = #tpu.dot_dimension_numbers<[1], [0], [0], [1], [0, 0, 1, 1], [], []>} : vector<8x32xbf16>, vector<32x96xbf16>, vector<8x96xf32> -> vector<8x96xf32>
    %c0_341 = arith.constant 0 : index
    %c0_342 = arith.constant 0 : index
    %1015 = vector.load %arg13[%c0_341, %c0_342] : memref<1x96xf32, #tpu.memory_space<vmem>>, vector<1x96xf32>
    %1016 = vector.broadcast %1015 : vector<1x96xf32> to vector<8x96xf32>
    %1017 = arith.addf %1014, %1016 : vector<8x96xf32>
    %1018 = vector.extract_strided_slice %1017 {offsets = [0, 0], sizes = [8, 32], strides = [1, 1]} : vector<8x96xf32> to vector<8x32xf32>
    %1019 = vector.extract_strided_slice %1012 {offsets = [0, 0], sizes = [8, 32], strides = [1, 1]} : vector<8x96xf32> to vector<8x32xf32>
    %1020 = arith.addf %1018, %1019 : vector<8x32xf32>
    %1021 = arith.negf %1020 : vector<8x32xf32>
    %1022 = math.exp %1021 : vector<8x32xf32>
    %cst_343 = arith.constant 1.000000e+00 : f32
    %1023 = vector.broadcast %cst_343 : f32 to vector<8x32xf32>
    %1024 = arith.addf %1023, %1022 : vector<8x32xf32>
    %1025 = arith.divf %1023, %1024 : vector<8x32xf32>
    %1026 = vector.extract_strided_slice %1017 {offsets = [0, 32], sizes = [8, 32], strides = [1, 1]} : vector<8x96xf32> to vector<8x32xf32>
    %1027 = vector.extract_strided_slice %1012 {offsets = [0, 32], sizes = [8, 32], strides = [1, 1]} : vector<8x96xf32> to vector<8x32xf32>
    %1028 = arith.addf %1026, %1027 : vector<8x32xf32>
    %1029 = arith.negf %1028 : vector<8x32xf32>
    %1030 = math.exp %1029 : vector<8x32xf32>
    %cst_344 = arith.constant 1.000000e+00 : f32
    %1031 = vector.broadcast %cst_344 : f32 to vector<8x32xf32>
    %1032 = arith.addf %1031, %1030 : vector<8x32xf32>
    %1033 = arith.divf %1031, %1032 : vector<8x32xf32>
    %1034 = vector.extract_strided_slice %1017 {offsets = [0, 64], sizes = [8, 32], strides = [1, 1]} : vector<8x96xf32> to vector<8x32xf32>
    %1035 = vector.extract_strided_slice %1012 {offsets = [0, 64], sizes = [8, 32], strides = [1, 1]} : vector<8x96xf32> to vector<8x32xf32>
    %1036 = arith.mulf %1025, %1035 : vector<8x32xf32>
    %1037 = arith.addf %1034, %1036 : vector<8x32xf32>
    %1038 = math.tanh %1037 : vector<8x32xf32>
    %cst_345 = arith.constant 1.000000e+00 : f32
    %1039 = vector.broadcast %cst_345 : f32 to vector<8x32xf32>
    %1040 = arith.subf %1039, %1033 : vector<8x32xf32>
    %1041 = arith.mulf %1040, %1038 : vector<8x32xf32>
    %1042 = arith.mulf %1033, %896 : vector<8x32xf32>
    %1043 = arith.addf %1041, %1042 : vector<8x32xf32>
    %c7_i32 = arith.constant 7 : i32
    %1044 = arith.index_cast %c7_i32 : i32 to index
    %c0_346 = arith.constant 0 : index
    %c0_347 = arith.constant 0 : index
    %1045 = vector.load %arg1[%1044, %c0_346, %c0_347] : memref<8x8x16xbf16, #tpu.memory_space<vmem>>, vector<1x8x16xbf16>
    %1046 = vector.shape_cast %1045 : vector<1x8x16xbf16> to vector<8x16xbf16>
    %c0_348 = arith.constant 0 : index
    %c0_349 = arith.constant 0 : index
    %1047 = vector.load %arg2[%c0_348, %c0_349] : memref<16x224xbf16, #tpu.memory_space<vmem>>, vector<16x224xbf16>
    %cst_350 = arith.constant dense<0.000000e+00> : vector<8x224xf32>
    %1048 = tpu.matmul %1046, %1047, %cst_350 {dimension_numbers = #tpu.dot_dimension_numbers<[1], [0], [0], [1], [0, 0, 1, 1], [], []>} : vector<8x16xbf16>, vector<16x224xbf16>, vector<8x224xf32> -> vector<8x224xf32>
    %1049 = vector.extract_strided_slice %1048 {offsets = [0, 0], sizes = [8, 128], strides = [1, 1]} : vector<8x224xf32> to vector<8x128xf32>
    %1050 = vector.extract_strided_slice %1048 {offsets = [0, 128], sizes = [8, 96], strides = [1, 1]} : vector<8x224xf32> to vector<8x96xf32>
    %1051 = arith.truncf %935 : vector<8x32xf32> to vector<8x32xbf16>
    %c0_351 = arith.constant 0 : index
    %c0_352 = arith.constant 0 : index
    %1052 = vector.load %arg5[%c0_351, %c0_352] : memref<32x128xbf16, #tpu.memory_space<vmem>>, vector<32x128xbf16>
    %cst_353 = arith.constant dense<0.000000e+00> : vector<8x128xf32>
    %1053 = tpu.matmul %1051, %1052, %cst_353 {dimension_numbers = #tpu.dot_dimension_numbers<[1], [0], [0], [1], [0, 0, 1, 1], [], []>} : vector<8x32xbf16>, vector<32x128xbf16>, vector<8x128xf32> -> vector<8x128xf32>
    %1054 = arith.addf %1053, %1049 : vector<8x128xf32>
    %c0_354 = arith.constant 0 : index
    %c0_355 = arith.constant 0 : index
    %1055 = vector.load %arg6[%c0_354, %c0_355] : memref<1x128xf32, #tpu.memory_space<vmem>>, vector<1x128xf32>
    %1056 = vector.broadcast %1055 : vector<1x128xf32> to vector<8x128xf32>
    %1057 = arith.addf %1054, %1056 : vector<8x128xf32>
    %1058 = vector.extract_strided_slice %1057 {offsets = [0, 0], sizes = [8, 32], strides = [1, 1]} : vector<8x128xf32> to vector<8x32xf32>
    %1059 = arith.negf %1058 : vector<8x32xf32>
    %1060 = math.exp %1059 : vector<8x32xf32>
    %cst_356 = arith.constant 1.000000e+00 : f32
    %1061 = vector.broadcast %cst_356 : f32 to vector<8x32xf32>
    %1062 = arith.addf %1061, %1060 : vector<8x32xf32>
    %1063 = arith.divf %1061, %1062 : vector<8x32xf32>
    %1064 = vector.extract_strided_slice %1057 {offsets = [0, 32], sizes = [8, 32], strides = [1, 1]} : vector<8x128xf32> to vector<8x32xf32>
    %1065 = arith.negf %1064 : vector<8x32xf32>
    %1066 = math.exp %1065 : vector<8x32xf32>
    %cst_357 = arith.constant 1.000000e+00 : f32
    %1067 = vector.broadcast %cst_357 : f32 to vector<8x32xf32>
    %1068 = arith.addf %1067, %1066 : vector<8x32xf32>
    %1069 = arith.divf %1067, %1068 : vector<8x32xf32>
    %1070 = vector.extract_strided_slice %1057 {offsets = [0, 64], sizes = [8, 32], strides = [1, 1]} : vector<8x128xf32> to vector<8x32xf32>
    %1071 = math.tanh %1070 : vector<8x32xf32>
    %1072 = vector.extract_strided_slice %1057 {offsets = [0, 96], sizes = [8, 32], strides = [1, 1]} : vector<8x128xf32> to vector<8x32xf32>
    %1073 = arith.negf %1072 : vector<8x32xf32>
    %1074 = math.exp %1073 : vector<8x32xf32>
    %cst_358 = arith.constant 1.000000e+00 : f32
    %1075 = vector.broadcast %cst_358 : f32 to vector<8x32xf32>
    %1076 = arith.addf %1075, %1074 : vector<8x32xf32>
    %1077 = arith.divf %1075, %1076 : vector<8x32xf32>
    %1078 = arith.mulf %1069, %933 : vector<8x32xf32>
    %1079 = arith.mulf %1063, %1071 : vector<8x32xf32>
    %1080 = arith.addf %1078, %1079 : vector<8x32xf32>
    %1081 = math.tanh %1080 : vector<8x32xf32>
    %1082 = arith.mulf %1077, %1081 : vector<8x32xf32>
    %1083 = arith.truncf %1082 : vector<8x32xf32> to vector<8x32xbf16>
    %1084 = arith.truncf %970 : vector<8x32xf32> to vector<8x32xbf16>
    %c0_359 = arith.constant 0 : index
    %c0_360 = arith.constant 0 : index
    %1085 = vector.load %arg10[%c0_359, %c0_360] : memref<32x128xbf16, #tpu.memory_space<vmem>>, vector<32x128xbf16>
    %cst_361 = arith.constant dense<0.000000e+00> : vector<8x128xf32>
    %1086 = tpu.matmul %1084, %1085, %cst_361 {dimension_numbers = #tpu.dot_dimension_numbers<[1], [0], [0], [1], [0, 0, 1, 1], [], []>} : vector<8x32xbf16>, vector<32x128xbf16>, vector<8x128xf32> -> vector<8x128xf32>
    %c0_362 = arith.constant 0 : index
    %c0_363 = arith.constant 0 : index
    %1087 = vector.load %arg3[%c0_362, %c0_363] : memref<32x128xbf16, #tpu.memory_space<vmem>>, vector<32x128xbf16>
    %cst_364 = arith.constant dense<0.000000e+00> : vector<8x128xf32>
    %1088 = tpu.matmul %1083, %1087, %cst_364 {dimension_numbers = #tpu.dot_dimension_numbers<[1], [0], [0], [1], [0, 0, 1, 1], [], []>} : vector<8x32xbf16>, vector<32x128xbf16>, vector<8x128xf32> -> vector<8x128xf32>
    %1089 = arith.addf %1086, %1088 : vector<8x128xf32>
    %c0_365 = arith.constant 0 : index
    %c0_366 = arith.constant 0 : index
    %1090 = vector.load %arg11[%c0_365, %c0_366] : memref<1x128xf32, #tpu.memory_space<vmem>>, vector<1x128xf32>
    %1091 = vector.broadcast %1090 : vector<1x128xf32> to vector<8x128xf32>
    %1092 = arith.addf %1089, %1091 : vector<8x128xf32>
    %1093 = vector.extract_strided_slice %1092 {offsets = [0, 0], sizes = [8, 32], strides = [1, 1]} : vector<8x128xf32> to vector<8x32xf32>
    %1094 = arith.negf %1093 : vector<8x32xf32>
    %1095 = math.exp %1094 : vector<8x32xf32>
    %cst_367 = arith.constant 1.000000e+00 : f32
    %1096 = vector.broadcast %cst_367 : f32 to vector<8x32xf32>
    %1097 = arith.addf %1096, %1095 : vector<8x32xf32>
    %1098 = arith.divf %1096, %1097 : vector<8x32xf32>
    %1099 = vector.extract_strided_slice %1092 {offsets = [0, 32], sizes = [8, 32], strides = [1, 1]} : vector<8x128xf32> to vector<8x32xf32>
    %1100 = arith.negf %1099 : vector<8x32xf32>
    %1101 = math.exp %1100 : vector<8x32xf32>
    %cst_368 = arith.constant 1.000000e+00 : f32
    %1102 = vector.broadcast %cst_368 : f32 to vector<8x32xf32>
    %1103 = arith.addf %1102, %1101 : vector<8x32xf32>
    %1104 = arith.divf %1102, %1103 : vector<8x32xf32>
    %1105 = vector.extract_strided_slice %1092 {offsets = [0, 64], sizes = [8, 32], strides = [1, 1]} : vector<8x128xf32> to vector<8x32xf32>
    %1106 = math.tanh %1105 : vector<8x32xf32>
    %1107 = vector.extract_strided_slice %1092 {offsets = [0, 96], sizes = [8, 32], strides = [1, 1]} : vector<8x128xf32> to vector<8x32xf32>
    %1108 = arith.negf %1107 : vector<8x32xf32>
    %1109 = math.exp %1108 : vector<8x32xf32>
    %cst_369 = arith.constant 1.000000e+00 : f32
    %1110 = vector.broadcast %cst_369 : f32 to vector<8x32xf32>
    %1111 = arith.addf %1110, %1109 : vector<8x32xf32>
    %1112 = arith.divf %1110, %1111 : vector<8x32xf32>
    %1113 = arith.mulf %1104, %968 : vector<8x32xf32>
    %1114 = arith.mulf %1098, %1106 : vector<8x32xf32>
    %1115 = arith.addf %1113, %1114 : vector<8x32xf32>
    %1116 = math.tanh %1115 : vector<8x32xf32>
    %1117 = arith.mulf %1112, %1116 : vector<8x32xf32>
    %1118 = arith.truncf %1005 : vector<8x32xf32> to vector<8x32xbf16>
    %c0_370 = arith.constant 0 : index
    %c0_371 = arith.constant 0 : index
    %1119 = vector.load %arg7[%c0_370, %c0_371] : memref<32x96xbf16, #tpu.memory_space<vmem>>, vector<32x96xbf16>
    %cst_372 = arith.constant dense<0.000000e+00> : vector<8x96xf32>
    %1120 = tpu.matmul %1118, %1119, %cst_372 {dimension_numbers = #tpu.dot_dimension_numbers<[1], [0], [0], [1], [0, 0, 1, 1], [], []>} : vector<8x32xbf16>, vector<32x96xbf16>, vector<8x96xf32> -> vector<8x96xf32>
    %c0_373 = arith.constant 0 : index
    %c0_374 = arith.constant 0 : index
    %1121 = vector.load %arg9[%c0_373, %c0_374] : memref<1x96xf32, #tpu.memory_space<vmem>>, vector<1x96xf32>
    %1122 = vector.broadcast %1121 : vector<1x96xf32> to vector<8x96xf32>
    %1123 = arith.addf %1120, %1122 : vector<8x96xf32>
    %c0_375 = arith.constant 0 : index
    %c0_376 = arith.constant 0 : index
    %1124 = vector.load %arg8[%c0_375, %c0_376] : memref<1x96xf32, #tpu.memory_space<vmem>>, vector<1x96xf32>
    %1125 = vector.broadcast %1124 : vector<1x96xf32> to vector<8x96xf32>
    %1126 = arith.addf %1050, %1125 : vector<8x96xf32>
    %1127 = vector.extract_strided_slice %1126 {offsets = [0, 0], sizes = [8, 32], strides = [1, 1]} : vector<8x96xf32> to vector<8x32xf32>
    %1128 = vector.extract_strided_slice %1123 {offsets = [0, 0], sizes = [8, 32], strides = [1, 1]} : vector<8x96xf32> to vector<8x32xf32>
    %1129 = arith.addf %1127, %1128 : vector<8x32xf32>
    %1130 = arith.negf %1129 : vector<8x32xf32>
    %1131 = math.exp %1130 : vector<8x32xf32>
    %cst_377 = arith.constant 1.000000e+00 : f32
    %1132 = vector.broadcast %cst_377 : f32 to vector<8x32xf32>
    %1133 = arith.addf %1132, %1131 : vector<8x32xf32>
    %1134 = arith.divf %1132, %1133 : vector<8x32xf32>
    %1135 = vector.extract_strided_slice %1126 {offsets = [0, 32], sizes = [8, 32], strides = [1, 1]} : vector<8x96xf32> to vector<8x32xf32>
    %1136 = vector.extract_strided_slice %1123 {offsets = [0, 32], sizes = [8, 32], strides = [1, 1]} : vector<8x96xf32> to vector<8x32xf32>
    %1137 = arith.addf %1135, %1136 : vector<8x32xf32>
    %1138 = arith.negf %1137 : vector<8x32xf32>
    %1139 = math.exp %1138 : vector<8x32xf32>
    %cst_378 = arith.constant 1.000000e+00 : f32
    %1140 = vector.broadcast %cst_378 : f32 to vector<8x32xf32>
    %1141 = arith.addf %1140, %1139 : vector<8x32xf32>
    %1142 = arith.divf %1140, %1141 : vector<8x32xf32>
    %1143 = vector.extract_strided_slice %1126 {offsets = [0, 64], sizes = [8, 32], strides = [1, 1]} : vector<8x96xf32> to vector<8x32xf32>
    %1144 = vector.extract_strided_slice %1123 {offsets = [0, 64], sizes = [8, 32], strides = [1, 1]} : vector<8x96xf32> to vector<8x32xf32>
    %1145 = arith.mulf %1134, %1144 : vector<8x32xf32>
    %1146 = arith.addf %1143, %1145 : vector<8x32xf32>
    %1147 = math.tanh %1146 : vector<8x32xf32>
    %cst_379 = arith.constant 1.000000e+00 : f32
    %1148 = vector.broadcast %cst_379 : f32 to vector<8x32xf32>
    %1149 = arith.subf %1148, %1142 : vector<8x32xf32>
    %1150 = arith.mulf %1149, %1147 : vector<8x32xf32>
    %1151 = arith.mulf %1142, %1005 : vector<8x32xf32>
    %1152 = arith.addf %1150, %1151 : vector<8x32xf32>
    %1153 = arith.truncf %1152 : vector<8x32xf32> to vector<8x32xbf16>
    %1154 = arith.truncf %1043 : vector<8x32xf32> to vector<8x32xbf16>
    %c0_380 = arith.constant 0 : index
    %c0_381 = arith.constant 0 : index
    %1155 = vector.load %arg12[%c0_380, %c0_381] : memref<32x96xbf16, #tpu.memory_space<vmem>>, vector<32x96xbf16>
    %cst_382 = arith.constant dense<0.000000e+00> : vector<8x96xf32>
    %1156 = tpu.matmul %1154, %1155, %cst_382 {dimension_numbers = #tpu.dot_dimension_numbers<[1], [0], [0], [1], [0, 0, 1, 1], [], []>} : vector<8x32xbf16>, vector<32x96xbf16>, vector<8x96xf32> -> vector<8x96xf32>
    %c0_383 = arith.constant 0 : index
    %c0_384 = arith.constant 0 : index
    %1157 = vector.load %arg14[%c0_383, %c0_384] : memref<1x96xf32, #tpu.memory_space<vmem>>, vector<1x96xf32>
    %1158 = vector.broadcast %1157 : vector<1x96xf32> to vector<8x96xf32>
    %1159 = arith.addf %1156, %1158 : vector<8x96xf32>
    %c0_385 = arith.constant 0 : index
    %c0_386 = arith.constant 0 : index
    %1160 = vector.load %arg4[%c0_385, %c0_386] : memref<32x96xbf16, #tpu.memory_space<vmem>>, vector<32x96xbf16>
    %cst_387 = arith.constant dense<0.000000e+00> : vector<8x96xf32>
    %1161 = tpu.matmul %1153, %1160, %cst_387 {dimension_numbers = #tpu.dot_dimension_numbers<[1], [0], [0], [1], [0, 0, 1, 1], [], []>} : vector<8x32xbf16>, vector<32x96xbf16>, vector<8x96xf32> -> vector<8x96xf32>
    %c0_388 = arith.constant 0 : index
    %c0_389 = arith.constant 0 : index
    %1162 = vector.load %arg13[%c0_388, %c0_389] : memref<1x96xf32, #tpu.memory_space<vmem>>, vector<1x96xf32>
    %1163 = vector.broadcast %1162 : vector<1x96xf32> to vector<8x96xf32>
    %1164 = arith.addf %1161, %1163 : vector<8x96xf32>
    %1165 = vector.extract_strided_slice %1164 {offsets = [0, 0], sizes = [8, 32], strides = [1, 1]} : vector<8x96xf32> to vector<8x32xf32>
    %1166 = vector.extract_strided_slice %1159 {offsets = [0, 0], sizes = [8, 32], strides = [1, 1]} : vector<8x96xf32> to vector<8x32xf32>
    %1167 = arith.addf %1165, %1166 : vector<8x32xf32>
    %1168 = arith.negf %1167 : vector<8x32xf32>
    %1169 = math.exp %1168 : vector<8x32xf32>
    %cst_390 = arith.constant 1.000000e+00 : f32
    %1170 = vector.broadcast %cst_390 : f32 to vector<8x32xf32>
    %1171 = arith.addf %1170, %1169 : vector<8x32xf32>
    %1172 = arith.divf %1170, %1171 : vector<8x32xf32>
    %1173 = vector.extract_strided_slice %1164 {offsets = [0, 32], sizes = [8, 32], strides = [1, 1]} : vector<8x96xf32> to vector<8x32xf32>
    %1174 = vector.extract_strided_slice %1159 {offsets = [0, 32], sizes = [8, 32], strides = [1, 1]} : vector<8x96xf32> to vector<8x32xf32>
    %1175 = arith.addf %1173, %1174 : vector<8x32xf32>
    %1176 = arith.negf %1175 : vector<8x32xf32>
    %1177 = math.exp %1176 : vector<8x32xf32>
    %cst_391 = arith.constant 1.000000e+00 : f32
    %1178 = vector.broadcast %cst_391 : f32 to vector<8x32xf32>
    %1179 = arith.addf %1178, %1177 : vector<8x32xf32>
    %1180 = arith.divf %1178, %1179 : vector<8x32xf32>
    %1181 = vector.extract_strided_slice %1164 {offsets = [0, 64], sizes = [8, 32], strides = [1, 1]} : vector<8x96xf32> to vector<8x32xf32>
    %1182 = vector.extract_strided_slice %1159 {offsets = [0, 64], sizes = [8, 32], strides = [1, 1]} : vector<8x96xf32> to vector<8x32xf32>
    %1183 = arith.mulf %1172, %1182 : vector<8x32xf32>
    %1184 = arith.addf %1181, %1183 : vector<8x32xf32>
    %1185 = math.tanh %1184 : vector<8x32xf32>
    %cst_392 = arith.constant 1.000000e+00 : f32
    %1186 = vector.broadcast %cst_392 : f32 to vector<8x32xf32>
    %1187 = arith.subf %1186, %1180 : vector<8x32xf32>
    %1188 = arith.mulf %1187, %1185 : vector<8x32xf32>
    %1189 = arith.mulf %1180, %1043 : vector<8x32xf32>
    %1190 = arith.addf %1188, %1189 : vector<8x32xf32>
    %c8_i32 = arith.constant 8 : i32
    %c0_393 = arith.constant 0 : index
    %c0_394 = arith.constant 0 : index
    %c0_395 = arith.constant 0 : index
    %1191 = vector.load %arg21[%c0_393, %c0_394, %c0_395] : memref<2x8x32xf32, #tpu.memory_space<vmem>>, vector<1x8x32xf32>
    %1192 = vector.shape_cast %1191 : vector<1x8x32xf32> to vector<8x32xf32>
    %1193 = vector.shape_cast %1082 : vector<8x32xf32> to vector<1x8x32xf32>
    tpu.vector_store %arg21[%c0_393, %c0_394, %c0_395], %1193 {strides = array<i32>} : memref<2x8x32xf32, #tpu.memory_space<vmem>>, vector<1x8x32xf32>,
    %c0_396 = arith.constant 0 : index
    %c0_397 = arith.constant 0 : index
    %c0_398 = arith.constant 0 : index
    %1194 = vector.load %arg22[%c0_396, %c0_397, %c0_398] : memref<2x8x32xf32, #tpu.memory_space<vmem>>, vector<1x8x32xf32>
    %1195 = vector.shape_cast %1194 : vector<1x8x32xf32> to vector<8x32xf32>
    %1196 = vector.shape_cast %1080 : vector<8x32xf32> to vector<1x8x32xf32>
    tpu.vector_store %arg22[%c0_396, %c0_397, %c0_398], %1196 {strides = array<i32>} : memref<2x8x32xf32, #tpu.memory_space<vmem>>, vector<1x8x32xf32>,
    %c0_399 = arith.constant 0 : index
    %c0_400 = arith.constant 0 : index
    %c0_401 = arith.constant 0 : index
    %1197 = vector.load %arg23[%c0_399, %c0_400, %c0_401] : memref<2x8x32xf32, #tpu.memory_space<vmem>>, vector<1x8x32xf32>
    %1198 = vector.shape_cast %1197 : vector<1x8x32xf32> to vector<8x32xf32>
    %1199 = vector.shape_cast %1152 : vector<8x32xf32> to vector<1x8x32xf32>
    tpu.vector_store %arg23[%c0_399, %c0_400, %c0_401], %1199 {strides = array<i32>} : memref<2x8x32xf32, #tpu.memory_space<vmem>>, vector<1x8x32xf32>,
    %c1_402 = arith.constant 1 : index
    %c0_403 = arith.constant 0 : index
    %c0_404 = arith.constant 0 : index
    %1200 = vector.load %arg21[%c1_402, %c0_403, %c0_404] : memref<2x8x32xf32, #tpu.memory_space<vmem>>, vector<1x8x32xf32>
    %1201 = vector.shape_cast %1200 : vector<1x8x32xf32> to vector<8x32xf32>
    %1202 = vector.shape_cast %1117 : vector<8x32xf32> to vector<1x8x32xf32>
    tpu.vector_store %arg21[%c1_402, %c0_403, %c0_404], %1202 {strides = array<i32>} : memref<2x8x32xf32, #tpu.memory_space<vmem>>, vector<1x8x32xf32>,
    %c1_405 = arith.constant 1 : index
    %c0_406 = arith.constant 0 : index
    %c0_407 = arith.constant 0 : index
    %1203 = vector.load %arg22[%c1_405, %c0_406, %c0_407] : memref<2x8x32xf32, #tpu.memory_space<vmem>>, vector<1x8x32xf32>
    %1204 = vector.shape_cast %1203 : vector<1x8x32xf32> to vector<8x32xf32>
    %1205 = vector.shape_cast %1115 : vector<8x32xf32> to vector<1x8x32xf32>
    tpu.vector_store %arg22[%c1_405, %c0_406, %c0_407], %1205 {strides = array<i32>} : memref<2x8x32xf32, #tpu.memory_space<vmem>>, vector<1x8x32xf32>,
    %c1_408 = arith.constant 1 : index
    %c0_409 = arith.constant 0 : index
    %c0_410 = arith.constant 0 : index
    %1206 = vector.load %arg23[%c1_408, %c0_409, %c0_410] : memref<2x8x32xf32, #tpu.memory_space<vmem>>, vector<1x8x32xf32>
    %1207 = vector.shape_cast %1206 : vector<1x8x32xf32> to vector<8x32xf32>
    %1208 = vector.shape_cast %1190 : vector<8x32xf32> to vector<1x8x32xf32>
    tpu.vector_store %arg23[%c1_408, %c0_409, %c0_410], %1208 {strides = array<i32>} : memref<2x8x32xf32, #tpu.memory_space<vmem>>, vector<1x8x32xf32>,
    %c0_i32_411 = arith.constant 0 : i32
    %1209 = arith.cmpi eq, %arg0, %c0_i32_411 : i32
    %1210 = arith.extui %1209 : i1 to i32
    %c0_i32_412 = arith.constant 0 : i32
    %1211 = arith.cmpi ne, %1210, %c0_i32_412 : i32
    scf.if %1211 {
      %1212 = tpu.concatenate %1117, %1190 in 0 : vector<8x32xf32>, vector<8x32xf32> -> vector<16x32xf32>
      %c0_413 = arith.constant 0 : index
      %c0_414 = arith.constant 0 : index
      %1213 = vector.load %arg15[%c0_413, %c0_414] : memref<32x8xf32, #tpu.memory_space<vmem>>, vector<32x8xf32>
      %cst_415 = arith.constant dense<0.000000e+00> : vector<16x8xf32>
      %1214 = tpu.matmul %1212, %1213, %cst_415 {dimension_numbers = #tpu.dot_dimension_numbers<[1], [0], [0], [1], [0, 0, 1, 1], [], []>} : vector<16x32xf32>, vector<32x8xf32>, vector<16x8xf32> -> vector<16x8xf32>
      %c0_416 = arith.constant 0 : index
      %c0_417 = arith.constant 0 : index
      %1215 = vector.load %arg16[%c0_416, %c0_417] : memref<1x8xf32, #tpu.memory_space<vmem>>, vector<1x8xf32>
      %1216 = vector.broadcast %1215 : vector<1x8xf32> to vector<16x8xf32>
      %1217 = arith.addf %1214, %1216 : vector<16x8xf32>
      %1218 = vector.extract_strided_slice %1217 {offsets = [0, 0], sizes = [8, 8], strides = [1, 1]} : vector<16x8xf32> to vector<8x8xf32>
      %1219 = vector.extract_strided_slice %1217 {offsets = [8, 0], sizes = [8, 8], strides = [1, 1]} : vector<16x8xf32> to vector<8x8xf32>
      %c0_418 = arith.constant 0 : index
      %c0_419 = arith.constant 0 : index
      %1220 = vector.load %arg17[%c0_418, %c0_419] : memref<16x2xf32, #tpu.memory_space<vmem>>, vector<8x2xf32>
      %cst_420 = arith.constant dense<0.000000e+00> : vector<8x2xf32>
      %1221 = tpu.matmul %1218, %1220, %cst_420 {dimension_numbers = #tpu.dot_dimension_numbers<[1], [0], [0], [1], [0, 0, 1, 1], [], []>} : vector<8x8xf32>, vector<8x2xf32>, vector<8x2xf32> -> vector<8x2xf32>
      %c8 = arith.constant 8 : index
      %c0_421 = arith.constant 0 : index
      %1222 = vector.load %arg17[%c8, %c0_421] : memref<16x2xf32, #tpu.memory_space<vmem>>, vector<8x2xf32>
      %cst_422 = arith.constant dense<0.000000e+00> : vector<8x2xf32>
      %1223 = tpu.matmul %1219, %1222, %cst_422 {dimension_numbers = #tpu.dot_dimension_numbers<[1], [0], [0], [1], [0, 0, 1, 1], [], []>} : vector<8x8xf32>, vector<8x2xf32>, vector<8x2xf32> -> vector<8x2xf32>
      %1224 = arith.addf %1221, %1223 : vector<8x2xf32>
      %c0_423 = arith.constant 0 : index
      %c0_424 = arith.constant 0 : index
      %1225 = vector.load %arg18[%c0_423, %c0_424] : memref<1x2xf32, #tpu.memory_space<vmem>>, vector<1x2xf32>
      %1226 = vector.broadcast %1225 : vector<1x2xf32> to vector<8x2xf32>
      %1227 = arith.addf %1224, %1226 : vector<8x2xf32>
      %c0_425 = arith.constant 0 : index
      %c0_426 = arith.constant 0 : index
      %1228 = vector.load %arg19[%c0_425, %c0_426] : memref<8x2xf32, #tpu.memory_space<vmem>>, vector<8x2xf32>
      tpu.vector_store %arg19[%c0_425, %c0_426], %1227 {strides = array<i32>} : memref<8x2xf32, #tpu.memory_space<vmem>>, vector<8x2xf32>,
      %1229 = arith.negf %1227 : vector<8x2xf32>
      %1230 = math.exp %1229 : vector<8x2xf32>
      %cst_427 = arith.constant 1.000000e+00 : f32
      %1231 = vector.broadcast %cst_427 : f32 to vector<8x2xf32>
      %1232 = arith.addf %1231, %1230 : vector<8x2xf32>
      %1233 = arith.divf %1231, %1232 : vector<8x2xf32>
      %c0_428 = arith.constant 0 : index
      %c0_429 = arith.constant 0 : index
      %1234 = vector.load %arg20[%c0_428, %c0_429] : memref<8x2xf32, #tpu.memory_space<vmem>>, vector<8x2xf32>
      tpu.vector_store %arg20[%c0_428, %c0_429], %1233 {strides = array<i32>} : memref<8x2xf32, #tpu.memory_space<vmem>>, vector<8x2xf32>,
    } else {
    }
    return
  }
  func.func @transform_0(%arg0: i32) -> (i32, i32, i32) {
    %c0_i32 = arith.constant 0 : i32
    %c0_i32_0 = arith.constant 0 : i32
    %c0_i32_1 = arith.constant 0 : i32
    return %arg0, %c0_i32, %c0_i32_0 : i32, i32, i32
  }
  func.func @transform_1(%arg0: i32) -> (i32, i32) {
    %c0_i32 = arith.constant 0 : i32
    %c0_i32_0 = arith.constant 0 : i32
    %c0_i32_1 = arith.constant 0 : i32
    return %c0_i32, %c0_i32_0 : i32, i32
  }
  func.func @transform_2(%arg0: i32) -> (i32, i32) {
    %c0_i32 = arith.constant 0 : i32
    %c0_i32_0 = arith.constant 0 : i32
    %c0_i32_1 = arith.constant 0 : i32
    return %c0_i32, %c0_i32_0 : i32, i32
  }
  func.func @transform_3(%arg0: i32) -> (i32, i32) {
    %c0_i32 = arith.constant 0 : i32
    %c0_i32_0 = arith.constant 0 : i32
    %c0_i32_1 = arith.constant 0 : i32
    return %c0_i32, %c0_i32_0 : i32, i32
  }
  func.func @transform_4(%arg0: i32) -> (i32, i32) {
    %c0_i32 = arith.constant 0 : i32
    %c0_i32_0 = arith.constant 0 : i32
    %c0_i32_1 = arith.constant 0 : i32
    return %c0_i32, %c0_i32_0 : i32, i32
  }
  func.func @transform_5(%arg0: i32) -> (i32, i32) {
    %c0_i32 = arith.constant 0 : i32
    %c0_i32_0 = arith.constant 0 : i32
    %c0_i32_1 = arith.constant 0 : i32
    return %c0_i32, %c0_i32_0 : i32, i32
  }
  func.func @transform_6(%arg0: i32) -> (i32, i32) {
    %c0_i32 = arith.constant 0 : i32
    %c0_i32_0 = arith.constant 0 : i32
    %c0_i32_1 = arith.constant 0 : i32
    return %c0_i32, %c0_i32_0 : i32, i32
  }
  func.func @transform_7(%arg0: i32) -> (i32, i32) {
    %c0_i32 = arith.constant 0 : i32
    %c0_i32_0 = arith.constant 0 : i32
    %c0_i32_1 = arith.constant 0 : i32
    return %c0_i32, %c0_i32_0 : i32, i32
  }
  func.func @transform_8(%arg0: i32) -> (i32, i32) {
    %c0_i32 = arith.constant 0 : i32
    %c0_i32_0 = arith.constant 0 : i32
    %c0_i32_1 = arith.constant 0 : i32
    return %c0_i32, %c0_i32_0 : i32, i32
  }
  func.func @transform_9(%arg0: i32) -> (i32, i32) {
    %c0_i32 = arith.constant 0 : i32
    %c0_i32_0 = arith.constant 0 : i32
    %c0_i32_1 = arith.constant 0 : i32
    return %c0_i32, %c0_i32_0 : i32, i32
  }
  func.func @transform_10(%arg0: i32) -> (i32, i32) {
    %c0_i32 = arith.constant 0 : i32
    %c0_i32_0 = arith.constant 0 : i32
    %c0_i32_1 = arith.constant 0 : i32
    return %c0_i32, %c0_i32_0 : i32, i32
  }
  func.func @transform_11(%arg0: i32) -> (i32, i32) {
    %c0_i32 = arith.constant 0 : i32
    %c0_i32_0 = arith.constant 0 : i32
    %c0_i32_1 = arith.constant 0 : i32
    return %c0_i32, %c0_i32_0 : i32, i32
  }
  func.func @transform_12(%arg0: i32) -> (i32, i32) {
    %c0_i32 = arith.constant 0 : i32
    %c0_i32_0 = arith.constant 0 : i32
    %c0_i32_1 = arith.constant 0 : i32
    return %c0_i32, %c0_i32_0 : i32, i32
  }
  func.func @transform_13(%arg0: i32) -> (i32, i32) {
    %c0_i32 = arith.constant 0 : i32
    %c0_i32_0 = arith.constant 0 : i32
    %c0_i32_1 = arith.constant 0 : i32
    return %c0_i32, %c0_i32_0 : i32, i32
  }
  func.func @transform_14(%arg0: i32) -> (i32, i32) {
    %c0_i32 = arith.constant 0 : i32
    %c0_i32_0 = arith.constant 0 : i32
    %c0_i32_1 = arith.constant 0 : i32
    return %c0_i32, %c0_i32_0 : i32, i32
  }
  func.func @transform_15(%arg0: i32) -> (i32, i32) {
    %c0_i32 = arith.constant 0 : i32
    %c0_i32_0 = arith.constant 0 : i32
    %c0_i32_1 = arith.constant 0 : i32
    return %c0_i32, %c0_i32_0 : i32, i32
  }
  func.func @transform_16(%arg0: i32) -> (i32, i32) {
    %c0_i32 = arith.constant 0 : i32
    %c0_i32_0 = arith.constant 0 : i32
    %c0_i32_1 = arith.constant 0 : i32
    return %c0_i32, %c0_i32_0 : i32, i32
  }
  func.func @transform_17(%arg0: i32) -> (i32, i32) {
    %c0_i32 = arith.constant 0 : i32
    %c0_i32_0 = arith.constant 0 : i32
    %c0_i32_1 = arith.constant 0 : i32
    return %c0_i32, %c0_i32_0 : i32, i32
  }
  func.func @transform_18(%arg0: i32) -> (i32, i32) {
    %c0_i32 = arith.constant 0 : i32
    %c0_i32_0 = arith.constant 0 : i32
    %c0_i32_1 = arith.constant 0 : i32
    return %c0_i32, %c0_i32_0 : i32, i32
  }
  func.func @transform_19(%arg0: i32) -> (i32, i32) {
    %c0_i32 = arith.constant 0 : i32
    %c0_i32_0 = arith.constant 0 : i32
    %c0_i32_1 = arith.constant 0 : i32
    return %c0_i32, %c0_i32_0 : i32, i32
  }
  func.func @transform_20(%arg0: i32) -> (i32, i32, i32) {
    %c0_i32 = arith.constant 0 : i32
    %c0_i32_0 = arith.constant 0 : i32
    %c0_i32_1 = arith.constant 0 : i32
    %c0_i32_2 = arith.constant 0 : i32
    return %c0_i32, %c0_i32_0, %c0_i32_1 : i32, i32, i32
  }
  func.func @transform_21(%arg0: i32) -> (i32, i32, i32) {
    %c0_i32 = arith.constant 0 : i32
    %c0_i32_0 = arith.constant 0 : i32
    %c0_i32_1 = arith.constant 0 : i32
    %c0_i32_2 = arith.constant 0 : i32
    return %c0_i32, %c0_i32_0, %c0_i32_1 : i32, i32, i32
  }
  func.func @transform_22(%arg0: i32) -> (i32, i32, i32) {
    %c0_i32 = arith.constant 0 : i32
    %c0_i32_0 = arith.constant 0 : i32
    %c0_i32_1 = arith.constant 0 : i32
    %c0_i32_2 = arith.constant 0 : i32
    return %c0_i32, %c0_i32_0, %c0_i32_1 : i32, i32, i32
  }
}

</mosaic_0001>

<bundles_post_ra>
// kernel: tpu_custom_call.1
= control target key start
LH: loop header
LB: loop body
LE: loop exit
PB: predicated region body
PF: predicated region fallthrough
CT: control target
= control target key end

     0   :  { %s6515_s0 = inlined_call_operand.vmem [shape: bf16[8,8,16], index: 0, kind: input, shape index: {}]   ;;  %s6516_s1 = inlined_call_operand.vmem [shape: bf16[16,224], index: 1, kind: input, shape index: {}]   ;;  %s6517_s2 = inlined_call_operand.hbm [shape: bf16[32,128], index: 2, kind: input, shape index: {}]   ;;  %s6518_s3 = inlined_call_operand.hbm [shape: bf16[32,96], index: 3, kind: input, shape index: {}]   ;;  %s6519_s4 = inlined_call_operand.vmem [shape: bf16[32,128], index: 4, kind: input, shape index: {}]   ;;  %s6520_s5 = inlined_call_operand.hbm [shape: f32[1,128], index: 5, kind: input, shape index: {}]   ;;  %s6521_s6 = inlined_call_operand.hbm [shape: bf16[32,96], index: 6, kind: input, shape index: {}]   ;;  %s6522_s7 = inlined_call_operand.hbm [shape: f32[1,96], index: 7, kind: input, shape index: {}]   ;;  %s6523_s8 = inlined_call_operand.hbm [shape: f32[1,96], index: 8, kind: input, shape index: {}]   ;;  %s6524_s9 = inlined_call_operand.hbm [shape: bf16[32,128], index: 9, kind: input, shape index: {}]   ;;  %s6525_s10 = inlined_call_operand.vmem [shape: f32[1,128], index: 10, kind: input, shape index: {}]   ;;  %s6526_s11 = inlined_call_operand.hbm [shape: bf16[32,96], index: 11, kind: input, shape index: {}]   ;;  %s6527_s12 = inlined_call_operand.vmem [shape: f32[1,96], index: 12, kind: input, shape index: {}]   ;;  %s6528_s13 = inlined_call_operand.vmem [shape: f32[1,96], index: 13, kind: input, shape index: {}]   ;;  %s6529_s14 = inlined_call_operand.vmem [shape: f32[32,8], index: 14, kind: input, shape index: {}]   ;;  %s6530_s15 = inlined_call_operand.vmem [shape: f32[1,8], index: 15, kind: input, shape index: {}]   ;;  %s6531_s16 = inlined_call_operand.vmem [shape: f32[16,2], index: 16, kind: input, shape index: {}]   ;;  %s6532_s17 = inlined_call_operand.vmem [shape: f32[1,2], index: 17, kind: input, shape index: {}]   ;;  %s6533_s18 = inlined_call_operand.vmem [shape: f32[8,2], index: 18, kind: output, shape index: {0}]   ;;  %s6534_s19 = inlined_call_operand.vmem [shape: f32[8,2], index: 19, kind: output, shape index: {1}]   ;;  %s6535_s20 = inlined_call_operand.hbm [shape: f32[2,8,32], index: 20, kind: output, shape index: {2}]   ;;  %s6536_s21 = inlined_call_operand.hbm [shape: f32[2,8,32], index: 21, kind: output, shape index: {3}]   ;;  %s6537_s22 = inlined_call_operand.hbm [shape: f32[2,8,32], index: 22, kind: output, shape index: {4}]  }
   0x1   :  { %6541 = sst [smem:[#allocation27_spill]] %s6515_s0 }
   0x2   :  { %6542 = sst [smem:[#allocation28_spill]] %s6516_s1 }
   0x3   :  { %6543 = sst [smem:[#allocation29_spill]] %s6517_s2 }
   0x4   :  { %6544 = sst [smem:[#allocation30_spill]] %s6518_s3 }
   0x5   :  { %6545 = sst [smem:[#allocation31_spill]] %s6519_s4 }
   0x6   :  { %6546 = sst [smem:[#allocation32_spill]] %s6520_s5 }
   0x7   :  { %6547 = sst [smem:[#allocation33_spill]] %s6521_s6 }
   0x8   :  { %28 = vsyncpa [#allocation3], 0 }
   0x9   :  { %29 = vsyncpa [#allocation6], 0 }
   0xa   :  { %30 = vsyncpa [#allocation9], 0 }
   0xb   :  { %31 = vsyncpa [#allocation12], 0 }
   0xc   :  { %32 = vsyncpa [#allocation15], 0 }
   0xd   :  { %33 = vsyncpa [#allocation4], 0 }
   0xe   :  { %34 = vsyncpa [#allocation18], 0  ;;  %s5269_s3 = smov [#allocation5]   ;;  %s5270_s29 = smov [#allocation8]  }
   0xf   :  { %s56_s28 = sshll.u32 %s5269_s3, 4  ;;  %s80_s30 = sshll.u32 %s5270_s29, 4  ;;  %s57_s28 = int_to_ptr.vmem [resolvable:$true] %s56_s28  ;;  %s81_s30 = int_to_ptr.vmem [resolvable:$true] %s80_s30 }
  0x10   :  { %s5043_s4 = scalar_lea.vmem %s57_s28, 256  ;;  %p5048_p1 = scmp.lt.s32.totalorder %s57_s28, %s57_s28 }
  0x11   :  { %p5044_p0 = scmp.ne.s32.totalorder %s57_s28, %s5043_s4  ;;  %p5049_p2 = scmp.lt.s32.totalorder %s5043_s4, %s5043_s4 }
  0x13   :  { %p5050_p3 = por %p5049_p2, %p5048_p1 }
  0x15   :  { %p5051_p4 = pnand %p5050_p3, %p5044_p0 }
  0x17   :  { %5054 = shalt.err (!%p5051_p4)
}
  0x18   :  { %s5271_s0 = smov 64   ;;  %s5272_s23 = smov 4  }
  0x19   :  { %s6548_s24 = sld [smem:[#allocation30_spill]]  ;;  %s5063_s6 = scalar_lea.vmem %s81_s30, 256 }
  0x1a   :  { %p5064_p5 = scmp.ne.s32.totalorder %s81_s30, %s5063_s6  ;;  %p5068_p6 = scmp.lt.s32.totalorder %s81_s30, %s81_s30 }
  0x1b   :  { %p5069_p7 = scmp.lt.s32.totalorder %s5063_s6, %s5063_s6 }
  0x1d   :  { %p5070_p8 = por %p5069_p7, %p5068_p6 }
  0x1f   :  { %62 = dma.hbm_to_vmem [thread:$0]  %s6548_s24, 256, %s57_s28, [#allocation6], %s5271_s0, %s5271_s0, %s5272_s23  }
  0x20   :  { %p5071_p9 = pnand %p5070_p8, %p5064_p5 }
  0x22   :  { %5074 = shalt.err (!%p5071_p9)
}
  0x23   :  { %s6549_s2 = sld [smem:[#allocation33_spill]]  ;;  %s5273_s27 = smov [#allocation11]  }
  0x24   :  { %s103_s3 = sshll.u32 %s5273_s27, 4  ;;  %s5274_s29 = smov [#allocation2]   ;;  %s104_s3 = int_to_ptr.vmem [resolvable:$true] %s103_s3 }
  0x25   :  { %s44_s4 = sshll.u32 %s5274_s29, 4  ;;  %s5083_s28 = scalar_lea.vmem %s104_s3, 16  ;;  %s45_s4 = int_to_ptr.vmem [resolvable:$true] %s44_s4 }
  0x26   :  { %p5084_p10 = scmp.ne.s32.totalorder %s104_s3, %s5083_s28  ;;  %s5087_s1 = scalar_lea.vmem %s104_s3, 32 }
  0x27   :  { %p5088_p11 = scmp.lt.s32.totalorder %s104_s3, %s104_s3  ;;  %p5089_p12 = scmp.lt.s32.totalorder %s5087_s1, %s5083_s28 }
  0x29   :  { %86 = dma.hbm_to_vmem [thread:$0]  %s6549_s2, 256, %s81_s30, [#allocation9], %s5271_s0, %s5271_s0, %s5272_s23  }
  0x2a   :  { %p5090_p13 = por %p5089_p12, %p5088_p11 }
  0x2c   :  { %p5091_p0 = pnand %p5090_p13, %p5084_p10 }
  0x2e   :  { %5094 = shalt.err (!%p5091_p0)
}
  0x2f   :  { %106 = dma.hbm_to_vmem [thread:$0]  %s6523_s8, 16, %s104_s3, [#allocation12]  }
  0x30   :  { %s5103_s6 = scalar_lea.vmem %s45_s4, 256  ;;  %p5108_p2 = scmp.lt.s32.totalorder %s45_s4, %s45_s4 }
  0x31   :  { %p5104_p1 = scmp.ne.s32.totalorder %s45_s4, %s5103_s6  ;;  %p5109_p3 = scmp.lt.s32.totalorder %s5103_s6, %s5103_s6 }
  0x33   :  { %p5110_p4 = por %p5109_p3, %p5108_p2 }
  0x35   :  { %p5111_p5 = pnand %p5110_p4, %p5104_p1 }
  0x37   :  { %5114 = shalt.err (!%p5111_p5)
}
  0x38   :  { %s6550_s26 = sld [smem:[#allocation29_spill]]  ;;  %s5275_s2 = smov [#allocation7]  }
  0x39   :  { %s71_s27 = sshll.u32 %s5275_s2, 4  ;;  %s5276_s29 = smov [#allocation10]   ;;  %s72_s27 = int_to_ptr.vmem [resolvable:$true] %s71_s27 }
  0x3a   :  { %s93_s28 = sshll.u32 %s5276_s29, 4  ;;  %s5123_s8 = scalar_lea.vmem %s72_s27, 16  ;;  %s94_s28 = int_to_ptr.vmem [resolvable:$true] %s93_s28 }
  0x3b   :  { %p5124_p6 = scmp.ne.s32.totalorder %s72_s27, %s5123_s8  ;;  %s5127_s3 = scalar_lea.vmem %s72_s27, 32 }
  0x3c   :  { %p5128_p7 = scmp.lt.s32.totalorder %s72_s27, %s72_s27  ;;  %p5129_p8 = scmp.lt.s32.totalorder %s5127_s3, %s5123_s8 }
  0x3e   :  { %50 = dma.hbm_to_vmem [thread:$0]  %s6550_s26, 256, %s45_s4, [#allocation3], %s5271_s0, %s5271_s0, %s5272_s23  }
  0x3f   :  { %p5130_p9 = por %p5129_p8, %p5128_p7 }
  0x41   :  { %p5131_p10 = pnand %p5130_p9, %p5124_p6 }
  0x43   :  { %5134 = shalt.err (!%p5131_p10)
}
  0x44   :  { %s6551_s24 = sld [smem:[#allocation32_spill]]  ;;  %s5143_s6 = scalar_lea.vmem %s94_s28, 16 }
  0x45   :  { %p5144_p11 = scmp.ne.s32.totalorder %s94_s28, %s5143_s6  ;;  %s5147_s4 = scalar_lea.vmem %s94_s28, 32 }
  0x46   :  { %p5148_p12 = scmp.lt.s32.totalorder %s94_s28, %s94_s28  ;;  %p5149_p13 = scmp.lt.s32.totalorder %s5147_s4, %s5143_s6 }
  0x48   :  { %p5150_p0 = por %p5149_p13, %p5148_p12 }
  0x4a   :  { %74 = dma.hbm_to_vmem [thread:$0]  %s6551_s24, 16, %s72_s27, [#allocation6]  }
  0x4b   :  { %p5151_p1 = pnand %p5150_p0, %p5144_p11 }
  0x4d   :  { %5154 = shalt.err (!%p5151_p1)
}
  0x4e   :  { %96 = dma.hbm_to_vmem [thread:$0]  %s6522_s7, 16, %s94_s28, [#allocation9]  }
  0x4f   :  { %s5277_s26 = smov [#allocation13]   ;;  %s5278_s29 = smov [#allocation14]  }
  0x50   :  { %s112_s2 = sshll.u32 %s5277_s26, 4  ;;  %s126_s8 = sshll.u32 %s5278_s29, 4  ;;  %s113_s2 = int_to_ptr.vmem [resolvable:$true] %s112_s2  ;;  %s127_s8 = int_to_ptr.vmem [resolvable:$true] %s126_s8 }
  0x51   :  { %s5163_s3 = scalar_lea.vmem %s113_s2, 256  ;;  %p5168_p3 = scmp.lt.s32.totalorder %s113_s2, %s113_s2 }
  0x52   :  { %p5164_p2 = scmp.ne.s32.totalorder %s113_s2, %s5163_s3  ;;  %p5169_p4 = scmp.lt.s32.totalorder %s5163_s3, %s5163_s3 }
  0x54   :  { %p5170_p5 = por %p5169_p4, %p5168_p3 }
  0x56   :  { %p5171_p6 = pnand %p5170_p5, %p5164_p2 }
  0x58   :  { %5174 = shalt.err (!%p5171_p6)
}
  0x59   :  { %118 = dma.hbm_to_vmem [thread:$0]  %s6524_s9, 256, %s113_s2, [#allocation12], %s5271_s0, %s5271_s0, %s5272_s23  }
  0x5a   :  { %s5183_s7 = scalar_lea.vmem %s127_s8, 256  ;;  %p5188_p8 = scmp.lt.s32.totalorder %s127_s8, %s127_s8 }
  0x5b   :  { %p5184_p7 = scmp.ne.s32.totalorder %s127_s8, %s5183_s7  ;;  %p5189_p9 = scmp.lt.s32.totalorder %s5183_s7, %s5183_s7 }
  0x5d   :  { %p5190_p10 = por %p5189_p9, %p5188_p8 }
  0x5f   :  { %p5191_p11 = pnand %p5190_p10, %p5184_p7 }
  0x61   :  { %5194 = shalt.err (!%p5191_p11)
}
  0x62   :  { %132 = dma.hbm_to_vmem [thread:$0]  %s6526_s11, 256, %s127_s8, [#allocation15], %s5271_s0, %s5271_s0, %s5272_s23  }
  0x63   :  { %5255 = dma.done.wait [#allocation3], 256  }
  0x64   :  { %5256 = vsyncadd [#allocation3], 4294967040 }
  0x65   :  { %5257 = dma.done.wait [#allocation6], 272  }
  0x66   :  { %5258 = vsyncadd [#allocation6], 4294967024 }
  0x67   :  { %5259 = dma.done.wait [#allocation9], 272  }
  0x68   :  { %5260 = vsyncadd [#allocation9], 4294967024 }
  0x69   :  { %5261 = dma.done.wait [#allocation12], 272  }
  0x6a   :  { %5262 = vsyncadd [#allocation12], 4294967024 }
  0x6b   :  { %5263 = dma.done.wait [#allocation15], 256  }
  0x6c   :  { %5264 = vsyncadd [#allocation15], 4294967040  ;;  %v5279_v0 = vmov 0.0   ;;  %v5280_v1 = vmov 0   ;;  %vm174_vm0 = vcmask 261120   ;;  %vm5281_vm1 = vmmov 0  }
  0x6d   :  { %4327 = vmatprep.subr.bf16.mxu1 %v5279_v0  ;;  %242 = vmatprep.mubr.bf16.mxu0 %v5280_v1  ;;  %175 = vst.msk [vmem:[#allocation16] sm:$0xff] %vm174_vm0, %v5279_v0  ;;  %176 = vst.msk [vmem:[#allocation16 + $0x8] sm:$0xff] %vm174_vm0, %v5279_v0  ;;  %s6552_s23 = sld [smem:[#allocation28_spill]]  ;;  %vm206_vm2 = vcmask 130048   ;;  %v5497_v12 = vld [vmem:[#allocation7] ss:$0 sm:$0xff] }
  0x6e   :  { %4331 = vmatprep.mubr.msk.bf16.mxu1 %vm5281_vm1, %v5279_v0  ;;  %177 = vst.msk [vmem:[#allocation17] sm:$0xff] %vm174_vm0, %v5279_v0  ;;  %178 = vst.msk [vmem:[#allocation17 + $0x8] sm:$0xff] %vm174_vm0, %v5279_v0  ;;  %s6553_s4 = sld [smem:[#allocation31_spill]]  ;;  %s5282_s27 = smov 32   ;;  %v5506_v32 = vld [vmem:[#allocation2 + $0x8] sm:$0xff]   ;;  %v5508_v33 = vld [vmem:[#allocation13 + $0x8] sm:$0xff]  }
  0x6f   :  { %179 = vst.msk [vmem:[#allocation19] sm:$0xff] %vm174_vm0, %v5279_v0  ;;  %180 = vst.msk [vmem:[#allocation19 + $0x8] sm:$0xff] %vm174_vm0, %v5279_v0  ;;  %s6554_s29 = sld [smem:[#allocation27_spill]]  ;;  %v5512_v34 = vld [vmem:[#allocation2] sm:$0xff]   ;;  %v5514_v35 = vld [vmem:[#allocation13] sm:$0xff]   ;;  %s5283_s1 = smov 96  }
  0x70   :  { %v5527_v42 = vld [vmem:[#allocation8 + $0x8] sm:$0xff]   ;;  %v5534_v44 = vld [vmem:[#allocation8] sm:$0xff]   ;;  %v5548_v55 = vld [vmem:[#allocation11] ss:$0 sm:$0xff]  ;;  %vm3827_vm3 = vcmask 64512   ;;  %vm181_vm4 = vcmask 15360  }
  0x71   :  { %v5552_v61 = vld [vmem:[#allocation10] ss:$0 sm:$0xff]  ;;  %182 = vst.msk [vmem:[%s6533_s18] sm:$0xff] %vm181_vm4, %v5279_v0  ;;  %183 = vst.msk [vmem:[%s6534_s19] sm:$0xff] %vm181_vm4, %v5279_v0 }
  0x73   :  { %v5462_v2 = vld [vmem:[%s6552_s23 + $0x4] ss:$8 sps:$4 sm:$0xff]   ;;  %v5473_v4 = vld [vmem:[%s6552_s23] ss:$8 sps:$4 sm:$0xff]  }
  0x74   :  { %v5467_v3 = vld [vmem:[%s6553_s4 + $0x8] sm:$0xff]   ;;  %224 = vmatprep.subr.bf16.mxu0 %v5462_v2  ;;  %v5482_v6 = vld [vmem:[%s6553_s4] sm:$0xff]   ;;  %v184_v7 = vld [vmem:[#allocation16] sm:$0xff] }
  0x75   :  { %v193_v5 = vld [vmem:[%s6554_s29] sm:$0xf]  ;;  %4328 = vmatpush3.bf16.msra.mxu1 %v5467_v3  ;;  %225 = vmatpush1.bf16.msra.mxu0 %v5473_v4  ;;  %v251_v8 = vpack.c.bf16 %v184_v7, %v184_v7  ;;  %v187_v21 = vld [vmem:[#allocation17] sm:$0xff] }
  0x76   :  { %4329 = vmatprep.subr.bf16.mxu1 %v5279_v0  ;;  %4335 = vmatprep.subr.bf16.mxu0 %v5279_v0  ;;  %v186_v37 = vld [vmem:[#allocation16 + $0x8] sm:$0xff]  ;;  %v190_v45 = vld [vmem:[#allocation19] sm:$0xff] }
  0x77   :  { %v349_v38 = vpack.c.bf16 %v186_v37, %v186_v37  ;;  %v507_v46 = vpack.c.bf16 %v190_v45, %v190_v45 }
  0x78   :  { %4053 = vmatmul.mubr.msk.bf16.vlgmr.msra.gmra.mxu0 %vm206_vm2, %v193_v5 }
  0x79   :  { %4330 = vmatpush3.bf16.msra.mxu1 %v5482_v6  ;;  %4339 = vmatprep.mubr.msk.bf16.mxu0 %vm5281_vm1, %v5279_v0 }
  0x7a   :  { %4343 = vmatprep.subr.bf16.mxu1 %v5279_v0  ;;  %4336 = vmatpush3.bf16.msra.mxu0 %v5506_v32 }
  0x7b   :  { %4337 = vmatprep.subr.bf16.mxu0 %v5279_v0 }
  0x7c   :  { %4332 = vmatmul.mubr.msk.bf16.vlgmr.msra.gmra.mxu1 %vm174_vm0, %v251_v8 }
  0x7d   :  { %4347 = vmatprep.mubr.msk.bf16.mxu1 %vm5281_vm1, %v5279_v0  ;;  %4344 = vmatpush3.bf16.msra.mxu1 %v5508_v33 }
  0x7e   :  { %4345 = vmatprep.subr.bf16.mxu1 %v5279_v0  ;;  %4338 = vmatpush3.bf16.msra.mxu0 %v5512_v34 }
  0x7f   :  { %4351 = vmatprep.subr.bf16.mxu0 %v5279_v0 }
  0x81   :  { %4346 = vmatpush3.bf16.msra.mxu1 %v5514_v35 }
  0x82   :  { %4359 = vmatprep.subr.bf16.mxu1 %v5279_v0 }
  0x84   :  { %4348 = vmatmul.mubr.msk.bf16.vlgmr.msra.gmra.mxu1 %vm174_vm0, %v349_v38 }
  0x85   :  { %4363 = vmatprep.mubr.msk.bf16.mxu1 %vm5281_vm1, %v5279_v0 }
 0x138   :  { %v244_v9 = vpop.f32.mrf.mxu0 }
 0x13a   :  { %v5495_v10 = vpop.f32.mrf.mxu0 }
 0x13b   :  { %v581_v62 = vadd.f32 %v5552_v61, %v5495_v10  ;;  %v5563_v10 = vld [vmem:[#allocation14] sm:$0xff]  }
 0x13c   :  { %v306_v11 = vpop.f32.mrf.mxu1  ;;  %v248_v14 = vpop.f32.mrf.mxu0 }
 0x13d   :  { %v307_v13 = vadd.f32 %v306_v11, %v244_v9 }
 0x13e   :  { %v4333_v15 = vpop.f32.mrf.mxu1  ;;  %v249_v17 = vpop.f32.mrf.mxu0 }
 0x13f   :  { %v319_v16 = vadd.f32 %v5497_v12, %v307_v13  ;;  %v5560_v17 = vld [vmem:[#allocation5 + $0x8] sm:$0xff]  }
 0x140   :  { %v309_v18 = vpop.f32.mrf.mxu1 }
 0x141   :  { %4767 = vtanh.f32 %v319_v16  ;;  %v4058_v22 = vmul.f32 -1.442695, %v319_v16  ;;  %v5558_v16 = vld [vmem:[#allocation14 + $0x8] sm:$0xff]   ;;  %v5566_v18 = vld [vmem:[#allocation19 + $0x8] sm:$0xff] }
 0x142   :  { %v4334_v19 = vpop.f32.mrf.mxu1  ;;  %4360 = vmatpush3.bf16.msra.mxu1 %v5558_v16 }
 0x143   :  { %4769 = vpow2.f32 %v4058_v22  ;;  %v5568_v19 = vld [vmem:[#allocation5] sm:$0xff]   ;;  %4361 = vmatprep.subr.bf16.mxu1 %v5279_v0  ;;  %v4082_v22 = vld [vmem:[%s6554_s29 + $0x4] sm:$0xf] }
 0x144   :  { %v5544_v47 = vpop.f32.mrf.mxu1 }
 0x146   :  { %v4349_v48 = vpop.f32.mrf.mxu1  ;;  %4362 = vmatpush3.bf16.msra.mxu1 %v5563_v10 }
 0x147   :  { %798 = vmatprep.subr.bf16.mxu1 %v5462_v2 }
 0x148   :  { %v468_v49 = vpop.f32.mrf.mxu1 }
 0x14a   :  { %v4350_v50 = vpop.f32.mrf.mxu1 }
 0x14e   :  { %v4768_v20 = vpop.eup %4767 }
 0x14f   :  { %333 = vrot.lane.b32.xlu0 %v4768_v20, %s5271_s0  ;;  %v613_v20 = vpack.c.bf16 %v5566_v18, %v5566_v18 }
 0x150   :  { %v4770_v23 = vpop.eup %4769 }
 0x151   :  { %v323_v24 = vadd.f32 1.0, %v4770_v23  ;;  %4364 = vmatmul.mubr.msk.bf16.vlgmr.msra.gmra.mxu1 %vm174_vm0, %v613_v20 }
 0x152   :  { %799 = vmatpush1.bf16.msra.mxu1 %v5473_v4  ;;  %816 = vmatprep.mubr.bf16.mxu1 %v5280_v1 }
 0x153   :  { %328 = vrot.lane.b32.xlu0 %v187_v21, %s5282_s27  ;;  %4771 = vrcp.f32 %v323_v24  ;;  %4383 = vmatprep.subr.bf16.mxu1 %v5279_v0 }
 0x159   :  { %4083 = vmatmul.mubr.msk.bf16.vlgmr.msra.gmra.mxu1 %vm206_vm2, %v4082_v22 }
 0x15a   :  { %4384 = vmatpush3.bf16.msra.mxu1 %v5506_v32  ;;  %4387 = vmatprep.mubr.msk.bf16.mxu1 %vm5281_vm1, %v5279_v0 }
 0x15b   :  { %4385 = vmatprep.subr.bf16.mxu1 %v5279_v0 }
 0x15e   :  { %4386 = vmatpush3.bf16.msra.mxu1 %v5512_v34 }
 0x15f   :  { %4399 = vmatprep.subr.bf16.mxu1 %v5279_v0 }
 0x160   :  { %v4772_v25 = vpop.eup %4771 }
 0x1c1   :  { %v334_v26 = vpop.permute.xlu0 %333 }
 0x1c2   :  { %v336_v27 = vmul.f32 %v4772_v25, %v334_v26 }
 0x1c4   :  { %338 = vrot.lane.b32.xlu1 %v336_v27, %s5282_s27 }
 0x1c5   :  { %v329_v28 = vpop.permute.xlu0 %328 }
 0x1c6   :  { %v331_v29 = vmul.f32 %v4772_v25, %v329_v28 }
 0x236   :  { %v339_v30 = vpop.permute.xlu1 %338 }
 0x237   :  { %v5503_v31 = vadd.f32 %v339_v30, %v331_v29  ;;  %v674_v30 = vpop.f32.mrf.mxu1 }
 0x239   :  { %4773 = vtanh.f32 %v5503_v31 }
 0x246   :  { %v4774_v36 = vpop.eup %4773 }
 0x247   :  { %344 = vrot.lane.b32.xlu1 %v4774_v36, %s5271_s0  ;;  %v4365_v36 = vpop.f32.mrf.mxu1 }
 0x249   :  { %v677_v37 = vpop.f32.mrf.mxu1 }
 0x24b   :  { %v4366_v38 = vpop.f32.mrf.mxu1 }
 0x2b9   :  { %v345_v39 = vpop.permute.xlu1 %344 }
 0x2ba   :  { %v347_v40 = vmul.f32 %v4772_v25, %v345_v39 }
 0x2bc   :  { %v348_v41 = vpack.c.bf16 %v347_v40, %v347_v40  ;;  %v818_v40 = vpop.f32.mrf.mxu1 }
 0x2be   :  { %359 = vrot.lane.b32.xlu0 %v348_v41, %s5282_s27  ;;  %v5616_v41 = vpop.f32.mrf.mxu1 }
 0x330   :  { %v5529_v43 = vpop.permute.xlu0 %359 }
 0x331   :  { %4340 = vmatmul.mubr.msk.bf16.vlgmr.msra.gmra.mxu0 %vm174_vm0, %v5529_v43 }
 0x332   :  { %4352 = vmatpush3.bf16.msra.mxu0 %v5527_v42  ;;  %4355 = vmatprep.mubr.msk.bf16.mxu0 %vm5281_vm1, %v5279_v0 }
 0x333   :  { %4353 = vmatprep.subr.bf16.mxu0 %v5279_v0 }
 0x336   :  { %4354 = vmatpush3.bf16.msra.mxu0 %v5534_v44 }
 0x337   :  { %4367 = vmatprep.subr.bf16.mxu0 %v5279_v0 }
 0x339   :  { %4356 = vmatmul.mubr.msk.bf16.vlgmr.msra.gmra.mxu0 %vm174_vm0, %v507_v46 }
 0x33a   :  { %4371 = vmatprep.mubr.msk.bf16.mxu0 %vm5281_vm1, %v5279_v0  ;;  %4368 = vmatpush3.bf16.msra.mxu0 %v5560_v17 }
 0x33b   :  { %4369 = vmatprep.subr.bf16.mxu0 %v5279_v0 }
 0x33e   :  { %4370 = vmatpush3.bf16.msra.mxu0 %v5568_v19 }
 0x33f   :  { %4375 = vmatprep.subr.bf16.mxu0 %v5279_v0 }
 0x3f1   :  { %v5546_v51 = vpop.f32.mrf.mxu0 }
 0x3f3   :  { %v4341_v52 = vpop.f32.mrf.mxu0 }
 0x3f5   :  { %v413_v53 = vpop.f32.mrf.mxu0 }
 0x3f7   :  { %v4342_v54 = vpop.f32.mrf.mxu0 }
 0x3f9   :  { %v568_v56 = vpop.f32.mrf.mxu0 }
 0x3fa   :  { %v569_v57 = vadd.f32 %v5548_v55, %v568_v56 }
 0x3fb   :  { %v4357_v58 = vpop.f32.mrf.mxu0 }
 0x3fc   :  { %590 = vrot.lane.b32.xlu1 %v569_v57, %s5271_s0  ;;  %v582_v63 = vadd.f32 %v581_v62, %v569_v57 }
 0x3fd   :  { %v571_v59 = vpop.f32.mrf.mxu0 }
 0x3fe   :  { %v4072_v5 = vmul.f32 -1.442695, %v582_v63 }
 0x3ff   :  { %v4358_v60 = vpop.f32.mrf.mxu0 }
 0x400   :  { %4775 = vpow2.f32 %v4072_v5 }
 0x40d   :  { %v4776_v7 = vpop.eup %4775 }
 0x40e   :  { %v586_v8 = vadd.f32 1.0, %v4776_v7 }
 0x410   :  { %4777 = vrcp.f32 %v586_v8 }
 0x41d   :  { %v4778_v9 = vpop.eup %4777 }
 0x41e   :  { %v600_v24 = vsub.f32 1.0, %v4778_v9 }
 0x46e   :  { %v591_v11 = vpop.permute.xlu1 %590 }
 0x46f   :  { %v593_v13 = vmul.f32 %v4778_v9, %v591_v11 }
 0x471   :  { %595 = vrot.lane.b32.xlu0 %v593_v13, %s5271_s0  ;;  %v5627_v13 = vld [vmem:[%s6525_s10] ss:$0 sm:$0xff] }
 0x475   :  { %607 = vrot.lane.b32.xlu0 %v190_v45, %s5282_s27  ;;  %v822_v45 = vpop.f32.mrf.mxu1 }
 0x477   :  { %v823_v46 = vpop.f32.mrf.mxu1 }
 0x4e3   :  { %v596_v14 = vpop.permute.xlu0 %595 }
 0x4e4   :  { %v598_v15 = vadd.f32 %v596_v14, %v581_v62 }
 0x4e6   :  { %4779 = vtanh.f32 %v598_v15 }
 0x4e7   :  { %v608_v23 = vpop.permute.xlu0 %607 }
 0x4e8   :  { %v610_v26 = vmul.f32 %v4778_v9, %v608_v23  ;;  %v466_v9 = vadd.f32 %v5544_v47, %v5546_v51  ;;  %v5638_v23 = vld [vmem:[%s6528_s13] ss:$0 sm:$0xff] }
 0x4ea   :  { %v478_v20 = vadd.f32 %v5627_v13, %v466_v9 }
 0x4f3   :  { %v4780_v21 = vpop.eup %4779 }
 0x4f4   :  { %602 = vrot.lane.b32.xlu1 %v4780_v21, %s5283_s1 }
 0x566   :  { %v603_v25 = vpop.permute.xlu1 %602 }
 0x567   :  { %v605_v27 = vmul.f32 %v603_v25, %v600_v24  ;;  %v675_v24 = vadd.f32 %v5638_v23, %v674_v30  ;;  %v189_v25 = vld [vmem:[#allocation17 + $0x8] sm:$0xff] }
 0x569   :  { %v5593_v28 = vadd.f32 %v610_v26, %v605_v27  ;;  %v5647_v26 = vld [vmem:[%s6527_s12] ss:$0 sm:$0xff] }
 0x56b   :  { %v612_v29 = vpack.c.bf16 %v5593_v28, %v5593_v28 }
 0x56d   :  { %692 = vrot.lane.b32.xlu1 %v612_v29, %s5283_s1 }
 0x5df   :  { %v5598_v39 = vpop.permute.xlu1 %692 }
 0x5e0   :  { %4372 = vmatmul.mubr.msk.bf16.vlgmr.msra.gmra.mxu0 %vm174_vm0, %v5598_v39 }
 0x5e1   :  { %4376 = vmatpush3.bf16.msra.mxu0 %v5467_v3  ;;  %4379 = vmatprep.mubr.msk.bf16.mxu0 %vm5281_vm1, %v5279_v0 }
 0x5e2   :  { %4377 = vmatprep.subr.bf16.mxu0 %v5279_v0 }
 0x5e5   :  { %4378 = vmatpush3.bf16.msra.mxu0 %v5482_v6 }
 0x5e6   :  { %4391 = vmatprep.subr.bf16.mxu0 %v5279_v0 }
 0x5e8   :  { %4380 = vmatmul.mubr.msk.bf16.vlgmr.msra.gmra.mxu0 %vm174_vm0, %v5529_v43 }
 0x5e9   :  { %4392 = vmatpush3.bf16.msra.mxu0 %v5508_v33  ;;  %4395 = vmatprep.mubr.msk.bf16.mxu0 %vm5281_vm1, %v5279_v0 }
 0x5ea   :  { %4393 = vmatprep.subr.bf16.mxu0 %v5279_v0 }
 0x5ed   :  { %4394 = vmatpush3.bf16.msra.mxu0 %v5514_v35 }
 0x5ee   :  { %4407 = vmatprep.subr.bf16.mxu0 %v5279_v0 }
 0x6a0   :  { %v743_v48 = vpop.f32.mrf.mxu0 }
 0x6a1   :  { %v744_v27 = vadd.f32 %v5647_v26, %v743_v48  ;;  %v4066_v48 = vmul.f32 -1.442695, %v478_v20 }
 0x6a2   :  { %v4373_v49 = vpop.f32.mrf.mxu0 }
 0x6a3   :  { %v749_v29 = vadd.f32 %v744_v27, %v675_v24 }
 0x6a4   :  { %v746_v50 = vpop.f32.mrf.mxu0 }
 0x6a5   :  { %v4081_v36 = vmul.f32 -1.442695, %v749_v29 }
 0x6a6   :  { %v4374_v43 = vpop.f32.mrf.mxu0 }
 0x6a8   :  { %v859_v52 = vpop.f32.mrf.mxu0 }
 0x6a9   :  { %v860_v53 = vadd.f32 %v859_v52, %v818_v40 }
 0x6aa   :  { %v4381_v54 = vpop.f32.mrf.mxu0 }
 0x6ab   :  { %v865_v56 = vadd.f32 %v5497_v12, %v860_v53 }
 0x6ac   :  { %v862_v57 = vpop.f32.mrf.mxu0 }
 0x6ad   :  { %4781 = vtanh.f32 %v865_v56  ;;  %v4085_v60 = vmul.f32 -1.442695, %v865_v56 }
 0x6ae   :  { %v4382_v58 = vpop.f32.mrf.mxu0 }
 0x6af   :  { %4783 = vpow2.f32 %v4085_v60 }
 0x6ba   :  { %v4782_v59 = vpop.eup %4781 }
 0x6bb   :  { %875 = vrot.lane.b32.xlu0 %v4782_v59, %s5271_s0 }
 0x6bc   :  { %v4784_v62 = vpop.eup %4783 }
 0x6bd   :  { %v869_v63 = vadd.f32 1.0, %v4784_v62 }
 0x6bf   :  { %4785 = vrcp.f32 %v869_v63 }
 0x6cc   :  { %v4786_v5 = vpop.eup %4785 }
 0x6cd   :  { %v873_v11 = vmul.f32 %v4786_v5, %v5503_v31 }
 0x72d   :  { %v876_v7 = vpop.permute.xlu0 %875 }
 0x72e   :  { %v878_v8 = vmul.f32 %v4786_v5, %v876_v7 }
 0x730   :  { %880 = vrot.lane.b32.xlu1 %v878_v8, %s5282_s27 }
 0x7a2   :  { %v881_v14 = vpop.permute.xlu1 %880 }
 0x7a3   :  { %v5629_v15 = vadd.f32 %v881_v14, %v873_v11 }
 0x7a5   :  { %4787 = vtanh.f32 %v5629_v15 }
 0x7a6   :  { %4789 = vtanh.f32 %v478_v20 }
 0x7a7   :  { %4791 = vpow2.f32 %v4081_v36 }
 0x7b2   :  { %v4788_v21 = vpop.eup %4787 }
 0x7b3   :  { %886 = vrot.lane.b32.xlu0 %v4788_v21, %s5271_s0  ;;  %v4790_v22 = vpop.eup %4789 }
 0x7b4   :  { %v4792_v37 = vpop.eup %4791 }
 0x7b5   :  { %v753_v38 = vadd.f32 1.0, %v4792_v37 }
 0x7b7   :  { %492 = vrot.lane.b32.xlu0 %v4790_v22, %s5271_s0  ;;  %4793 = vrcp.f32 %v753_v38 }
 0x7b8   :  { %4795 = vpow2.f32 %v4066_v48 }
 0x7c4   :  { %v5658_v30 = vpop.eup %4793 }
 0x7c5   :  { %v4796_v49 = vpop.eup %4795  ;;  %v767_v48 = vsub.f32 1.0, %v5658_v30 }
 0x7c6   :  { %v482_v50 = vadd.f32 1.0, %v4796_v49 }
 0x7c8   :  { %4797 = vrcp.f32 %v482_v50 }
 0x7d5   :  { %v4798_v59 = vpop.eup %4797 }
 0x825   :  { %v887_v31 = vpop.permute.xlu0 %886 }
 0x826   :  { %v889_v47 = vmul.f32 %v4786_v5, %v887_v31  ;;  %v1049_v5 = vadd.f32 %v5552_v61, %v5616_v41 }
 0x828   :  { %v890_v51 = vpack.c.bf16 %v889_v47, %v889_v47 }
 0x829   :  { %v493_v57 = vpop.permute.xlu0 %492 }
 0x82a   :  { %893 = vrot.lane.b32.xlu1 %v890_v51, %s5282_s27  ;;  %v495_v62 = vmul.f32 %v4798_v59, %v493_v57 }
 0x82e   :  { %757 = vrot.lane.b32.xlu1 %v675_v24, %s5271_s0 }
 0x832   :  { %487 = vrot.lane.b32.xlu1 %v189_v25, %s5282_s27 }
 0x89c   :  { %v5650_v40 = vpop.permute.xlu1 %893 }
 0x89d   :  { %4388 = vmatmul.mubr.msk.bf16.vlgmr.msra.gmra.mxu1 %vm174_vm0, %v5650_v40 }
 0x89e   :  { %4400 = vmatpush3.bf16.msra.mxu1 %v5527_v42  ;;  %4403 = vmatprep.mubr.msk.bf16.mxu1 %vm5281_vm1, %v5279_v0 }
 0x89f   :  { %4401 = vmatprep.subr.bf16.mxu1 %v5279_v0 }
 0x8a0   :  { %v758_v45 = vpop.permute.xlu1 %757 }
 0x8a1   :  { %v760_v46 = vmul.f32 %v5658_v30, %v758_v45 }
 0x8a2   :  { %4402 = vmatpush3.bf16.msra.mxu1 %v5534_v44 }
 0x8a3   :  { %762 = vrot.lane.b32.xlu1 %v760_v46, %s5271_s0  ;;  %4415 = vmatprep.subr.bf16.mxu1 %v5279_v0 }
 0x8a4   :  { %v488_v11 = vpop.permute.xlu1 %487 }
 0x8a5   :  { %4404 = vmatmul.mubr.msk.bf16.vlgmr.msra.gmra.mxu1 %vm174_vm0, %v5598_v39  ;;  %v490_v51 = vmul.f32 %v4798_v59, %v488_v11 }
 0x8a6   :  { %4416 = vmatpush3.bf16.msra.mxu1 %v5560_v17  ;;  %4419 = vmatprep.mubr.msk.bf16.mxu1 %vm5281_vm1, %v5279_v0 }
 0x8a7   :  { %4417 = vmatprep.subr.bf16.mxu1 %v5279_v0 }
 0x8aa   :  { %4418 = vmatpush3.bf16.msra.mxu1 %v5568_v19 }
 0x8ab   :  { %4423 = vmatprep.subr.bf16.mxu1 %v5279_v0 }
 0x915   :  { %v763_v20 = vpop.permute.xlu1 %762 }
 0x916   :  { %v765_v21 = vadd.f32 %v763_v20, %v744_v27 }
 0x95d   :  { %v5672_v43 = vpop.f32.mrf.mxu1 }
 0x95f   :  { %v4389_v52 = vpop.f32.mrf.mxu1 }
 0x961   :  { %v935_v39 = vpop.f32.mrf.mxu1 }
 0x963   :  { %v4390_v53 = vpop.f32.mrf.mxu1 }
 0x965   :  { %v1043_v54 = vpop.f32.mrf.mxu1 }
 0x966   :  { %v1044_v56 = vadd.f32 %v5548_v55, %v1043_v54 }
 0x967   :  { %v4405_v58 = vpop.f32.mrf.mxu1 }
 0x968   :  { %1058 = vrot.lane.b32.xlu0 %v1044_v56, %s5271_s0  ;;  %v1050_v7 = vadd.f32 %v1049_v5, %v1044_v56 }
 0x969   :  { %v1046_v60 = vpop.f32.mrf.mxu1 }
 0x96a   :  { %v4090_v8 = vmul.f32 -1.442695, %v1050_v7 }
 0x96b   :  { %v4406_v63 = vpop.f32.mrf.mxu1 }
 0x96c   :  { %497 = vrot.lane.b32.xlu0 %v495_v62, %s5282_s27  ;;  %4799 = vpow2.f32 %v4090_v8  ;;  %v4094_v62 = vld [vmem:[%s6554_s29 + $0x8] sm:$0xf] }
 0x979   :  { %v4800_v9 = vpop.eup %4799 }
 0x97a   :  { %v1054_v14 = vadd.f32 1.0, %v4800_v9 }
 0x97c   :  { %4801 = vrcp.f32 %v1054_v14 }
 0x97d   :  { %4803 = vtanh.f32 %v765_v21 }
 0x989   :  { %v4802_v22 = vpop.eup %4801 }
 0x98a   :  { %v4804_v41 = vpop.eup %4803  ;;  %v1068_v54 = vsub.f32 1.0, %v4802_v22  ;;  %v1074_v57 = vmul.f32 %v4802_v22, %v5593_v28 }
 0x9da   :  { %v1059_v31 = vpop.permute.xlu0 %1058 }
 0x9db   :  { %v1061_v47 = vmul.f32 %v4802_v22, %v1059_v31 }
 0x9dd   :  { %1063 = vrot.lane.b32.xlu0 %v1061_v47, %s5271_s0 }
 0x9de   :  { %v498_v24 = vpop.permute.xlu0 %497 }
 0x9df   :  { %v5680_v25 = vadd.f32 %v498_v24, %v490_v51 }
 0x9e1   :  { %4805 = vtanh.f32 %v5680_v25  ;;  %769 = vrot.lane.b32.xlu0 %v4804_v41, %s5283_s1 }
 0x9ee   :  { %v4806_v29 = vpop.eup %4805 }
 0x9ef   :  { %503 = vrot.lane.b32.xlu1 %v4806_v29, %s5271_s0 }
 0x9f3   :  { %774 = vrot.lane.b32.xlu1 %v5566_v18, %s5282_s27 }
 0xa4f   :  { %v1064_v27 = vpop.permute.xlu0 %1063 }
 0xa50   :  { %v1066_v36 = vadd.f32 %v1064_v27, %v1049_v5 }
 0xa52   :  { %4807 = vtanh.f32 %v1066_v36 }
 0xa53   :  { %v770_v46 = vpop.permute.xlu0 %769 }
 0xa54   :  { %v772_v52 = vmul.f32 %v770_v46, %v767_v48 }
 0xa5f   :  { %v4808_v37 = vpop.eup %4807 }
 0xa60   :  { %1070 = vrot.lane.b32.xlu0 %v4808_v37, %s5283_s1 }
 0xa61   :  { %v504_v38 = vpop.permute.xlu1 %503 }
 0xa62   :  { %v506_v45 = vmul.f32 %v4798_v59, %v504_v38 }
 0xa64   :  { %v891_v49 = vpack.c.bf16 %v506_v45, %v506_v45 }
 0xa65   :  { %v775_v50 = vpop.permute.xlu1 %774 }
 0xa66   :  { %v777_v39 = vmul.f32 %v5658_v30, %v775_v50  ;;  %939 = vrot.lane.b32.xlu1 %v891_v49, %s5282_s27 }
 0xa68   :  { %v5691_v53 = vadd.f32 %v777_v39, %v772_v52 }
 0xa6a   :  { %v1077_v18 = vpack.c.bf16 %v5691_v53, %v5691_v53 }
 0xa6c   :  { %1079 = vrot.lane.b32.xlu0 %v1077_v18, %s5283_s1 }
 0xad2   :  { %v1071_v56 = vpop.permute.xlu0 %1070 }
 0xad3   :  { %v1073_v58 = vmul.f32 %v1071_v56, %v1068_v54 }
 0xad5   :  { %v5697_v59 = vadd.f32 %v1074_v57, %v1073_v58 }
 0xad7   :  { %v1076_v60 = vpack.c.bf16 %v5697_v59, %v5697_v59 }
 0xad8   :  { %v940_v30 = vpop.permute.xlu1 %939 }
 0xad9   :  { %4396 = vmatmul.mubr.msk.bf16.vlgmr.msra.gmra.mxu0 %vm174_vm0, %v940_v30  ;;  %1125 = vrot.lane.b32.xlu1 %v1076_v60, %s5283_s1 }
 0xada   :  { %4408 = vmatpush3.bf16.msra.mxu0 %v5558_v16  ;;  %4411 = vmatprep.mubr.msk.bf16.mxu0 %vm5281_vm1, %v5279_v0 }
 0xadb   :  { %4409 = vmatprep.subr.bf16.mxu0 %v5279_v0 }
 0xade   :  { %4410 = vmatpush3.bf16.msra.mxu0 %v5563_v10  ;;  %v1080_v28 = vpop.permute.xlu0 %1079 }
 0xadf   :  { %1215 = vmatprep.subr.bf16.mxu0 %v5462_v2 }
 0xae1   :  { %4412 = vmatmul.mubr.msk.bf16.vlgmr.msra.gmra.mxu0 %vm174_vm0, %v1080_v28 }
 0xae2   :  { %1216 = vmatpush1.bf16.msra.mxu0 %v5473_v4  ;;  %1233 = vmatprep.mubr.bf16.mxu0 %v5280_v1 }
 0xae3   :  { %4431 = vmatprep.subr.bf16.mxu0 %v5279_v0 }
 0xae9   :  { %4095 = vmatmul.mubr.msk.bf16.vlgmr.msra.gmra.mxu0 %vm206_vm2, %v4094_v62 }
 0xaea   :  { %4432 = vmatpush3.bf16.msra.mxu0 %v5506_v32  ;;  %4435 = vmatprep.mubr.msk.bf16.mxu0 %vm5281_vm1, %v5279_v0 }
 0xaeb   :  { %4433 = vmatprep.subr.bf16.mxu0 %v5279_v0 }
 0xaee   :  { %4434 = vmatpush3.bf16.msra.mxu0 %v5512_v34 }
 0xaef   :  { %4447 = vmatprep.subr.bf16.mxu0 %v5279_v0 }
 0xb4b   :  { %v5723_v63 = vpop.permute.xlu1 %1125 }
 0xb4c   :  { %4420 = vmatmul.mubr.msk.bf16.vlgmr.msra.gmra.mxu1 %vm174_vm0, %v5723_v63 }
 0xb4d   :  { %4424 = vmatpush3.bf16.msra.mxu1 %v5467_v3  ;;  %4427 = vmatprep.mubr.msk.bf16.mxu1 %vm5281_vm1, %v5279_v0 }
 0xb4e   :  { %4425 = vmatprep.subr.bf16.mxu1 %v5279_v0 }
 0xb51   :  { %4426 = vmatpush3.bf16.msra.mxu1 %v5482_v6 }
 0xb52   :  { %4439 = vmatprep.subr.bf16.mxu1 %v5279_v0 }
 0xb54   :  { %4428 = vmatmul.mubr.msk.bf16.vlgmr.msra.gmra.mxu1 %vm174_vm0, %v5650_v40 }
 0xb55   :  { %4440 = vmatpush3.bf16.msra.mxu1 %v5508_v33  ;;  %4443 = vmatprep.mubr.msk.bf16.mxu1 %vm5281_vm1, %v5279_v0 }
 0xb56   :  { %4441 = vmatprep.subr.bf16.mxu1 %v5279_v0 }
 0xb59   :  { %4442 = vmatpush3.bf16.msra.mxu1 %v5514_v35 }
 0xb5a   :  { %4455 = vmatprep.subr.bf16.mxu1 %v5279_v0 }
 0xb99   :  { %v978_v3 = vpop.f32.mrf.mxu0 }
 0xb9a   :  { %v979_v18 = vadd.f32 %v978_v3, %v5672_v43 }
 0xb9b   :  { %v4397_v5 = vpop.f32.mrf.mxu0 }
 0xb9c   :  { %v984_v58 = vadd.f32 %v5627_v13, %v979_v18 }
 0xb9d   :  { %v981_v7 = vpop.f32.mrf.mxu0 }
 0xb9e   :  { %v4088_v28 = vmul.f32 -1.442695, %v984_v58 }
 0xb9f   :  { %v4398_v6 = vpop.f32.mrf.mxu0 }
 0xba1   :  { %v1118_v8 = vpop.f32.mrf.mxu0 }
 0xba2   :  { %v1119_v7 = vadd.f32 %v5638_v23, %v1118_v8 }
 0xba3   :  { %v4413_v9 = vpop.f32.mrf.mxu0 }
 0xba5   :  { %v1121_v11 = vpop.f32.mrf.mxu0 }
 0xba7   :  { %v4414_v14 = vpop.f32.mrf.mxu0 }
 0xba9   :  { %v1235_v40 = vpop.f32.mrf.mxu0 }
 0xbab   :  { %v5741_v20 = vpop.f32.mrf.mxu0 }
 0xbad   :  { %v1239_v21 = vpop.f32.mrf.mxu0 }
 0xbaf   :  { %v1240_v22 = vpop.f32.mrf.mxu0 }
 0xc0c   :  { %v1164_v31 = vpop.f32.mrf.mxu1 }
 0xc0d   :  { %v1165_v8 = vadd.f32 %v5647_v26, %v1164_v31 }
 0xc0e   :  { %v4421_v47 = vpop.f32.mrf.mxu1 }
 0xc10   :  { %v1167_v51 = vpop.f32.mrf.mxu1 }
 0xc12   :  { %v4422_v24 = vpop.f32.mrf.mxu1 }
 0xc14   :  { %v1276_v41 = vpop.f32.mrf.mxu1 }
 0xc15   :  { %v1277_v29 = vadd.f32 %v1276_v41, %v1235_v40  ;;  %v1170_v40 = vadd.f32 %v1165_v8, %v1119_v7 }
 0xc16   :  { %v4429_v27 = vpop.f32.mrf.mxu1 }
 0xc17   :  { %v1282_v36 = vadd.f32 %v5497_v12, %v1277_v29  ;;  %v4093_v21 = vmul.f32 -1.442695, %v1170_v40 }
 0xc18   :  { %v1279_v37 = vpop.f32.mrf.mxu1 }
 0xc19   :  { %4809 = vtanh.f32 %v1282_v36  ;;  %v4097_v46 = vmul.f32 -1.442695, %v1282_v36 }
 0xc1a   :  { %v4430_v38 = vpop.f32.mrf.mxu1 }
 0xc1b   :  { %4811 = vpow2.f32 %v4097_v46 }
 0xc26   :  { %v4810_v45 = vpop.eup %4809 }
 0xc27   :  { %1292 = vrot.lane.b32.xlu0 %v4810_v45, %s5271_s0 }
 0xc28   :  { %v4812_v48 = vpop.eup %4811 }
 0xc29   :  { %v1286_v49 = vadd.f32 1.0, %v4812_v48 }
 0xc2b   :  { %4813 = vrcp.f32 %v1286_v49 }
 0xc38   :  { %v4814_v50 = vpop.eup %4813 }
 0xc39   :  { %v1290_v54 = vmul.f32 %v4814_v50, %v5629_v15 }
 0xc99   :  { %v1293_v52 = vpop.permute.xlu0 %1292 }
 0xc9a   :  { %v1295_v39 = vmul.f32 %v4814_v50, %v1293_v52  ;;  %v1466_v52 = vadd.f32 %v5552_v61, %v5741_v20 }
 0xc9c   :  { %1297 = vrot.lane.b32.xlu1 %v1295_v39, %s5282_s27 }
 0xd0e   :  { %v1298_v56 = vpop.permute.xlu1 %1297 }
 0xd0f   :  { %v5748_v57 = vadd.f32 %v1298_v56, %v1290_v54 }
 0xd11   :  { %4815 = vtanh.f32 %v5748_v57 }
 0xd12   :  { %4817 = vtanh.f32 %v984_v58 }
 0xd13   :  { %4819 = vpow2.f32 %v4088_v28 }
 0xd1e   :  { %v4816_v60 = vpop.eup %4815 }
 0xd1f   :  { %1303 = vrot.lane.b32.xlu0 %v4816_v60, %s5271_s0  ;;  %v4818_v30 = vpop.eup %4817 }
 0xd20   :  { %v4820_v62 = vpop.eup %4819 }
 0xd21   :  { %v988_v43 = vadd.f32 1.0, %v4820_v62 }
 0xd23   :  { %994 = vrot.lane.b32.xlu0 %v4818_v30, %s5271_s0  ;;  %4821 = vrcp.f32 %v988_v43 }
 0xd24   :  { %4823 = vpow2.f32 %v4093_v21 }
 0xd30   :  { %v4822_v9 = vpop.eup %4821 }
 0xd31   :  { %v4824_v22 = vpop.eup %4823  ;;  %v992_v24 = vmul.f32 %v4822_v9, %v5680_v25 }
 0xd32   :  { %v1174_v51 = vadd.f32 1.0, %v4824_v22 }
 0xd34   :  { %4825 = vrcp.f32 %v1174_v51 }
 0xd41   :  { %v4826_v46 = vpop.eup %4825 }
 0xd42   :  { %v1194_v21 = vmul.f32 %v4826_v46, %v5691_v53 }
 0xd91   :  { %v1304_v15 = vpop.permute.xlu0 %1303 }
 0xd92   :  { %v1306_v3 = vmul.f32 %v4814_v50, %v1304_v15 }
 0xd94   :  { %v1307_v5 = vpack.c.bf16 %v1306_v3, %v1306_v3 }
 0xd95   :  { %v995_v6 = vpop.permute.xlu0 %994 }
 0xd96   :  { %1310 = vrot.lane.b32.xlu1 %v1307_v5, %s5282_s27  ;;  %v997_v11 = vmul.f32 %v4822_v9, %v995_v6 }
 0xd9a   :  { %1178 = vrot.lane.b32.xlu1 %v1119_v7, %s5271_s0 }
 0xd9e   :  { %999 = vrot.lane.b32.xlu1 %v997_v11, %s5282_s27  ;;  %v1188_v11 = vsub.f32 1.0, %v4826_v46 }
 0xe08   :  { %v5758_v14 = vpop.permute.xlu1 %1310 }
 0xe09   :  { %4436 = vmatmul.mubr.msk.bf16.vlgmr.msra.gmra.mxu0 %vm174_vm0, %v5758_v14 }
 0xe0a   :  { %4448 = vmatpush3.bf16.msra.mxu0 %v5527_v42  ;;  %4451 = vmatprep.mubr.msk.bf16.mxu0 %vm5281_vm1, %v5279_v0 }
 0xe0b   :  { %4449 = vmatprep.subr.bf16.mxu0 %v5279_v0 }
 0xe0c   :  { %v1179_v47 = vpop.permute.xlu1 %1178 }
 0xe0d   :  { %v1181_v49 = vmul.f32 %v4826_v46, %v1179_v47 }
 0xe0e   :  { %4450 = vmatpush3.bf16.msra.mxu0 %v5534_v44 }
 0xe0f   :  { %4463 = vmatprep.subr.bf16.mxu0 %v5279_v0 }
 0xe11   :  { %4452 = vmatmul.mubr.msk.bf16.vlgmr.msra.gmra.mxu0 %vm174_vm0, %v5723_v63  ;;  %v1000_v63 = vpop.permute.xlu1 %999 }
 0xe12   :  { %4464 = vmatpush3.bf16.msra.mxu0 %v5560_v17  ;;  %4467 = vmatprep.mubr.msk.bf16.mxu0 %vm5281_vm1, %v5279_v0  ;;  %v5780_v29 = vadd.f32 %v1000_v63, %v992_v24 }
 0xe13   :  { %4465 = vmatprep.subr.bf16.mxu0 %v5279_v0 }
 0xe14   :  { %4827 = vtanh.f32 %v5780_v29 }
 0xe16   :  { %4466 = vmatpush3.bf16.msra.mxu0 %v5568_v19 }
 0xe17   :  { %4471 = vmatprep.subr.bf16.mxu0 %v5279_v0 }
 0xe21   :  { %v4828_v25 = vpop.eup %4827 }
 0xec9   :  { %v5778_v41 = vpop.f32.mrf.mxu0 }
 0xecb   :  { %v4437_v27 = vpop.f32.mrf.mxu0 }
 0xecd   :  { %v1352_v36 = vpop.f32.mrf.mxu0 }
 0xecf   :  { %v4438_v37 = vpop.f32.mrf.mxu0 }
 0xed1   :  { %v1460_v31 = vpop.f32.mrf.mxu0 }
 0xed2   :  { %v1461_v38 = vadd.f32 %v5548_v55, %v1460_v31 }
 0xed3   :  { %v4453_v45 = vpop.f32.mrf.mxu0 }
 0xed4   :  { %1475 = vrot.lane.b32.xlu0 %v1461_v38, %s5271_s0  ;;  %v1467_v39 = vadd.f32 %v1466_v52, %v1461_v38 }
 0xed5   :  { %v1463_v48 = vpop.f32.mrf.mxu0 }
 0xed6   :  { %v4102_v18 = vmul.f32 -1.442695, %v1467_v39 }
 0xed7   :  { %v4454_v50 = vpop.f32.mrf.mxu0 }
 0xed8   :  { %1183 = vrot.lane.b32.xlu0 %v1181_v49, %s5271_s0  ;;  %4829 = vpow2.f32 %v4102_v18 }
 0xedc   :  { %1005 = vrot.lane.b32.xlu0 %v4828_v25, %s5271_s0 }
 0xee5   :  { %v4830_v54 = vpop.eup %4829 }
 0xee6   :  { %v1471_v56 = vadd.f32 1.0, %v4830_v54 }
 0xee8   :  { %4831 = vrcp.f32 %v1471_v56 }
 0xef5   :  { %v4832_v58 = vpop.eup %4831 }
 0xef6   :  { %v1485_v53 = vsub.f32 1.0, %v4832_v58  ;;  %v1491_v63 = vmul.f32 %v4832_v58, %v5697_v59 }
 0xf46   :  { %v1476_v60 = vpop.permute.xlu0 %1475 }
 0xf47   :  { %v1478_v30 = vmul.f32 %v4832_v58, %v1476_v60 }
 0xf49   :  { %1480 = vrot.lane.b32.xlu1 %v1478_v30, %s5271_s0 }
 0xf4a   :  { %v1184_v28 = vpop.permute.xlu0 %1183 }
 0xf4b   :  { %v1186_v62 = vadd.f32 %v1184_v28, %v1165_v8 }
 0xf4d   :  { %4833 = vtanh.f32 %v1186_v62 }
 0xf4e   :  { %v1006_v43 = vpop.permute.xlu0 %1005 }
 0xf4f   :  { %v1008_v15 = vmul.f32 %v4822_v9, %v1006_v43 }
 0xf51   :  { %v1308_v20 = vpack.c.bf16 %v1008_v15, %v1008_v15 }
 0xf5a   :  { %v4834_v3 = vpop.eup %4833 }
 0xf5b   :  { %1190 = vrot.lane.b32.xlu1 %v4834_v3, %s5283_s1 }
 0xf5f   :  { %1356 = vrot.lane.b32.xlu1 %v1308_v20, %s5282_s27 }
 0xfbb   :  { %v1481_v5 = vpop.permute.xlu1 %1480 }
 0xfbc   :  { %v1483_v7 = vadd.f32 %v1481_v5, %v1466_v52 }
 0xfbe   :  { %4835 = vtanh.f32 %v1483_v7 }
 0xfcb   :  { %v4836_v6 = vpop.eup %4835 }
 0xfcc   :  { %1487 = vrot.lane.b32.xlu0 %v4836_v6, %s5283_s1 }
 0xfcd   :  { %v1191_v40 = vpop.permute.xlu1 %1190 }
 0xfce   :  { %v1193_v8 = vmul.f32 %v1191_v40, %v1188_v11 }
 0xfd0   :  { %v5794_v22 = vadd.f32 %v1194_v21, %v1193_v8 }
 0xfd1   :  { %v1357_v9 = vpop.permute.xlu1 %1356 }
 0xfd2   :  { %4444 = vmatmul.mubr.msk.bf16.vlgmr.msra.gmra.mxu1 %vm174_vm0, %v1357_v9  ;;  %v1494_v47 = vpack.c.bf16 %v5794_v22, %v5794_v22 }
 0xfd3   :  { %4456 = vmatpush3.bf16.msra.mxu1 %v5558_v16  ;;  %4459 = vmatprep.mubr.msk.bf16.mxu1 %vm5281_vm1, %v5279_v0 }
 0xfd4   :  { %1496 = vrot.lane.b32.xlu0 %v1494_v47, %s5283_s1  ;;  %4457 = vmatprep.subr.bf16.mxu1 %v5279_v0 }
 0xfd7   :  { %4458 = vmatpush3.bf16.msra.mxu1 %v5563_v10 }
 0xfd8   :  { %1632 = vmatprep.subr.bf16.mxu1 %v5462_v2  ;;  %v4106_v2 = vld [vmem:[%s6554_s29 + $0xc] sm:$0xf] }
0x103e   :  { %v1488_v51 = vpop.permute.xlu0 %1487 }
0x103f   :  { %v1490_v24 = vmul.f32 %v1488_v51, %v1485_v53 }
0x1041   :  { %v5807_v27 = vadd.f32 %v1491_v63, %v1490_v24 }
0x1043   :  { %v1493_v16 = vpack.c.bf16 %v5807_v27, %v5807_v27 }
0x1045   :  { %1542 = vrot.lane.b32.xlu1 %v1493_v16, %s5283_s1 }
0x1046   :  { %v1497_v36 = vpop.permute.xlu0 %1496 }
0x1047   :  { %4460 = vmatmul.mubr.msk.bf16.vlgmr.msra.gmra.mxu1 %vm174_vm0, %v1497_v36 }
0x1048   :  { %1633 = vmatpush1.bf16.msra.mxu1 %v5473_v4  ;;  %1650 = vmatprep.mubr.bf16.mxu1 %v5280_v1 }
0x1049   :  { %4479 = vmatprep.subr.bf16.mxu1 %v5279_v0 }
0x104f   :  { %4107 = vmatmul.mubr.msk.bf16.vlgmr.msra.gmra.mxu1 %vm206_vm2, %v4106_v2 }
0x1050   :  { %4480 = vmatpush3.bf16.msra.mxu1 %v5506_v32  ;;  %4483 = vmatprep.mubr.msk.bf16.mxu1 %vm5281_vm1, %v5279_v0  ;;  %v5833_v32 = vld [vmem:[%s6553_s4 + $0x8] sm:$0xff]  }
0x1051   :  { %4481 = vmatprep.subr.bf16.mxu1 %v5279_v0 }
0x1054   :  { %4482 = vmatpush3.bf16.msra.mxu1 %v5512_v34  ;;  %v5842_v34 = vld [vmem:[%s6553_s4] sm:$0xff]  }
0x1055   :  { %4495 = vmatprep.subr.bf16.mxu1 %v5279_v0 }
0x1092   :  { %v1395_v4 = vpop.f32.mrf.mxu1 }
0x1093   :  { %v1396_v7 = vadd.f32 %v1395_v4, %v5778_v41 }
0x1094   :  { %v4445_v10 = vpop.f32.mrf.mxu1 }
0x1095   :  { %v1401_v40 = vadd.f32 %v5627_v13, %v1396_v7 }
0x1096   :  { %v1398_v59 = vpop.f32.mrf.mxu1 }
0x1097   :  { %v4100_v9 = vmul.f32 -1.442695, %v1401_v40 }
0x1098   :  { %v4446_v37 = vpop.f32.mrf.mxu1 }
0x10b7   :  { %v5826_v31 = vpop.permute.xlu1 %1542 }
0x10b8   :  { %4468 = vmatmul.mubr.msk.bf16.vlgmr.msra.gmra.mxu0 %vm174_vm0, %v5826_v31 }
0x10b9   :  { %4472 = vmatpush3.bf16.msra.mxu0 %v5833_v32  ;;  %4475 = vmatprep.mubr.msk.bf16.mxu0 %vm5281_vm1, %v5279_v0 }
0x10ba   :  { %4473 = vmatprep.subr.bf16.mxu0 %v5279_v0 }
0x10bd   :  { %4474 = vmatpush3.bf16.msra.mxu0 %v5842_v34 }
0x10be   :  { %4487 = vmatprep.subr.bf16.mxu0 %v5279_v0 }
0x10c0   :  { %4476 = vmatmul.mubr.msk.bf16.vlgmr.msra.gmra.mxu0 %vm174_vm0, %v5758_v14 }
0x10c1   :  { %4488 = vmatpush3.bf16.msra.mxu0 %v5508_v33  ;;  %4491 = vmatprep.mubr.msk.bf16.mxu0 %vm5281_vm1, %v5279_v0 }
0x10c2   :  { %4489 = vmatprep.subr.bf16.mxu0 %v5279_v0 }
0x10c5   :  { %4490 = vmatpush3.bf16.msra.mxu0 %v5514_v35 }
0x10c6   :  { %4503 = vmatprep.subr.bf16.mxu0 %v5279_v0 }
0x1107   :  { %v1535_v38 = vpop.f32.mrf.mxu1 }
0x1108   :  { %v1536_v13 = vadd.f32 %v5638_v23, %v1535_v38 }
0x1109   :  { %v4461_v45 = vpop.f32.mrf.mxu1 }
0x110b   :  { %v1538_v46 = vpop.f32.mrf.mxu1 }
0x110d   :  { %v4462_v48 = vpop.f32.mrf.mxu1 }
0x110f   :  { %v1652_v49 = vpop.f32.mrf.mxu1 }
0x1111   :  { %v5854_v50 = vpop.f32.mrf.mxu1 }
0x1113   :  { %v1656_v25 = vpop.f32.mrf.mxu1 }
0x1115   :  { %v1657_v14 = vpop.f32.mrf.mxu1 }
0x1178   :  { %v1581_v52 = vpop.f32.mrf.mxu0 }
0x117a   :  { %v4469_v33 = vpop.f32.mrf.mxu0 }
0x117b   :  { %v1883_v33 = vadd.f32 %v5552_v61, %v5854_v50 }
0x117c   :  { %v1584_v39 = vpop.f32.mrf.mxu0 }
0x117e   :  { %v4470_v18 = vpop.f32.mrf.mxu0 }
0x1180   :  { %v1693_v54 = vpop.f32.mrf.mxu0 }
0x1181   :  { %v1694_v56 = vadd.f32 %v1693_v54, %v1652_v49 }
0x1182   :  { %v4477_v58 = vpop.f32.mrf.mxu0 }
0x1183   :  { %v1699_v35 = vadd.f32 %v5497_v12, %v1694_v56 }
0x1184   :  { %v1696_v60 = vpop.f32.mrf.mxu0 }
0x1185   :  { %4837 = vtanh.f32 %v1699_v35  ;;  %v4109_v62 = vmul.f32 -1.442695, %v1699_v35 }
0x1186   :  { %v4478_v30 = vpop.f32.mrf.mxu0 }
0x1187   :  { %4839 = vpow2.f32 %v4109_v62 }
0x1192   :  { %v4838_v28 = vpop.eup %4837 }
0x1193   :  { %1709 = vrot.lane.b32.xlu0 %v4838_v28, %s5271_s0 }
0x1194   :  { %v4840_v43 = vpop.eup %4839 }
0x1195   :  { %v1703_v15 = vadd.f32 1.0, %v4840_v43 }
0x1197   :  { %4841 = vrcp.f32 %v1703_v15 }
0x11a4   :  { %v4842_v3 = vpop.eup %4841 }
0x11a5   :  { %v1707_v12 = vmul.f32 %v4842_v3, %v5748_v57 }
0x1205   :  { %v1710_v20 = vpop.permute.xlu0 %1709 }
0x1206   :  { %v1712_v5 = vmul.f32 %v4842_v3, %v1710_v20 }
0x1208   :  { %1714 = vrot.lane.b32.xlu1 %v1712_v5, %s5282_s27 }
0x127a   :  { %v1715_v6 = vpop.permute.xlu1 %1714 }
0x127b   :  { %v5861_v11 = vadd.f32 %v1715_v6, %v1707_v12 }
0x127d   :  { %4843 = vtanh.f32 %v5861_v11 }
0x127e   :  { %4845 = vtanh.f32 %v1401_v40 }
0x127f   :  { %4847 = vpow2.f32 %v4100_v9  ;;  %v5925_v9 = vld [vmem:[%s6552_s23 + $0x4] ss:$8 sps:$4 sm:$0xff]  }
0x128a   :  { %v4844_v21 = vpop.eup %4843 }
0x128b   :  { %1720 = vrot.lane.b32.xlu0 %v4844_v21, %s5271_s0  ;;  %v4846_v8 = vpop.eup %4845 }
0x128c   :  { %v4848_v47 = vpop.eup %4847 }
0x128d   :  { %v1405_v41 = vadd.f32 1.0, %v4848_v47 }
0x128f   :  { %1411 = vrot.lane.b32.xlu0 %v4846_v8, %s5271_s0  ;;  %4849 = vrcp.f32 %v1405_v41  ;;  %v5912_v8 = vld [vmem:[#allocation14 + $0x8] sm:$0xff]  }
0x129c   :  { %v4850_v24 = vpop.eup %4849 }
0x12fd   :  { %v1721_v57 = vpop.permute.xlu0 %1720 }
0x12fe   :  { %v1723_v53 = vmul.f32 %v4842_v3, %v1721_v57 }
0x1300   :  { %v1724_v51 = vpack.c.bf16 %v1723_v53, %v1723_v53 }
0x1301   :  { %v1412_v63 = vpop.permute.xlu0 %1411 }
0x1302   :  { %1727 = vrot.lane.b32.xlu1 %v1724_v51, %s5282_s27  ;;  %v1414_v16 = vmul.f32 %v4850_v24, %v1412_v63 }
0x1306   :  { %1595 = vrot.lane.b32.xlu1 %v1536_v13, %s5271_s0 }
0x130a   :  { %1416 = vrot.lane.b32.xlu1 %v1414_v16, %s5282_s27  ;;  %v5947_v16 = vld [vmem:[#allocation2 + $0x8] sm:$0xff]  }
0x1374   :  { %v5871_v36 = vpop.permute.xlu1 %1727 }
0x1375   :  { %4484 = vmatmul.mubr.msk.bf16.vlgmr.msra.gmra.mxu1 %vm174_vm0, %v5871_v36 }
0x1376   :  { %4496 = vmatpush3.bf16.msra.mxu1 %v5527_v42  ;;  %4499 = vmatprep.mubr.msk.bf16.mxu1 %vm5281_vm1, %v5279_v0  ;;  %v1582_v42 = vadd.f32 %v5647_v26, %v1581_v52 }
0x1377   :  { %4497 = vmatprep.subr.bf16.mxu1 %v5279_v0 }
0x1378   :  { %v1587_v23 = vadd.f32 %v1582_v42, %v1536_v13  ;;  %v1596_v4 = vpop.permute.xlu1 %1595 }
0x137a   :  { %4498 = vmatpush3.bf16.msra.mxu1 %v5534_v44  ;;  %v4105_v44 = vmul.f32 -1.442695, %v1587_v23 }
0x137b   :  { %4511 = vmatprep.subr.bf16.mxu1 %v5279_v0 }
0x137c   :  { %4851 = vpow2.f32 %v4105_v44  ;;  %v1417_v59 = vpop.permute.xlu1 %1416 }
0x137d   :  { %4500 = vmatmul.mubr.msk.bf16.vlgmr.msra.gmra.mxu1 %vm174_vm0, %v5826_v31 }
0x137e   :  { %4512 = vmatpush3.bf16.msra.mxu1 %v5560_v17  ;;  %4515 = vmatprep.mubr.msk.bf16.mxu1 %vm5281_vm1, %v5279_v0  ;;  %v1409_v17 = vmul.f32 %v4850_v24, %v5780_v29 }
0x137f   :  { %4513 = vmatprep.subr.bf16.mxu1 %v5279_v0 }
0x1380   :  { %v5893_v31 = vadd.f32 %v1417_v59, %v1409_v17  ;;  %v5969_v59 = vld [vmem:[#allocation13 + $0x8] sm:$0xff]   ;;  %v5975_v17 = vld [vmem:[#allocation13] sm:$0xff]  }
0x1382   :  { %4514 = vmatpush3.bf16.msra.mxu1 %v5568_v19 }
0x1383   :  { %4519 = vmatprep.subr.bf16.mxu1 %v5279_v0 }
0x1389   :  { %v4852_v2 = vpop.eup %4851 }
0x138a   :  { %v1591_v10 = vadd.f32 1.0, %v4852_v2 }
0x138c   :  { %4853 = vrcp.f32 %v1591_v10 }
0x138d   :  { %4855 = vtanh.f32 %v5893_v31 }
0x1399   :  { %v4854_v49 = vpop.eup %4853 }
0x139a   :  { %v1598_v14 = vmul.f32 %v4854_v49, %v1596_v4  ;;  %v4856_v29 = vpop.eup %4855  ;;  %v1605_v20 = vsub.f32 1.0, %v4854_v49  ;;  %v1611_v7 = vmul.f32 %v4854_v49, %v5794_v22  ;;  %v5919_v22 = vld [vmem:[#allocation14] sm:$0xff]  }
0x1435   :  { %v5891_v37 = vpop.f32.mrf.mxu1 }
0x1437   :  { %v4485_v38 = vpop.f32.mrf.mxu1 }
0x1439   :  { %v1769_v19 = vpop.f32.mrf.mxu1 }
0x143b   :  { %v4486_v45 = vpop.f32.mrf.mxu1 }
0x143d   :  { %v1877_v26 = vpop.f32.mrf.mxu1 }
0x143e   :  { %v1878_v46 = vadd.f32 %v5548_v55, %v1877_v26 }
0x143f   :  { %v4501_v48 = vpop.f32.mrf.mxu1 }
0x1440   :  { %1892 = vrot.lane.b32.xlu0 %v1878_v46, %s5271_s0  ;;  %v1884_v39 = vadd.f32 %v1883_v33, %v1878_v46 }
0x1441   :  { %v1880_v25 = vpop.f32.mrf.mxu1 }
0x1442   :  { %v4114_v18 = vmul.f32 -1.442695, %v1884_v39 }
0x1443   :  { %v4502_v52 = vpop.f32.mrf.mxu1 }
0x1444   :  { %1600 = vrot.lane.b32.xlu0 %v1598_v14, %s5271_s0  ;;  %4857 = vpow2.f32 %v4114_v18 }
0x1448   :  { %1422 = vrot.lane.b32.xlu0 %v4856_v29, %s5271_s0 }
0x1451   :  { %v4858_v54 = vpop.eup %4857 }
0x1452   :  { %v1888_v55 = vadd.f32 1.0, %v4858_v54  ;;  %v5983_v54 = vld [vmem:[#allocation7] ss:$0 sm:$0xff] }
0x1454   :  { %4859 = vrcp.f32 %v1888_v55 }
0x1461   :  { %v4860_v56 = vpop.eup %4859 }
0x1462   :  { %v1902_v47 = vsub.f32 1.0, %v4860_v56  ;;  %v1908_v57 = vmul.f32 %v4860_v56, %v5807_v27  ;;  %v4118_v27 = vld [vmem:[%s6554_s29 + $0x10] sm:$0xf] }
0x14b2   :  { %v1893_v58 = vpop.permute.xlu0 %1892 }
0x14b3   :  { %v1895_v35 = vmul.f32 %v4860_v56, %v1893_v58 }
0x14b5   :  { %1897 = vrot.lane.b32.xlu1 %v1895_v35, %s5271_s0 }
0x14b6   :  { %v1601_v60 = vpop.permute.xlu0 %1600 }
0x14b7   :  { %v1603_v30 = vadd.f32 %v1601_v60, %v1582_v42  ;;  %v5953_v42 = vld [vmem:[#allocation2] sm:$0xff]  }
0x14b9   :  { %4861 = vtanh.f32 %v1603_v30 }
0x14ba   :  { %v1423_v28 = vpop.permute.xlu0 %1422 }
0x14bb   :  { %v1425_v62 = vmul.f32 %v4850_v24, %v1423_v28  ;;  %v5938_v24 = vld [vmem:[%s6552_s23] ss:$8 sps:$4 sm:$0xff]  }
0x14bd   :  { %v1725_v61 = vpack.c.bf16 %v1425_v62, %v1425_v62 }
0x14c6   :  { %v4862_v43 = vpop.eup %4861 }
0x14c7   :  { %1607 = vrot.lane.b32.xlu1 %v4862_v43, %s5283_s1 }
0x14cb   :  { %1773 = vrot.lane.b32.xlu1 %v1725_v61, %s5282_s27 }
0x1527   :  { %v1898_v50 = vpop.permute.xlu1 %1897 }
0x1528   :  { %v1900_v15 = vadd.f32 %v1898_v50, %v1883_v33 }
0x152a   :  { %4863 = vtanh.f32 %v1900_v15 }
0x1537   :  { %v4864_v3 = vpop.eup %4863 }
0x1538   :  { %1904 = vrot.lane.b32.xlu0 %v4864_v3, %s5283_s1 }
0x1539   :  { %v1608_v5 = vpop.permute.xlu1 %1607 }
0x153a   :  { %v1610_v12 = vmul.f32 %v1608_v5, %v1605_v20  ;;  %v5995_v5 = vld [vmem:[%s6525_s10] ss:$0 sm:$0xff] }
0x153c   :  { %v5907_v6 = vadd.f32 %v1611_v7, %v1610_v12 }
0x153d   :  { %v1774_v40 = vpop.permute.xlu1 %1773 }
0x153e   :  { %4492 = vmatmul.mubr.msk.bf16.vlgmr.msra.gmra.mxu0 %vm174_vm0, %v1774_v40  ;;  %v1911_v21 = vpack.c.bf16 %v5907_v6, %v5907_v6 }
0x153f   :  { %4504 = vmatpush3.bf16.msra.mxu0 %v5912_v8  ;;  %4507 = vmatprep.mubr.msk.bf16.mxu0 %vm5281_vm1, %v5279_v0 }
0x1540   :  { %1913 = vrot.lane.b32.xlu0 %v1911_v21, %s5283_s1  ;;  %4505 = vmatprep.subr.bf16.mxu0 %v5279_v0 }
0x1543   :  { %4506 = vmatpush3.bf16.msra.mxu0 %v5919_v22 }
0x1544   :  { %2049 = vmatprep.subr.bf16.mxu0 %v5925_v9 }
0x15aa   :  { %v1905_v41 = vpop.permute.xlu0 %1904 }
0x15ab   :  { %v1907_v53 = vmul.f32 %v1905_v41, %v1902_v47 }
0x15ad   :  { %v5929_v51 = vadd.f32 %v1908_v57, %v1907_v53  ;;  %v6005_v53 = vld [vmem:[%s6528_s13] ss:$0 sm:$0xff] }
0x15af   :  { %v1910_v13 = vpack.c.bf16 %v5929_v51, %v5929_v51 }
0x15b1   :  { %1959 = vrot.lane.b32.xlu1 %v1910_v13, %s5283_s1 }
0x15b2   :  { %v1914_v63 = vpop.permute.xlu0 %1913 }
0x15b3   :  { %4508 = vmatmul.mubr.msk.bf16.vlgmr.msra.gmra.mxu0 %vm174_vm0, %v1914_v63 }
0x15b4   :  { %2050 = vmatpush1.bf16.msra.mxu0 %v5938_v24  ;;  %2067 = vmatprep.mubr.bf16.mxu0 %v5280_v1 }
0x15b5   :  { %4527 = vmatprep.subr.bf16.mxu0 %v5279_v0 }
0x15bb   :  { %4119 = vmatmul.mubr.msk.bf16.vlgmr.msra.gmra.mxu0 %vm206_vm2, %v4118_v27 }
0x15bc   :  { %4528 = vmatpush3.bf16.msra.mxu0 %v5947_v16  ;;  %4531 = vmatprep.mubr.msk.bf16.mxu0 %vm5281_vm1, %v5279_v0 }
0x15bd   :  { %4529 = vmatprep.subr.bf16.mxu0 %v5279_v0 }
0x15c0   :  { %4530 = vmatpush3.bf16.msra.mxu0 %v5953_v42 }
0x15c1   :  { %4543 = vmatprep.subr.bf16.mxu0 %v5279_v0 }
0x15fe   :  { %v1812_v23 = vpop.f32.mrf.mxu0 }
0x15ff   :  { %v1813_v50 = vadd.f32 %v1812_v23, %v5891_v37 }
0x1600   :  { %v4493_v44 = vpop.f32.mrf.mxu0 }
0x1601   :  { %v1818_v7 = vadd.f32 %v5995_v5, %v1813_v50 }
0x1602   :  { %v1815_v2 = vpop.f32.mrf.mxu0 }
0x1603   :  { %v6017_v2 = vld [vmem:[#allocation8 + $0x8] sm:$0xff]  }
0x1604   :  { %v4494_v4 = vpop.f32.mrf.mxu0 }
0x1605   :  { %v6023_v4 = vld [vmem:[#allocation8] sm:$0xff]  }
0x1623   :  { %v5957_v10 = vpop.permute.xlu1 %1959 }
0x1624   :  { %4516 = vmatmul.mubr.msk.bf16.vlgmr.msra.gmra.mxu1 %vm174_vm0, %v5957_v10 }
0x1625   :  { %4520 = vmatpush3.bf16.msra.mxu1 %v5833_v32  ;;  %4523 = vmatprep.mubr.msk.bf16.mxu1 %vm5281_vm1, %v5279_v0 }
0x1626   :  { %4521 = vmatprep.subr.bf16.mxu1 %v5279_v0 }
0x1629   :  { %4522 = vmatpush3.bf16.msra.mxu1 %v5842_v34 }
0x162a   :  { %4535 = vmatprep.subr.bf16.mxu1 %v5279_v0 }
0x162c   :  { %4524 = vmatmul.mubr.msk.bf16.vlgmr.msra.gmra.mxu1 %vm174_vm0, %v5871_v36 }
0x162d   :  { %4536 = vmatpush3.bf16.msra.mxu1 %v5969_v59  ;;  %4539 = vmatprep.mubr.msk.bf16.mxu1 %vm5281_vm1, %v5279_v0 }
0x162e   :  { %4537 = vmatprep.subr.bf16.mxu1 %v5279_v0 }
0x1631   :  { %4538 = vmatpush3.bf16.msra.mxu1 %v5975_v17 }
0x1632   :  { %4551 = vmatprep.subr.bf16.mxu1 %v5279_v0 }
0x1673   :  { %v1952_v38 = vpop.f32.mrf.mxu0 }
0x1674   :  { %v1953_v13 = vadd.f32 %v6005_v53, %v1952_v38  ;;  %v6029_v38 = vld [vmem:[#allocation5 + $0x8] sm:$0xff]  }
0x1675   :  { %v4509_v19 = vpop.f32.mrf.mxu0 }
0x1676   :  { %v6035_v19 = vld [vmem:[#allocation5] sm:$0xff]  }
0x1677   :  { %v1955_v45 = vpop.f32.mrf.mxu0 }
0x1678   :  { %v6042_v45 = vld [vmem:[%s6527_s12] ss:$0 sm:$0xff] }
0x1679   :  { %v4510_v26 = vpop.f32.mrf.mxu0 }
0x167b   :  { %v2069_v36 = vpop.f32.mrf.mxu0 }
0x167d   :  { %v5979_v46 = vpop.f32.mrf.mxu0 }
0x167f   :  { %v2073_v48 = vpop.f32.mrf.mxu0 }
0x1681   :  { %v2074_v49 = vpop.f32.mrf.mxu0 }
0x16e4   :  { %v5981_v25 = vpop.f32.mrf.mxu1 }
0x16e6   :  { %v4517_v14 = vpop.f32.mrf.mxu1 }
0x16e8   :  { %v2001_v52 = vpop.f32.mrf.mxu1 }
0x16ea   :  { %v4518_v29 = vpop.f32.mrf.mxu1 }
0x16ec   :  { %v2110_v33 = vpop.f32.mrf.mxu1 }
0x16ed   :  { %v2111_v39 = vadd.f32 %v2110_v33, %v2069_v36 }
0x16ee   :  { %v4525_v18 = vpop.f32.mrf.mxu1 }
0x16ef   :  { %v2116_v55 = vadd.f32 %v5983_v54, %v2111_v39 }
0x16f0   :  { %v2113_v56 = vpop.f32.mrf.mxu1 }
0x16f1   :  { %4865 = vtanh.f32 %v2116_v55  ;;  %v4121_v60 = vmul.f32 -1.442695, %v2116_v55 }
0x16f2   :  { %v4526_v58 = vpop.f32.mrf.mxu1 }
0x16f3   :  { %4867 = vpow2.f32 %v4121_v60  ;;  %v6053_v58 = vld [vmem:[#allocation11] ss:$0 sm:$0xff] }
0x16fe   :  { %v4866_v35 = vpop.eup %4865 }
0x16ff   :  { %2126 = vrot.lane.b32.xlu0 %v4866_v35, %s5271_s0 }
0x1700   :  { %v4868_v30 = vpop.eup %4867 }
0x1701   :  { %v2120_v28 = vadd.f32 1.0, %v4868_v30 }
0x1703   :  { %4869 = vrcp.f32 %v2120_v28 }
0x1710   :  { %v4870_v62 = vpop.eup %4869 }
0x1711   :  { %v2124_v15 = vmul.f32 %v4870_v62, %v5861_v11  ;;  %v4112_v11 = vmul.f32 -1.442695, %v1818_v7 }
0x1771   :  { %v2127_v43 = vpop.permute.xlu0 %2126 }
0x1772   :  { %v2129_v61 = vmul.f32 %v4870_v62, %v2127_v43 }
0x1774   :  { %2131 = vrot.lane.b32.xlu1 %v2129_v61, %s5282_s27  ;;  %v6059_v61 = vld [vmem:[#allocation10] ss:$0 sm:$0xff] }
0x1775   :  { %v2300_v50 = vadd.f32 %v6059_v61, %v5979_v46 }
0x17e6   :  { %v2132_v3 = vpop.permute.xlu1 %2131 }
0x17e7   :  { %v5990_v20 = vadd.f32 %v2132_v3, %v2124_v15 }
0x17e9   :  { %4871 = vtanh.f32 %v5990_v20 }
0x17ea   :  { %4873 = vtanh.f32 %v1818_v7 }
0x17eb   :  { %4875 = vpow2.f32 %v4112_v11 }
0x17f6   :  { %v4872_v12 = vpop.eup %4871 }
0x17f7   :  { %2137 = vrot.lane.b32.xlu0 %v4872_v12, %s5271_s0  ;;  %v4874_v40 = vpop.eup %4873 }
0x17f8   :  { %v4876_v37 = vpop.eup %4875 }
0x17f9   :  { %v1822_v21 = vadd.f32 1.0, %v4876_v37 }
0x17fb   :  { %1828 = vrot.lane.b32.xlu0 %v4874_v40, %s5271_s0  ;;  %4877 = vrcp.f32 %v1822_v21 }
0x1808   :  { %v6009_v27 = vpop.eup %4877 }
0x1809   :  { %v1826_v29 = vmul.f32 %v6009_v27, %v5893_v31 }
0x1869   :  { %v2138_v47 = vpop.permute.xlu0 %2137 }
0x186a   :  { %v2140_v41 = vmul.f32 %v4870_v62, %v2138_v47 }
0x186c   :  { %v2141_v57 = vpack.c.bf16 %v2140_v41, %v2140_v41 }
0x186d   :  { %v1829_v63 = vpop.permute.xlu0 %1828 }
0x186e   :  { %2144 = vrot.lane.b32.xlu1 %v2141_v57, %s5282_s27  ;;  %v1831_v23 = vmul.f32 %v6009_v27, %v1829_v63 }
0x1872   :  { %2012 = vrot.lane.b32.xlu1 %v1953_v13, %s5271_s0 }
0x1876   :  { %1833 = vrot.lane.b32.xlu1 %v1831_v23, %s5282_s27 }
0x18e0   :  { %v6013_v44 = vpop.permute.xlu1 %2144 }
0x18e1   :  { %4532 = vmatmul.mubr.msk.bf16.vlgmr.msra.gmra.mxu0 %vm174_vm0, %v6013_v44 }
0x18e2   :  { %4544 = vmatpush3.bf16.msra.mxu0 %v6017_v2  ;;  %4547 = vmatprep.mubr.msk.bf16.mxu0 %vm5281_vm1, %v5279_v0 }
0x18e3   :  { %4545 = vmatprep.subr.bf16.mxu0 %v5279_v0 }
0x18e4   :  { %v2013_v49 = vpop.permute.xlu1 %2012 }
0x18e6   :  { %4546 = vmatpush3.bf16.msra.mxu0 %v6023_v4 }
0x18e7   :  { %4559 = vmatprep.subr.bf16.mxu0 %v5279_v0 }
0x18e8   :  { %v1834_v52 = vpop.permute.xlu1 %1833 }
0x18e9   :  { %4548 = vmatmul.mubr.msk.bf16.vlgmr.msra.gmra.mxu0 %vm174_vm0, %v5957_v10  ;;  %v1999_v10 = vadd.f32 %v6042_v45, %v5981_v25  ;;  %v6050_v39 = vadd.f32 %v1834_v52, %v1826_v29 }
0x18ea   :  { %4560 = vmatpush3.bf16.msra.mxu0 %v6029_v38  ;;  %4563 = vmatprep.mubr.msk.bf16.mxu0 %vm5281_vm1, %v5279_v0 }
0x18eb   :  { %4561 = vmatprep.subr.bf16.mxu0 %v5279_v0  ;;  %v2004_v26 = vadd.f32 %v1999_v10, %v1953_v13 }
0x18ed   :  { %v4117_v36 = vmul.f32 -1.442695, %v2004_v26 }
0x18ee   :  { %4562 = vmatpush3.bf16.msra.mxu0 %v6035_v19 }
0x18ef   :  { %4567 = vmatprep.subr.bf16.mxu0 %v5279_v0  ;;  %4879 = vpow2.f32 %v4117_v36 }
0x18fc   :  { %v4880_v48 = vpop.eup %4879 }
0x18fd   :  { %v2008_v14 = vadd.f32 1.0, %v4880_v48 }
0x18ff   :  { %4881 = vrcp.f32 %v2008_v14 }
0x1900   :  { %4883 = vtanh.f32 %v6050_v39 }
0x190c   :  { %v4882_v30 = vpop.eup %4881 }
0x190d   :  { %v2015_v31 = vmul.f32 %v4882_v30, %v2013_v49  ;;  %v4884_v43 = vpop.eup %4883  ;;  %v2022_v36 = vsub.f32 1.0, %v4882_v30 }
0x19a1   :  { %v6048_v33 = vpop.f32.mrf.mxu0 }
0x19a3   :  { %v4533_v18 = vpop.f32.mrf.mxu0 }
0x19a5   :  { %v2186_v55 = vpop.f32.mrf.mxu0 }
0x19a7   :  { %v4534_v25 = vpop.f32.mrf.mxu0 }
0x19a9   :  { %v2294_v56 = vpop.f32.mrf.mxu0 }
0x19aa   :  { %v2295_v35 = vadd.f32 %v6053_v58, %v2294_v56 }
0x19ab   :  { %v4549_v60 = vpop.f32.mrf.mxu0 }
0x19ac   :  { %2309 = vrot.lane.b32.xlu0 %v2295_v35, %s5271_s0  ;;  %v2301_v15 = vadd.f32 %v2300_v50, %v2295_v35 }
0x19ad   :  { %v2297_v28 = vpop.f32.mrf.mxu0 }
0x19ae   :  { %v4126_v3 = vmul.f32 -1.442695, %v2301_v15 }
0x19af   :  { %v4550_v62 = vpop.f32.mrf.mxu0 }
0x19b0   :  { %2017 = vrot.lane.b32.xlu0 %v2015_v31, %s5271_s0  ;;  %4885 = vpow2.f32 %v4126_v3 }
0x19b4   :  { %1839 = vrot.lane.b32.xlu0 %v4884_v43, %s5271_s0 }
0x19bd   :  { %v4886_v7 = vpop.eup %4885 }
0x19be   :  { %v2305_v12 = vadd.f32 1.0, %v4886_v7 }
0x19c0   :  { %4887 = vrcp.f32 %v2305_v12 }
0x19cd   :  { %v4888_v40 = vpop.eup %4887 }
0x19ce   :  { %v2325_v18 = vmul.f32 %v4888_v40, %v5929_v51  ;;  %v4130_v51 = vld [vmem:[%s6554_s29 + $0x14] sm:$0xf] }
0x1a1e   :  { %v2310_v11 = vpop.permute.xlu0 %2309 }
0x1a1f   :  { %v2312_v37 = vmul.f32 %v4888_v40, %v2310_v11 }
0x1a21   :  { %2314 = vrot.lane.b32.xlu1 %v2312_v37, %s5271_s0 }
0x1a22   :  { %v2018_v21 = vpop.permute.xlu0 %2017 }
0x1a23   :  { %v2020_v47 = vadd.f32 %v2018_v21, %v1999_v10  ;;  %v2028_v10 = vmul.f32 %v4882_v30, %v5907_v6  ;;  %v2319_v6 = vsub.f32 1.0, %v4888_v40 }
0x1a25   :  { %4889 = vtanh.f32 %v2020_v47 }
0x1a26   :  { %v1840_v41 = vpop.permute.xlu0 %1839 }
0x1a27   :  { %v1842_v57 = vmul.f32 %v6009_v27, %v1840_v41 }
0x1a29   :  { %v2142_v46 = vpack.c.bf16 %v1842_v57, %v1842_v57 }
0x1a32   :  { %v4890_v13 = vpop.eup %4889 }
0x1a33   :  { %2024 = vrot.lane.b32.xlu1 %v4890_v13, %s5283_s1 }
0x1a37   :  { %2190 = vrot.lane.b32.xlu1 %v2142_v46, %s5282_s27 }
0x1a93   :  { %v2315_v63 = vpop.permute.xlu1 %2314 }
0x1a94   :  { %v2317_v23 = vadd.f32 %v2315_v63, %v2300_v50 }
0x1a96   :  { %4891 = vtanh.f32 %v2317_v23 }
0x1aa3   :  { %v4892_v26 = vpop.eup %4891 }
0x1aa4   :  { %2321 = vrot.lane.b32.xlu0 %v4892_v26, %s5283_s1 }
0x1aa5   :  { %v2025_v48 = vpop.permute.xlu1 %2024 }
0x1aa6   :  { %v2027_v49 = vmul.f32 %v2025_v48, %v2022_v36 }
0x1aa8   :  { %v6069_v14 = vadd.f32 %v2028_v10, %v2027_v49 }
0x1aa9   :  { %v2191_v27 = vpop.permute.xlu1 %2190 }
0x1aaa   :  { %4540 = vmatmul.mubr.msk.bf16.vlgmr.msra.gmra.mxu1 %vm174_vm0, %v2191_v27  ;;  %v2328_v52 = vpack.c.bf16 %v6069_v14, %v6069_v14 }
0x1aab   :  { %4552 = vmatpush3.bf16.msra.mxu1 %v5912_v8  ;;  %4555 = vmatprep.mubr.msk.bf16.mxu1 %vm5281_vm1, %v5279_v0 }
0x1aac   :  { %2330 = vrot.lane.b32.xlu0 %v2328_v52, %s5283_s1  ;;  %4553 = vmatprep.subr.bf16.mxu1 %v5279_v0 }
0x1aaf   :  { %4554 = vmatpush3.bf16.msra.mxu1 %v5919_v22 }
0x1ab0   :  { %2466 = vmatprep.subr.bf16.mxu1 %v5925_v9 }
0x1b16   :  { %v2322_v29 = vpop.permute.xlu0 %2321 }
0x1b17   :  { %v2324_v55 = vmul.f32 %v2322_v29, %v2319_v6 }
0x1b19   :  { %v6082_v25 = vadd.f32 %v2325_v18, %v2324_v55 }
0x1b1b   :  { %v2327_v56 = vpack.c.bf16 %v6082_v25, %v6082_v25 }
0x1b1d   :  { %2376 = vrot.lane.b32.xlu1 %v2327_v56, %s5283_s1 }
0x1b1e   :  { %v2331_v35 = vpop.permute.xlu0 %2330 }
0x1b1f   :  { %4556 = vmatmul.mubr.msk.bf16.vlgmr.msra.gmra.mxu1 %vm174_vm0, %v2331_v35 }
0x1b20   :  { %2467 = vmatpush1.bf16.msra.mxu1 %v5938_v24  ;;  %2484 = vmatprep.mubr.bf16.mxu1 %v5280_v1 }
0x1b21   :  { %4575 = vmatprep.subr.bf16.mxu1 %v5279_v0 }
0x1b27   :  { %4131 = vmatmul.mubr.msk.bf16.vlgmr.msra.gmra.mxu1 %vm206_vm2, %v4130_v51 }
0x1b28   :  { %4576 = vmatpush3.bf16.msra.mxu1 %v5947_v16  ;;  %4579 = vmatprep.mubr.msk.bf16.mxu1 %vm5281_vm1, %v5279_v0 }
0x1b29   :  { %4577 = vmatprep.subr.bf16.mxu1 %v5279_v0 }
0x1b2c   :  { %4578 = vmatpush3.bf16.msra.mxu1 %v5953_v42 }
0x1b2d   :  { %4591 = vmatprep.subr.bf16.mxu1 %v5279_v0 }
0x1b6a   :  { %v2229_v60 = vpop.f32.mrf.mxu1 }
0x1b6b   :  { %v2230_v27 = vadd.f32 %v2229_v60, %v6048_v33 }
0x1b6c   :  { %v4541_v30 = vpop.f32.mrf.mxu1 }
0x1b6d   :  { %v2235_v18 = vadd.f32 %v5995_v5, %v2230_v27 }
0x1b6e   :  { %v2232_v28 = vpop.f32.mrf.mxu1 }
0x1b6f   :  { %v4124_v35 = vmul.f32 -1.442695, %v2235_v18 }
0x1b70   :  { %v4542_v31 = vpop.f32.mrf.mxu1 }
0x1b8f   :  { %v6101_v62 = vpop.permute.xlu1 %2376 }
0x1b90   :  { %4564 = vmatmul.mubr.msk.bf16.vlgmr.msra.gmra.mxu0 %vm174_vm0, %v6101_v62 }
0x1b91   :  { %4568 = vmatpush3.bf16.msra.mxu0 %v5833_v32  ;;  %4571 = vmatprep.mubr.msk.bf16.mxu0 %vm5281_vm1, %v5279_v0 }
0x1b92   :  { %4569 = vmatprep.subr.bf16.mxu0 %v5279_v0 }
0x1b95   :  { %4570 = vmatpush3.bf16.msra.mxu0 %v5842_v34 }
0x1b96   :  { %4583 = vmatprep.subr.bf16.mxu0 %v5279_v0 }
0x1b98   :  { %4572 = vmatmul.mubr.msk.bf16.vlgmr.msra.gmra.mxu0 %vm174_vm0, %v6013_v44 }
0x1b99   :  { %4584 = vmatpush3.bf16.msra.mxu0 %v5969_v59  ;;  %4587 = vmatprep.mubr.msk.bf16.mxu0 %vm5281_vm1, %v5279_v0 }
0x1b9a   :  { %4585 = vmatprep.subr.bf16.mxu0 %v5279_v0 }
0x1b9d   :  { %4586 = vmatpush3.bf16.msra.mxu0 %v5975_v17 }
0x1b9e   :  { %4599 = vmatprep.subr.bf16.mxu0 %v5279_v0 }
0x1bdf   :  { %v2369_v32 = vpop.f32.mrf.mxu1 }
0x1be0   :  { %v2370_v28 = vadd.f32 %v6005_v53, %v2369_v32 }
0x1be1   :  { %v4557_v43 = vpop.f32.mrf.mxu1 }
0x1be3   :  { %v2372_v50 = vpop.f32.mrf.mxu1 }
0x1be5   :  { %v4558_v34 = vpop.f32.mrf.mxu1 }
0x1be7   :  { %v2486_v15 = vpop.f32.mrf.mxu1 }
0x1be9   :  { %v6119_v3 = vpop.f32.mrf.mxu1 }
0x1beb   :  { %v2490_v7 = vpop.f32.mrf.mxu1 }
0x1bed   :  { %v2491_v44 = vpop.f32.mrf.mxu1 }
0x1c50   :  { %v2415_v12 = vpop.f32.mrf.mxu0 }
0x1c51   :  { %v2416_v32 = vadd.f32 %v6042_v45, %v2415_v12 }
0x1c52   :  { %v4565_v40 = vpop.f32.mrf.mxu0 }
0x1c54   :  { %v2418_v11 = vpop.f32.mrf.mxu0 }
0x1c56   :  { %v4566_v37 = vpop.f32.mrf.mxu0 }
0x1c58   :  { %v2527_v21 = vpop.f32.mrf.mxu0 }
0x1c59   :  { %v2528_v47 = vadd.f32 %v2527_v21, %v2486_v15  ;;  %v2421_v15 = vadd.f32 %v2416_v32, %v2370_v28 }
0x1c5a   :  { %v4573_v41 = vpop.f32.mrf.mxu0 }
0x1c5b   :  { %v2533_v57 = vadd.f32 %v5983_v54, %v2528_v47  ;;  %v4129_v7 = vmul.f32 -1.442695, %v2421_v15 }
0x1c5c   :  { %v2530_v13 = vpop.f32.mrf.mxu0 }
0x1c5d   :  { %4893 = vtanh.f32 %v2533_v57  ;;  %v4133_v23 = vmul.f32 -1.442695, %v2533_v57 }
0x1c5e   :  { %v4574_v46 = vpop.f32.mrf.mxu0 }
0x1c5f   :  { %4895 = vpow2.f32 %v4133_v23 }
0x1c6a   :  { %v4894_v63 = vpop.eup %4893 }
0x1c6b   :  { %2543 = vrot.lane.b32.xlu0 %v4894_v63, %s5271_s0 }
0x1c6c   :  { %v4896_v26 = vpop.eup %4895 }
0x1c6d   :  { %v2537_v36 = vadd.f32 1.0, %v4896_v26 }
0x1c6f   :  { %4897 = vrcp.f32 %v2537_v36 }
0x1c7c   :  { %v4898_v48 = vpop.eup %4897 }
0x1c7d   :  { %v2541_v52 = vmul.f32 %v4898_v48, %v5990_v20 }
0x1cdd   :  { %v2544_v10 = vpop.permute.xlu0 %2543 }
0x1cde   :  { %v2546_v49 = vmul.f32 %v4898_v48, %v2544_v10  ;;  %v2717_v10 = vadd.f32 %v6059_v61, %v6119_v3 }
0x1ce0   :  { %2548 = vrot.lane.b32.xlu1 %v2546_v49, %s5282_s27 }
0x1d52   :  { %v2549_v6 = vpop.permute.xlu1 %2548 }
0x1d53   :  { %v6126_v29 = vadd.f32 %v2549_v6, %v2541_v52 }
0x1d55   :  { %4899 = vtanh.f32 %v6126_v29 }
0x1d56   :  { %4901 = vtanh.f32 %v2235_v18 }
0x1d57   :  { %4903 = vpow2.f32 %v4124_v35 }
0x1d62   :  { %v4900_v55 = vpop.eup %4899 }
0x1d63   :  { %2554 = vrot.lane.b32.xlu0 %v4900_v55, %s5271_s0  ;;  %v4902_v56 = vpop.eup %4901 }
0x1d64   :  { %v4904_v51 = vpop.eup %4903 }
0x1d65   :  { %v2239_v33 = vadd.f32 1.0, %v4904_v51 }
0x1d67   :  { %2245 = vrot.lane.b32.xlu0 %v4902_v56, %s5271_s0  ;;  %4905 = vrcp.f32 %v2239_v33 }
0x1d68   :  { %4907 = vpow2.f32 %v4129_v7 }
0x1d74   :  { %v4906_v43 = vpop.eup %4905 }
0x1d75   :  { %v4908_v44 = vpop.eup %4907  ;;  %v2243_v37 = vmul.f32 %v4906_v43, %v6050_v39 }
0x1d76   :  { %v2425_v11 = vadd.f32 1.0, %v4908_v44 }
0x1d78   :  { %4909 = vrcp.f32 %v2425_v11 }
0x1d85   :  { %v4910_v23 = vpop.eup %4909 }
0x1d86   :  { %v2445_v7 = vmul.f32 %v4910_v23, %v6069_v14 }
0x1dd5   :  { %v2555_v20 = vpop.permute.xlu0 %2554 }
0x1dd6   :  { %v2557_v60 = vmul.f32 %v4898_v48, %v2555_v20 }
0x1dd8   :  { %v2558_v30 = vpack.c.bf16 %v2557_v60, %v2557_v60 }
0x1dd9   :  { %v2246_v31 = vpop.permute.xlu0 %2245 }
0x1dda   :  { %2561 = vrot.lane.b32.xlu1 %v2558_v30, %s5282_s27  ;;  %v2248_v50 = vmul.f32 %v4906_v43, %v2246_v31 }
0x1dde   :  { %2429 = vrot.lane.b32.xlu1 %v2370_v28, %s5271_s0 }
0x1de2   :  { %2250 = vrot.lane.b32.xlu1 %v2248_v50, %s5282_s27  ;;  %v2439_v50 = vsub.f32 1.0, %v4910_v23 }
0x1e4c   :  { %v6136_v34 = vpop.permute.xlu1 %2561 }
0x1e4d   :  { %4580 = vmatmul.mubr.msk.bf16.vlgmr.msra.gmra.mxu1 %vm174_vm0, %v6136_v34 }
0x1e4e   :  { %4592 = vmatpush3.bf16.msra.mxu1 %v6017_v2  ;;  %4595 = vmatprep.mubr.msk.bf16.mxu1 %vm5281_vm1, %v5279_v0 }
0x1e4f   :  { %4593 = vmatprep.subr.bf16.mxu1 %v5279_v0 }
0x1e50   :  { %v2430_v40 = vpop.permute.xlu1 %2429 }
0x1e51   :  { %v2432_v36 = vmul.f32 %v4910_v23, %v2430_v40 }
0x1e52   :  { %4594 = vmatpush3.bf16.msra.mxu1 %v6023_v4 }
0x1e53   :  { %4607 = vmatprep.subr.bf16.mxu1 %v5279_v0 }
0x1e55   :  { %4596 = vmatmul.mubr.msk.bf16.vlgmr.msra.gmra.mxu1 %vm174_vm0, %v6101_v62  ;;  %v2251_v62 = vpop.permute.xlu1 %2250 }
0x1e56   :  { %4608 = vmatpush3.bf16.msra.mxu1 %v6029_v38  ;;  %4611 = vmatprep.mubr.msk.bf16.mxu1 %vm5281_vm1, %v5279_v0  ;;  %v6158_v47 = vadd.f32 %v2251_v62, %v2243_v37 }
0x1e57   :  { %4609 = vmatprep.subr.bf16.mxu1 %v5279_v0 }
0x1e58   :  { %4911 = vtanh.f32 %v6158_v47 }
0x1e5a   :  { %4610 = vmatpush3.bf16.msra.mxu1 %v6035_v19 }
0x1e5b   :  { %4615 = vmatprep.subr.bf16.mxu1 %v5279_v0 }
0x1e65   :  { %v4912_v39 = vpop.eup %4911 }
0x1f0d   :  { %v6156_v21 = vpop.f32.mrf.mxu1 }
0x1f0f   :  { %v4581_v41 = vpop.f32.mrf.mxu1 }
0x1f11   :  { %v2603_v57 = vpop.f32.mrf.mxu1 }
0x1f13   :  { %v4582_v13 = vpop.f32.mrf.mxu1 }
0x1f15   :  { %v2711_v12 = vpop.f32.mrf.mxu1 }
0x1f16   :  { %v2712_v46 = vadd.f32 %v6053_v58, %v2711_v12 }
0x1f17   :  { %v4597_v63 = vpop.f32.mrf.mxu1 }
0x1f18   :  { %2726 = vrot.lane.b32.xlu0 %v2712_v46, %s5271_s0  ;;  %v2718_v49 = vadd.f32 %v2717_v10, %v2712_v46 }
0x1f19   :  { %v2714_v26 = vpop.f32.mrf.mxu1 }
0x1f1a   :  { %v4138_v27 = vmul.f32 -1.442695, %v2718_v49 }
0x1f1b   :  { %v4598_v48 = vpop.f32.mrf.mxu1 }
0x1f1c   :  { %2434 = vrot.lane.b32.xlu0 %v2432_v36, %s5271_s0  ;;  %4913 = vpow2.f32 %v4138_v27 }
0x1f20   :  { %2256 = vrot.lane.b32.xlu0 %v4912_v39, %s5271_s0 }
0x1f29   :  { %v4914_v52 = vpop.eup %4913 }
0x1f2a   :  { %v2722_v6 = vadd.f32 1.0, %v4914_v52 }
0x1f2c   :  { %4915 = vrcp.f32 %v2722_v6 }
0x1f39   :  { %v4916_v18 = vpop.eup %4915 }
0x1f3a   :  { %v2736_v14 = vsub.f32 1.0, %v4916_v18  ;;  %v2742_v62 = vmul.f32 %v4916_v18, %v6082_v25 }
0x1f8a   :  { %v2727_v55 = vpop.permute.xlu0 %2726 }
0x1f8b   :  { %v2729_v56 = vmul.f32 %v4916_v18, %v2727_v55 }
0x1f8d   :  { %2731 = vrot.lane.b32.xlu1 %v2729_v56, %s5271_s0 }
0x1f8e   :  { %v2435_v35 = vpop.permute.xlu0 %2434 }
0x1f8f   :  { %v2437_v51 = vadd.f32 %v2435_v35, %v2416_v32 }
0x1f91   :  { %4917 = vtanh.f32 %v2437_v51 }
0x1f92   :  { %v2257_v33 = vpop.permute.xlu0 %2256 }
0x1f93   :  { %v2259_v20 = vmul.f32 %v4906_v43, %v2257_v33 }
0x1f95   :  { %v2559_v3 = vpack.c.bf16 %v2259_v20, %v2259_v20 }
0x1f9e   :  { %v4918_v60 = vpop.eup %4917 }
0x1f9f   :  { %2441 = vrot.lane.b32.xlu1 %v4918_v60, %s5283_s1 }
0x1fa3   :  { %2607 = vrot.lane.b32.xlu1 %v2559_v3, %s5282_s27 }
0x1fff   :  { %v2732_v30 = vpop.permute.xlu1 %2731 }
0x2000   :  { %v2734_v28 = vadd.f32 %v2732_v30, %v2717_v10 }
0x2002   :  { %4919 = vtanh.f32 %v2734_v28 }
0x200f   :  { %v4920_v31 = vpop.eup %4919 }
0x2010   :  { %2738 = vrot.lane.b32.xlu0 %v4920_v31, %s5283_s1 }
0x2011   :  { %v2442_v15 = vpop.permute.xlu1 %2441 }
0x2012   :  { %v2444_v32 = vmul.f32 %v2442_v15, %v2439_v50 }
0x2014   :  { %v6172_v44 = vadd.f32 %v2445_v7, %v2444_v32 }
0x2015   :  { %v2608_v43 = vpop.permute.xlu1 %2607 }
0x2016   :  { %4588 = vmatmul.mubr.msk.bf16.vlgmr.msra.gmra.mxu0 %vm174_vm0, %v2608_v43  ;;  %v2745_v40 = vpack.c.bf16 %v6172_v44, %v6172_v44 }
0x2017   :  { %4600 = vmatpush3.bf16.msra.mxu0 %v5912_v8  ;;  %4603 = vmatprep.mubr.msk.bf16.mxu0 %vm5281_vm1, %v5279_v0 }
0x2018   :  { %2747 = vrot.lane.b32.xlu0 %v2745_v40, %s5283_s1  ;;  %4601 = vmatprep.subr.bf16.mxu0 %v5279_v0 }
0x201b   :  { %4602 = vmatpush3.bf16.msra.mxu0 %v5919_v22  ;;  %v4142_v22 = vld [vmem:[%s6554_s29 + $0x18] sm:$0xf] }
0x201c   :  { %2883 = vmatprep.subr.bf16.mxu0 %v5925_v9 }
0x2082   :  { %v2739_v11 = vpop.permute.xlu0 %2738 }
0x2083   :  { %v2741_v37 = vmul.f32 %v2739_v11, %v2736_v14 }
0x2085   :  { %v6185_v41 = vadd.f32 %v2742_v62, %v2741_v37 }
0x2087   :  { %v2744_v8 = vpack.c.bf16 %v6185_v41, %v6185_v41 }
0x2089   :  { %2793 = vrot.lane.b32.xlu1 %v2744_v8, %s5283_s1 }
0x208a   :  { %v2748_v57 = vpop.permute.xlu0 %2747 }
0x208b   :  { %4604 = vmatmul.mubr.msk.bf16.vlgmr.msra.gmra.mxu0 %vm174_vm0, %v2748_v57 }
0x208c   :  { %2884 = vmatpush1.bf16.msra.mxu0 %v5938_v24  ;;  %2901 = vmatprep.mubr.bf16.mxu0 %v5280_v1 }
0x208d   :  { %4623 = vmatprep.subr.bf16.mxu0 %v5279_v0 }
0x2093   :  { %4143 = vmatmul.mubr.msk.bf16.vlgmr.msra.gmra.mxu0 %vm206_vm2, %v4142_v22 }
0x2094   :  { %4624 = vmatpush3.bf16.msra.mxu0 %v5947_v16  ;;  %4627 = vmatprep.mubr.msk.bf16.mxu0 %vm5281_vm1, %v5279_v0  ;;  %v6211_v16 = vld [vmem:[%s6553_s4 + $0x8] sm:$0xff]  }
0x2095   :  { %4625 = vmatprep.subr.bf16.mxu0 %v5279_v0 }
0x2098   :  { %4626 = vmatpush3.bf16.msra.mxu0 %v5953_v42  ;;  %v6220_v42 = vld [vmem:[%s6553_s4] sm:$0xff]  }
0x2099   :  { %4639 = vmatprep.subr.bf16.mxu0 %v5279_v0 }
0x20d6   :  { %v2646_v9 = vpop.f32.mrf.mxu0 }
0x20d7   :  { %v2647_v28 = vadd.f32 %v2646_v9, %v6156_v21 }
0x20d8   :  { %v4589_v24 = vpop.f32.mrf.mxu0 }
0x20d9   :  { %v2652_v15 = vadd.f32 %v5995_v5, %v2647_v28 }
0x20da   :  { %v2649_v25 = vpop.f32.mrf.mxu0 }
0x20db   :  { %v4136_v43 = vmul.f32 -1.442695, %v2652_v15 }
0x20dc   :  { %v4590_v13 = vpop.f32.mrf.mxu0 }
0x20fb   :  { %v6204_v12 = vpop.permute.xlu1 %2793 }
0x20fc   :  { %4612 = vmatmul.mubr.msk.bf16.vlgmr.msra.gmra.mxu1 %vm174_vm0, %v6204_v12 }
0x20fd   :  { %4616 = vmatpush3.bf16.msra.mxu1 %v6211_v16  ;;  %4619 = vmatprep.mubr.msk.bf16.mxu1 %vm5281_vm1, %v5279_v0 }
0x20fe   :  { %4617 = vmatprep.subr.bf16.mxu1 %v5279_v0 }
0x2101   :  { %4618 = vmatpush3.bf16.msra.mxu1 %v6220_v42 }
0x2102   :  { %4631 = vmatprep.subr.bf16.mxu1 %v5279_v0 }
0x2104   :  { %4620 = vmatmul.mubr.msk.bf16.vlgmr.msra.gmra.mxu1 %vm174_vm0, %v6136_v34 }
0x2105   :  { %4632 = vmatpush3.bf16.msra.mxu1 %v5969_v59  ;;  %4635 = vmatprep.mubr.msk.bf16.mxu1 %vm5281_vm1, %v5279_v0 }
0x2106   :  { %4633 = vmatprep.subr.bf16.mxu1 %v5279_v0 }
0x2109   :  { %4634 = vmatpush3.bf16.msra.mxu1 %v5975_v17 }
0x210a   :  { %4647 = vmatprep.subr.bf16.mxu1 %v5279_v0 }
0x214b   :  { %v2786_v46 = vpop.f32.mrf.mxu0 }
0x214c   :  { %v2787_v5 = vadd.f32 %v6005_v53, %v2786_v46 }
0x214d   :  { %v4605_v63 = vpop.f32.mrf.mxu0 }
0x214f   :  { %v2789_v23 = vpop.f32.mrf.mxu0 }
0x2151   :  { %v4606_v26 = vpop.f32.mrf.mxu0 }
0x2153   :  { %v2903_v36 = vpop.f32.mrf.mxu0 }
0x2155   :  { %v6232_v48 = vpop.f32.mrf.mxu0 }
0x2157   :  { %v2907_v39 = vpop.f32.mrf.mxu0 }
0x2159   :  { %v2908_v34 = vpop.f32.mrf.mxu0 }
0x21bc   :  { %v2832_v10 = vpop.f32.mrf.mxu1 }
0x21bd   :  { %v2833_v53 = vadd.f32 %v6042_v45, %v2832_v10 }
0x21be   :  { %v4613_v59 = vpop.f32.mrf.mxu1 }
0x21bf   :  { %v3134_v59 = vadd.f32 %v6059_v61, %v6232_v48 }
0x21c0   :  { %v2835_v49 = vpop.f32.mrf.mxu1 }
0x21c2   :  { %v4614_v27 = vpop.f32.mrf.mxu1 }
0x21c4   :  { %v2944_v52 = vpop.f32.mrf.mxu1 }
0x21c5   :  { %v2945_v6 = vadd.f32 %v2944_v52, %v2903_v36 }
0x21c6   :  { %v4621_v18 = vpop.f32.mrf.mxu1 }
0x21c7   :  { %v2950_v17 = vadd.f32 %v5983_v54, %v2945_v6 }
0x21c8   :  { %v2947_v55 = vpop.f32.mrf.mxu1 }
0x21c9   :  { %4921 = vtanh.f32 %v2950_v17  ;;  %v4145_v51 = vmul.f32 -1.442695, %v2950_v17 }
0x21ca   :  { %v4622_v56 = vpop.f32.mrf.mxu1 }
0x21cb   :  { %4923 = vpow2.f32 %v4145_v51 }
0x21d6   :  { %v4922_v35 = vpop.eup %4921 }
0x21d7   :  { %2960 = vrot.lane.b32.xlu0 %v4922_v35, %s5271_s0 }
0x21d8   :  { %v4924_v33 = vpop.eup %4923 }
0x21d9   :  { %v2954_v20 = vadd.f32 1.0, %v4924_v33 }
0x21db   :  { %4925 = vrcp.f32 %v2954_v20 }
0x21e8   :  { %v4926_v60 = vpop.eup %4925 }
0x21e9   :  { %v2958_v54 = vmul.f32 %v4926_v60, %v6126_v29 }
0x2249   :  { %v2961_v3 = vpop.permute.xlu0 %2960 }
0x224a   :  { %v2963_v30 = vmul.f32 %v4926_v60, %v2961_v3 }
0x224c   :  { %2965 = vrot.lane.b32.xlu1 %v2963_v30, %s5282_s27 }
0x22be   :  { %v2966_v31 = vpop.permute.xlu1 %2965 }
0x22bf   :  { %v6239_v50 = vadd.f32 %v2966_v31, %v2958_v54 }
0x22c1   :  { %4927 = vtanh.f32 %v6239_v50 }
0x22c2   :  { %4929 = vtanh.f32 %v2652_v15 }
0x22c3   :  { %4931 = vpow2.f32 %v4136_v43  ;;  %v5019_v43 = vld [vmem:[%s6552_s23 + $0x4] ss:$8 sps:$4 sm:$0xff]  }
0x22ce   :  { %v4928_v7 = vpop.eup %4927 }
0x22cf   :  { %2971 = vrot.lane.b32.xlu0 %v4928_v7, %s5271_s0  ;;  %v4930_v32 = vpop.eup %4929 }
0x22d0   :  { %v4932_v40 = vpop.eup %4931 }
0x22d1   :  { %v2656_v21 = vadd.f32 1.0, %v4932_v40 }
0x22d3   :  { %2662 = vrot.lane.b32.xlu0 %v4930_v32, %s5271_s0  ;;  %4933 = vrcp.f32 %v2656_v21  ;;  %v6290_v32 = vld [vmem:[#allocation14 + $0x8] sm:$0xff]  }
0x22e0   :  { %v4934_v37 = vpop.eup %4933 }
0x2341   :  { %v2972_v29 = vpop.permute.xlu0 %2971 }
0x2342   :  { %v2974_v14 = vmul.f32 %v4926_v60, %v2972_v29 }
0x2344   :  { %v2975_v11 = vpack.c.bf16 %v2974_v14, %v2974_v14 }
0x2345   :  { %v2663_v62 = vpop.permute.xlu0 %2662 }
0x2346   :  { %2978 = vrot.lane.b32.xlu1 %v2975_v11, %s5282_s27  ;;  %v2665_v8 = vmul.f32 %v4934_v37, %v2663_v62 }
0x234a   :  { %2846 = vrot.lane.b32.xlu1 %v2787_v5, %s5271_s0 }
0x234e   :  { %2667 = vrot.lane.b32.xlu1 %v2665_v8, %s5282_s27  ;;  %v5021_v8 = vld [vmem:[#allocation2 + $0x8] sm:$0xff]  }
0x23b8   :  { %v6249_v57 = vpop.permute.xlu1 %2978 }
0x23b9   :  { %4628 = vmatmul.mubr.msk.bf16.vlgmr.msra.gmra.mxu0 %vm174_vm0, %v6249_v57 }
0x23ba   :  { %4640 = vmatpush3.bf16.msra.mxu0 %v6017_v2  ;;  %4643 = vmatprep.mubr.msk.bf16.mxu0 %vm5281_vm1, %v5279_v0  ;;  %v2838_v2 = vadd.f32 %v2833_v53, %v2787_v5 }
0x23bb   :  { %4641 = vmatprep.subr.bf16.mxu0 %v5279_v0 }
0x23bc   :  { %v2847_v9 = vpop.permute.xlu1 %2846 }
0x23be   :  { %4642 = vmatpush3.bf16.msra.mxu0 %v6023_v4  ;;  %v4141_v4 = vmul.f32 -1.442695, %v2838_v2 }
0x23bf   :  { %4655 = vmatprep.subr.bf16.mxu0 %v5279_v0 }
0x23c0   :  { %4935 = vpow2.f32 %v4141_v4  ;;  %v2668_v25 = vpop.permute.xlu1 %2667 }
0x23c1   :  { %4644 = vmatmul.mubr.msk.bf16.vlgmr.msra.gmra.mxu0 %vm174_vm0, %v6204_v12 }
0x23c2   :  { %4656 = vmatpush3.bf16.msra.mxu0 %v6029_v38  ;;  %4659 = vmatprep.mubr.msk.bf16.mxu0 %vm5281_vm1, %v5279_v0  ;;  %v2660_v38 = vmul.f32 %v4934_v37, %v6158_v47 }
0x23c3   :  { %4657 = vmatprep.subr.bf16.mxu0 %v5279_v0 }
0x23c4   :  { %v6271_v12 = vadd.f32 %v2668_v25, %v2660_v38 }
0x23c6   :  { %4658 = vmatpush3.bf16.msra.mxu0 %v6035_v19 }
0x23c7   :  { %4663 = vmatprep.subr.bf16.mxu0 %v5279_v0 }
0x23cd   :  { %v4936_v22 = vpop.eup %4935 }
0x23ce   :  { %v2842_v24 = vadd.f32 1.0, %v4936_v22 }
0x23d0   :  { %4937 = vrcp.f32 %v2842_v24  ;;  %v5023_v24 = vld [vmem:[#allocation13 + $0x8] sm:$0xff]  }
0x23d1   :  { %4939 = vtanh.f32 %v6271_v12 }
0x23dd   :  { %v4938_v36 = vpop.eup %4937 }
0x23de   :  { %v2849_v34 = vmul.f32 %v4938_v36, %v2847_v9  ;;  %v4940_v47 = vpop.eup %4939  ;;  %v2856_v3 = vsub.f32 1.0, %v4938_v36  ;;  %v2862_v28 = vmul.f32 %v4938_v36, %v6172_v44  ;;  %v6297_v44 = vld [vmem:[#allocation14] sm:$0xff]  }
0x2479   :  { %v6269_v13 = vpop.f32.mrf.mxu0 }
0x247b   :  { %v4629_v46 = vpop.f32.mrf.mxu0 }
0x247d   :  { %v3020_v19 = vpop.f32.mrf.mxu0 }
0x247f   :  { %v4630_v63 = vpop.f32.mrf.mxu0 }
0x2481   :  { %v3128_v45 = vpop.f32.mrf.mxu0 }
0x2482   :  { %v3129_v23 = vadd.f32 %v6053_v58, %v3128_v45 }
0x2483   :  { %v4645_v26 = vpop.f32.mrf.mxu0 }
0x2484   :  { %3143 = vrot.lane.b32.xlu0 %v3129_v23, %s5271_s0  ;;  %v3135_v49 = vadd.f32 %v3134_v59, %v3129_v23 }
0x2485   :  { %v3131_v39 = vpop.f32.mrf.mxu0 }
0x2486   :  { %v4150_v27 = vmul.f32 -1.442695, %v3135_v49 }
0x2487   :  { %v4646_v10 = vpop.f32.mrf.mxu0 }
0x2488   :  { %2851 = vrot.lane.b32.xlu0 %v2849_v34, %s5271_s0  ;;  %4941 = vpow2.f32 %v4150_v27 }
0x248c   :  { %2673 = vrot.lane.b32.xlu0 %v4940_v47, %s5271_s0 }
0x2495   :  { %v4942_v52 = vpop.eup %4941 }
0x2496   :  { %v3139_v58 = vadd.f32 1.0, %v4942_v52 }
0x2498   :  { %4943 = vrcp.f32 %v3139_v58 }
0x24a5   :  { %v4944_v6 = vpop.eup %4943 }
0x24a6   :  { %v3153_v40 = vsub.f32 1.0, %v4944_v6  ;;  %v3159_v29 = vmul.f32 %v4944_v6, %v6185_v41  ;;  %v4154_v41 = vld [vmem:[%s6554_s29 + $0x1c] sm:$0xf]  ;;  %s5285_s29 = smov [#allocation16]  }
0x24f6   :  { %v3144_v18 = vpop.permute.xlu0 %3143 }
0x24f7   :  { %v3146_v17 = vmul.f32 %v4944_v6, %v3144_v18 }
0x24f9   :  { %3148 = vrot.lane.b32.xlu1 %v3146_v17, %s5271_s0 }
0x24fa   :  { %v2852_v55 = vpop.permute.xlu0 %2851 }
0x24fb   :  { %v2854_v56 = vadd.f32 %v2852_v55, %v2833_v53  ;;  %v5022_v53 = vld [vmem:[#allocation2] sm:$0xff]  }
0x24fd   :  { %4945 = vtanh.f32 %v2854_v56 }
0x24fe   :  { %v2674_v35 = vpop.permute.xlu0 %2673 }
0x24ff   :  { %v2676_v51 = vmul.f32 %v4934_v37, %v2674_v35  ;;  %v5020_v37 = vld [vmem:[%s6552_s23] ss:$8 sps:$4 sm:$0xff]  }
0x2501   :  { %v2976_v61 = vpack.c.bf16 %v2676_v51, %v2676_v51 }
0x250a   :  { %v4946_v33 = vpop.eup %4945 }
0x250b   :  { %2858 = vrot.lane.b32.xlu1 %v4946_v33, %s5283_s1 }
0x250f   :  { %3024 = vrot.lane.b32.xlu1 %v2976_v61, %s5282_s27 }
0x256b   :  { %v3149_v48 = vpop.permute.xlu1 %3148 }
0x256c   :  { %v3151_v20 = vadd.f32 %v3149_v48, %v3134_v59  ;;  %v5025_v59 = vld [vmem:[#allocation7] ss:$0 sm:$0xff] }
0x256e   :  { %4947 = vtanh.f32 %v3151_v20  ;;  %v6352_v20 = vld [vmem:[%s6525_s10] ss:$0 sm:$0xff]  ;;  %s4000_s10 = sshll.u32 %s5285_s29, 4  ;;  %s4001_s10 = int_to_ptr.vmem [resolvable:$true] %s4000_s10 }
0x257b   :  { %v4948_v60 = vpop.eup %4947 }
0x257c   :  { %3155 = vrot.lane.b32.xlu0 %v4948_v60, %s5283_s1 }
0x257d   :  { %v2859_v30 = vpop.permute.xlu1 %2858 }
0x257e   :  { %v2861_v54 = vmul.f32 %v2859_v30, %v2856_v3 }
0x2580   :  { %v6285_v31 = vadd.f32 %v2862_v28, %v2861_v54 }
0x2581   :  { %v3025_v15 = vpop.permute.xlu1 %3024 }
0x2582   :  { %v3162_v7 = vpack.c.bf16 %v6285_v31, %v6285_v31  ;;  %4636 = vmatmul.mubr.msk.bf16.vlgmr.msra.gmra.mxu1 %vm174_vm0, %v3025_v15 }
0x2583   :  { %4648 = vmatpush3.bf16.msra.mxu1 %v6290_v32  ;;  %4651 = vmatprep.mubr.msk.bf16.mxu1 %vm5281_vm1, %v5279_v0 }
0x2584   :  { %3164 = vrot.lane.b32.xlu0 %v3162_v7, %s5283_s1  ;;  %4649 = vmatprep.subr.bf16.mxu1 %v5279_v0 }
0x2587   :  { %4650 = vmatpush3.bf16.msra.mxu1 %v6297_v44 }
0x2588   :  { %3300 = vmatprep.subr.bf16.mxu1 %v5019_v43  ;;  %v6366_v43 = vld [vmem:[%s6528_s13] ss:$0 sm:$0xff] }
0x25ee   :  { %v3156_v21 = vpop.permute.xlu0 %3155 }
0x25ef   :  { %v3158_v14 = vmul.f32 %v3156_v21, %v3153_v40 }
0x25f1   :  { %v6304_v11 = vadd.f32 %v3159_v29, %v3158_v14 }
0x25f3   :  { %v3161_v5 = vpack.c.bf16 %v6304_v11, %v6304_v11 }
0x25f5   :  { %3210 = vrot.lane.b32.xlu1 %v3161_v5, %s5283_s1 }
0x25f6   :  { %v3165_v62 = vpop.permute.xlu0 %3164 }
0x25f7   :  { %4652 = vmatmul.mubr.msk.bf16.vlgmr.msra.gmra.mxu1 %vm174_vm0, %v3165_v62  ;;  %v5028_v62 = vld [vmem:[#allocation8 + $0x8] sm:$0xff]  }
0x25f8   :  { %3301 = vmatpush1.bf16.msra.mxu1 %v5020_v37  ;;  %3318 = vmatprep.mubr.bf16.mxu1 %v5280_v1  ;;  %v5029_v37 = vld [vmem:[#allocation8] sm:$0xff]  }
0x25f9   :  { %4671 = vmatprep.subr.bf16.mxu1 %v5279_v0 }
0x25ff   :  { %4155 = vmatmul.mubr.msk.bf16.vlgmr.msra.gmra.mxu1 %vm206_vm2, %v4154_v41  ;;  %v5030_v41 = vld [vmem:[#allocation5 + $0x8] sm:$0xff]  }
0x2600   :  { %4672 = vmatpush3.bf16.msra.mxu1 %v5021_v8  ;;  %4675 = vmatprep.mubr.msk.bf16.mxu1 %vm5281_vm1, %v5279_v0  ;;  %v5031_v8 = vld [vmem:[#allocation5] sm:$0xff]  }
0x2601   :  { %4673 = vmatprep.subr.bf16.mxu1 %v5279_v0 }
0x2604   :  { %4674 = vmatpush3.bf16.msra.mxu1 %v5022_v53  ;;  %v6388_v53 = vld [vmem:[%s6527_s12] ss:$0 sm:$0xff] }
0x2605   :  { %4687 = vmatprep.subr.bf16.mxu1 %v5279_v0 }
0x2642   :  { %v3063_v1 = vpop.f32.mrf.mxu1 }
0x2643   :  { %v3064_v51 = vadd.f32 %v3063_v1, %v6269_v13 }
0x2644   :  { %v4637_v2 = vpop.f32.mrf.mxu1 }
0x2645   :  { %v3069_v60 = vadd.f32 %v6352_v20, %v3064_v51 }
0x2646   :  { %v3066_v4 = vpop.f32.mrf.mxu1 }
0x2648   :  { %v4638_v22 = vpop.f32.mrf.mxu1 }
0x2667   :  { %v6323_v9 = vpop.permute.xlu1 %3210 }
0x2668   :  { %4660 = vmatmul.mubr.msk.bf16.vlgmr.msra.gmra.mxu0 %vm174_vm0, %v6323_v9 }
0x2669   :  { %4664 = vmatpush3.bf16.msra.mxu0 %v6211_v16  ;;  %4667 = vmatprep.mubr.msk.bf16.mxu0 %vm5281_vm1, %v5279_v0  ;;  %v5024_v16 = vld [vmem:[#allocation13] sm:$0xff]  }
0x266a   :  { %4665 = vmatprep.subr.bf16.mxu0 %v5279_v0 }
0x266d   :  { %4666 = vmatpush3.bf16.msra.mxu0 %v6220_v42 }
0x266e   :  { %4679 = vmatprep.subr.bf16.mxu0 %v5279_v0 }
0x2670   :  { %4668 = vmatmul.mubr.msk.bf16.vlgmr.msra.gmra.mxu0 %vm174_vm0, %v6249_v57 }
0x2671   :  { %4680 = vmatpush3.bf16.msra.mxu0 %v5023_v24  ;;  %4683 = vmatprep.mubr.msk.bf16.mxu0 %vm5281_vm1, %v5279_v0 }
0x2672   :  { %4681 = vmatprep.subr.bf16.mxu0 %v5279_v0 }
0x2675   :  { %4682 = vmatpush3.bf16.msra.mxu0 %v5024_v16 }
0x2676   :  { %4695 = vmatprep.subr.bf16.mxu0 %v5279_v0 }
0x26b7   :  { %v3203_v25 = vpop.f32.mrf.mxu1 }
0x26b8   :  { %v3204_v40 = vadd.f32 %v6366_v43, %v3203_v25 }
0x26b9   :  { %v4653_v38 = vpop.f32.mrf.mxu1 }
0x26bb   :  { %v3206_v46 = vpop.f32.mrf.mxu1 }
0x26bd   :  { %v4654_v42 = vpop.f32.mrf.mxu1 }
0x26bf   :  { %v3320_v19 = vpop.f32.mrf.mxu1 }
0x26c1   :  { %v6339_v63 = vpop.f32.mrf.mxu1 }
0x26c3   :  { %v3324_v45 = vpop.f32.mrf.mxu1 }
0x26c5   :  { %v3325_v57 = vpop.f32.mrf.mxu1 }
0x2728   :  { %v6341_v23 = vpop.f32.mrf.mxu0 }
0x2729   :  { %v3250_v1 = vadd.f32 %v6388_v53, %v6341_v23  ;;  %v5033_v23 = vld [vmem:[#allocation11] ss:$0 sm:$0xff] }
0x272a   :  { %v4661_v26 = vpop.f32.mrf.mxu0 }
0x272b   :  { %v3255_v2 = vadd.f32 %v3250_v1, %v3204_v40 }
0x272c   :  { %v3252_v36 = vpop.f32.mrf.mxu0 }
0x272d   :  { %v4153_v4 = vmul.f32 -1.442695, %v3255_v2 }
0x272e   :  { %v4662_v39 = vpop.f32.mrf.mxu0 }
0x2730   :  { %v3361_v34 = vpop.f32.mrf.mxu0 }
0x2731   :  { %v3362_v10 = vadd.f32 %v3361_v34, %v3320_v19 }
0x2732   :  { %v4669_v47 = vpop.f32.mrf.mxu0 }
0x2733   :  { %v3367_v49 = vadd.f32 %v5025_v59, %v3362_v10  ;;  %v5034_v59 = vld [vmem:[#allocation10] ss:$0 sm:$0xff] }
0x2734   :  { %v3364_v27 = vpop.f32.mrf.mxu0 }
0x2735   :  { %4949 = vtanh.f32 %v3367_v49  ;;  %v4157_v6 = vmul.f32 -1.442695, %v3367_v49  ;;  %v3551_v49 = vadd.f32 %v5034_v59, %v6339_v63 }
0x2736   :  { %v4670_v52 = vpop.f32.mrf.mxu0 }
0x2737   :  { %4951 = vpow2.f32 %v4157_v6 }
0x2742   :  { %v4950_v58 = vpop.eup %4949 }
0x2743   :  { %3377 = vrot.lane.b32.xlu0 %v4950_v58, %s5271_s0 }
0x2744   :  { %v4952_v18 = vpop.eup %4951 }
0x2745   :  { %v3371_v17 = vadd.f32 1.0, %v4952_v18 }
0x2747   :  { %4953 = vrcp.f32 %v3371_v17 }
0x2754   :  { %v4954_v55 = vpop.eup %4953 }
0x2755   :  { %v3375_v33 = vmul.f32 %v4954_v55, %v6239_v50  ;;  %v4148_v50 = vmul.f32 -1.442695, %v3069_v60 }
0x27b5   :  { %v3378_v56 = vpop.permute.xlu0 %3377 }
0x27b6   :  { %v3380_v35 = vmul.f32 %v4954_v55, %v3378_v56 }
0x27b8   :  { %3382 = vrot.lane.b32.xlu1 %v3380_v35, %s5282_s27 }
0x282a   :  { %v3383_v61 = vpop.permute.xlu1 %3382 }
0x282b   :  { %v6347_v48 = vadd.f32 %v3383_v61, %v3375_v33 }
0x282d   :  { %4955 = vtanh.f32 %v6347_v48 }
0x282e   :  { %4957 = vtanh.f32 %v3069_v60 }
0x282f   :  { %4959 = vpow2.f32 %v4148_v50 }
0x283a   :  { %v4956_v3 = vpop.eup %4955 }
0x283b   :  { %3388 = vrot.lane.b32.xlu0 %v4956_v3, %s5271_s0  ;;  %v4958_v30 = vpop.eup %4957 }
0x283c   :  { %v4960_v13 = vpop.eup %4959 }
0x283d   :  { %v3073_v28 = vadd.f32 1.0, %v4960_v13 }
0x283f   :  { %3079 = vrot.lane.b32.xlu0 %v4958_v30, %s5271_s0  ;;  %4961 = vrcp.f32 %v3073_v28 }
0x2840   :  { %4963 = vpow2.f32 %v4153_v4 }
0x284c   :  { %v6370_v29 = vpop.eup %4961 }
0x284d   :  { %v4964_v22 = vpop.eup %4963  ;;  %v3077_v25 = vmul.f32 %v6370_v29, %v6271_v12 }
0x284e   :  { %v3259_v24 = vadd.f32 1.0, %v4964_v22 }
0x2850   :  { %4965 = vrcp.f32 %v3259_v24 }
0x285d   :  { %v4966_v39 = vpop.eup %4965 }
0x285e   :  { %v3273_v50 = vsub.f32 1.0, %v4966_v39  ;;  %v3279_v28 = vmul.f32 %v4966_v39, %v6285_v31 }
0x28ad   :  { %v3389_v54 = vpop.permute.xlu0 %3388 }
0x28ae   :  { %v6358_v15 = vmul.f32 %v4954_v55, %v3389_v54 }
0x28b0   :  { %v3392_v7 = vpack.c.bf16 %v6358_v15, %v6358_v15 }
0x28b1   :  { %v3080_v21 = vpop.permute.xlu0 %3079 }
0x28b2   :  { %3395 = vrot.lane.b32.xlu1 %v3392_v7, %s5282_s27  ;;  %v3082_v14 = vmul.f32 %v6370_v29, %v3080_v21 }
0x28b6   :  { %3263 = vrot.lane.b32.xlu1 %v3204_v40, %s5271_s0 }
0x28ba   :  { %3084 = vrot.lane.b32.xlu1 %v3082_v14, %s5282_s27 }
0x2924   :  { %v3396_v5 = vpop.permute.xlu1 %3395 }
0x2925   :  { %4676 = vmatmul.mubr.msk.bf16.vlgmr.msra.gmra.mxu1 %vm174_vm0, %v3396_v5 }
0x2926   :  { %4688 = vmatpush3.bf16.msra.mxu1 %v5028_v62  ;;  %4691 = vmatprep.mubr.msk.bf16.mxu1 %vm5281_vm1, %v5279_v0 }
0x2927   :  { %4689 = vmatprep.subr.bf16.mxu1 %v5279_v0 }
0x292a   :  { %4690 = vmatpush3.bf16.msra.mxu1 %v5029_v37 }
0x292b   :  { %4703 = vmatprep.subr.bf16.mxu1 %v5279_v0 }
0x292d   :  { %4692 = vmatmul.mubr.msk.bf16.vlgmr.msra.gmra.mxu1 %vm174_vm0, %v6323_v9  ;;  %v3264_v9 = vpop.permute.xlu1 %3263 }
0x292e   :  { %4704 = vmatpush3.bf16.msra.mxu1 %v5030_v41  ;;  %4707 = vmatprep.mubr.msk.bf16.mxu1 %vm5281_vm1, %v5279_v0  ;;  %v3266_v10 = vmul.f32 %v4966_v39, %v3264_v9 }
0x292f   :  { %4705 = vmatprep.subr.bf16.mxu1 %v5279_v0 }
0x2931   :  { %v3085_v16 = vpop.permute.xlu1 %3084 }
0x2932   :  { %4706 = vmatpush3.bf16.msra.mxu1 %v5031_v8  ;;  %v6396_v46 = vadd.f32 %v3085_v16, %v3077_v25 }
0x2933   :  { %4727 = vmatprep.subr.mxu1 %v5279_v0 }
0x2934   :  { %4967 = vtanh.f32 %v6396_v46 }
0x2941   :  { %v4968_v12 = vpop.eup %4967 }
0x29e5   :  { %v6394_v38 = vpop.f32.mrf.mxu1 }
0x29e7   :  { %v4677_v42 = vpop.f32.mrf.mxu1 }
0x29e9   :  { %v3437_v19 = vpop.f32.mrf.mxu1 }
0x29eb   :  { %v4678_v45 = vpop.f32.mrf.mxu1 }
0x29ed   :  { %v3545_v57 = vpop.f32.mrf.mxu1 }
0x29ee   :  { %v3546_v26 = vadd.f32 %v5033_v23, %v3545_v57 }
0x29ef   :  { %v4693_v36 = vpop.f32.mrf.mxu1 }
0x29f0   :  { %3560 = vrot.lane.b32.xlu0 %v3546_v26, %s5271_s0  ;;  %v3552_v27 = vadd.f32 %v3551_v49, %v3546_v26 }
0x29f1   :  { %v3548_v34 = vpop.f32.mrf.mxu1 }
0x29f2   :  { %v4162_v52 = vmul.f32 -1.442695, %v3552_v27 }
0x29f3   :  { %v4694_v47 = vpop.f32.mrf.mxu1 }
0x29f4   :  { %3268 = vrot.lane.b32.xlu0 %v3266_v10, %s5271_s0  ;;  %4969 = vpow2.f32 %v4162_v52 }
0x29f8   :  { %3090 = vrot.lane.b32.xlu0 %v4968_v12, %s5271_s0 }
0x2a01   :  { %v4970_v58 = vpop.eup %4969 }
0x2a02   :  { %v3556_v6 = vadd.f32 1.0, %v4970_v58 }
0x2a04   :  { %4971 = vrcp.f32 %v3556_v6 }
0x2a11   :  { %v4972_v18 = vpop.eup %4971 }
0x2a12   :  { %v3570_v31 = vsub.f32 1.0, %v4972_v18  ;;  %v3576_v14 = vmul.f32 %v4972_v18, %v6304_v11 }
0x2a62   :  { %v3561_v17 = vpop.permute.xlu0 %3560 }
0x2a63   :  { %v3563_v55 = vmul.f32 %v4972_v18, %v3561_v17 }
0x2a65   :  { %3565 = vrot.lane.b32.xlu1 %v3563_v55, %s5271_s0 }
0x2a66   :  { %v3269_v56 = vpop.permute.xlu0 %3268 }
0x2a67   :  { %v3271_v35 = vadd.f32 %v3269_v56, %v3250_v1 }
0x2a69   :  { %4973 = vtanh.f32 %v3271_v35 }
0x2a6a   :  { %v3091_v51 = vpop.permute.xlu0 %3090 }
0x2a6b   :  { %v3093_v33 = vmul.f32 %v6370_v29, %v3091_v51 }
0x2a6d   :  { %v3393_v63 = vpack.c.bf16 %v3093_v33, %v3093_v33 }
0x2a76   :  { %v4974_v61 = vpop.eup %4973 }
0x2a77   :  { %3275 = vrot.lane.b32.xlu1 %v4974_v61, %s5283_s1 }
0x2a7b   :  { %3441 = vrot.lane.b32.xlu1 %v3393_v63, %s5282_s27 }
0x2ad7   :  { %v3566_v60 = vpop.permute.xlu1 %3565 }
0x2ad8   :  { %v3568_v3 = vadd.f32 %v3566_v60, %v3551_v49 }
0x2ada   :  { %4975 = vtanh.f32 %v3568_v3 }
0x2ae7   :  { %v4976_v30 = vpop.eup %4975 }
0x2ae8   :  { %3572 = vrot.lane.b32.xlu0 %v4976_v30, %s5283_s1 }
0x2ae9   :  { %v3276_v13 = vpop.permute.xlu1 %3275 }
0x2aea   :  { %v3278_v54 = vmul.f32 %v3276_v13, %v3273_v50  ;;  %v3734_v13 = vld [vmem:[%s6529_s14 + $0x8] sm:$0xff] }
0x2aec   :  { %v6409_v7 = vadd.f32 %v3279_v28, %v3278_v54  ;;  %v3733_v28 = vld [vmem:[%s6529_s14] sm:$0xff] }
0x2aed   :  { %v3442_v40 = vpop.permute.xlu1 %3441  ;;  %v3825_v54 = vld [vmem:[%s6531_s16] sm:$0xff] }
0x2aee   :  { %v3579_v21 = vpack.c.bf16 %v6409_v7, %v6409_v7  ;;  %4684 = vmatmul.mubr.msk.bf16.vlgmr.msra.gmra.mxu0 %vm174_vm0, %v3442_v40 }
0x2aef   :  { %4696 = vmatpush3.bf16.msra.mxu0 %v6290_v32  ;;  %4699 = vmatprep.mubr.msk.bf16.mxu0 %vm5281_vm1, %v5279_v0 }
0x2af0   :  { %3581 = vrot.lane.b32.xlu0 %v3579_v21, %s5283_s1  ;;  %4697 = vmatprep.subr.bf16.mxu0 %v5279_v0 }
0x2af3   :  { %4698 = vmatpush3.bf16.msra.mxu0 %v6297_v44 }
0x2b5a   :  { %v3573_v29 = vpop.permute.xlu0 %3572 }
0x2b5b   :  { %v3575_v5 = vmul.f32 %v3573_v29, %v3570_v31 }
0x2b5d   :  { %v6421_v62 = vadd.f32 %v3576_v14, %v3575_v5  ;;  %v3826_v14 = vld [vmem:[%s6531_s16 + $0x8] sm:$0xff]  ;;  %v4166_v5 = vld [vmem:[%s6530_s15] ss:$0 sm:$0xff]  ;;  %s5284_s15 = smov [#allocation17]  }
0x2b5e   :  { %s4012_s23 = sshll.u32 %s5284_s15, 4  ;;  %s4013_s23 = int_to_ptr.vmem [resolvable:$true] %s4012_s23 }
0x2b5f   :  { %v3578_v37 = vpack.c.bf16 %v6421_v62, %v6421_v62  ;;  %s5195_s5 = scalar_lea.vmem %s4013_s23, 256  ;;  %p5200_p13 = scmp.lt.s32.totalorder %s4013_s23, %s4013_s23 }
0x2b60   :  { %p5196_p12 = scmp.ne.s32.totalorder %s4013_s23, %s5195_s5  ;;  %p5201_p0 = scmp.lt.s32.totalorder %s5195_s5, %s5195_s5 }
0x2b61   :  { %3627 = vrot.lane.b32.xlu1 %v3578_v37, %s5283_s1 }
0x2b62   :  { %v3582_v32 = vpop.permute.xlu0 %3581  ;;  %p5202_p1 = por %p5201_p0, %p5200_p13 }
0x2b63   :  { %4700 = vmatmul.mubr.msk.bf16.vlgmr.msra.gmra.mxu0 %vm174_vm0, %v3582_v32 }
0x2b64   :  { %p5203_p2 = pnand %p5202_p1, %p5196_p12 }
0x2bae   :  { %v3480_v41 = vpop.f32.mrf.mxu0 }
0x2baf   :  { %v3481_v8 = vadd.f32 %v3480_v41, %v6394_v38 }
0x2bb0   :  { %v4685_v1 = vpop.f32.mrf.mxu0 }
0x2bb1   :  { %v3486_v44 = vadd.f32 %v6352_v20, %v3481_v8 }
0x2bb2   :  { %v3483_v2 = vpop.f32.mrf.mxu0 }
0x2bb3   :  { %4977 = vtanh.f32 %v3486_v44  ;;  %v4160_v9 = vmul.f32 -1.442695, %v3486_v44 }
0x2bb4   :  { %v4686_v11 = vpop.f32.mrf.mxu0 }
0x2bb5   :  { %4979 = vpow2.f32 %v4160_v9 }
0x2bc0   :  { %v4978_v4 = vpop.eup %4977 }
0x2bc1   :  { %3496 = vrot.lane.b32.xlu1 %v4978_v4, %s5271_s0 }
0x2bc2   :  { %v4980_v24 = vpop.eup %4979 }
0x2bc3   :  { %v3490_v16 = vadd.f32 1.0, %v4980_v24 }
0x2bc5   :  { %4981 = vrcp.f32 %v3490_v16 }
0x2bd2   :  { %v4982_v45 = vpop.eup %4981 }
0x2bd3   :  { %v3628_v22 = vpop.permute.xlu1 %3627 }
0x2bd4   :  { %4708 = vmatmul.mubr.msk.bf16.vlgmr.msra.gmra.mxu1 %vm174_vm0, %v3628_v22 }
0x2bd5   :  { %4729 = vmatprep.mubr.msk.f32.mxu1 %vm5281_vm1, %v5279_v0  ;;  %4728 = vmatpush3.msra.mxu1 %v3825_v54 }
0x2c23   :  { %v3620_v25 = vpop.f32.mrf.mxu0 }
0x2c24   :  { %v3621_v38 = vadd.f32 %v6366_v43, %v3620_v25  ;;  %v3494_v43 = vmul.f32 %v4982_v45, %v6396_v46 }
0x2c25   :  { %v4701_v20 = vpop.f32.mrf.mxu0 }
0x2c26   :  { %3680 = vrot.lane.b32.xlu0 %v3621_v38, %s5271_s0 }
0x2c27   :  { %v3623_v42 = vpop.f32.mrf.mxu0 }
0x2c29   :  { %v4702_v19 = vpop.f32.mrf.mxu0 }
0x2c33   :  { %v3497_v57 = vpop.permute.xlu1 %3496 }
0x2c34   :  { %v3499_v23 = vmul.f32 %v4982_v45, %v3497_v57 }
0x2c36   :  { %3501 = vrot.lane.b32.xlu1 %v3499_v23, %s5282_s27 }
0x2c94   :  { %v3666_v26 = vpop.f32.mrf.mxu1 }
0x2c95   :  { %v3667_v36 = vadd.f32 %v6388_v53, %v3666_v26 }
0x2c96   :  { %v4709_v39 = vpop.f32.mrf.mxu1 }
0x2c97   :  { %v3672_v34 = vadd.f32 %v3667_v36, %v3621_v38 }
0x2c98   :  { %v3669_v10 = vpop.f32.mrf.mxu1  ;;  %v3681_v6 = vpop.permute.xlu0 %3680 }
0x2c99   :  { %v4165_v47 = vmul.f32 -1.442695, %v3672_v34 }
0x2c9a   :  { %v4710_v12 = vpop.f32.mrf.mxu1 }
0x2c9b   :  { %4983 = vpow2.f32 %v4165_v47 }
0x2ca8   :  { %v4984_v59 = vpop.eup %4983  ;;  %v3502_v49 = vpop.permute.xlu1 %3501 }
0x2ca9   :  { %v3676_v27 = vadd.f32 1.0, %v4984_v59  ;;  %v3504_v52 = vadd.f32 %v3502_v49, %v3494_v43 }
0x2cab   :  { %4985 = vrcp.f32 %v3676_v27 }
0x2cac   :  { %4987 = vtanh.f32 %v3504_v52 }
0x2cb8   :  { %v4986_v58 = vpop.eup %4985 }
0x2cb9   :  { %v4988_v18 = vpop.eup %4987  ;;  %v3683_v17 = vmul.f32 %v4986_v58, %v3681_v6  ;;  %v3690_v63 = vsub.f32 1.0, %v4986_v58  ;;  %v3696_v3 = vmul.f32 %v4986_v58, %v6409_v7 }
0x2cba   :  { %3507 = vrot.lane.b32.xlu1 %v4988_v18, %s5271_s0 }
0x2cbb   :  { %3685 = vrot.lane.b32.xlu0 %v3683_v17, %s5271_s0 }
0x2d2c   :  { %v3508_v53 = vpop.permute.xlu1 %3507 }
0x2d2d   :  { %v3510_v55 = vmul.f32 %v4982_v45, %v3508_v53  ;;  %v3686_v56 = vpop.permute.xlu0 %3685 }
0x2d2e   :  { %v3688_v35 = vadd.f32 %v3686_v56, %v3667_v36 }
0x2d2f   :  { %3714 = vrot.lane.b32.xlu1 %v3510_v55, %s5282_s27 }
0x2d30   :  { %4989 = vtanh.f32 %v3688_v35 }
0x2d33   :  { %3704 = vrot.lane.b32.xlu1 %v6347_v48, %s5283_s1  ;;  %v3736_v48 = vld [vmem:[%s6529_s14 + $0x18] sm:$0xff] }
0x2d34   :  { %4711 = vmatprep.subr.mxu0 %v3736_v48 }
0x2d35   :  { %4712 = vmatpush3.msra.mxu0 %v3736_v48 }
0x2d37   :  { %3699 = vrot.lane.b32.xlu1 %v6358_v15, %s5282_s27  ;;  %v3735_v15 = vld [vmem:[%s6529_s14 + $0x10] sm:$0xff] }
0x2d38   :  { %4713 = vmatprep.subr.mxu0 %v3735_v15 }
0x2d39   :  { %4714 = vmatpush3.msra.mxu0 %v3735_v15 }
0x2d3a   :  { %4715 = vmatprep.subr.mxu0 %v3734_v13 }
0x2d3b   :  { %4716 = vmatpush3.msra.mxu0 %v3734_v13 }
0x2d3c   :  { %4717 = vmatprep.subr.mxu0 %v3733_v28 }
0x2d3d   :  { %v4990_v46 = vpop.eup %4989  ;;  %4718 = vmatpush3.msra.mxu0 %v3733_v28 }
0x2d3e   :  { %3692 = vrot.lane.b32.xlu0 %v4990_v46, %s5283_s1  ;;  %4722 = vmatprep.subr.mxu0 %v5279_v0 }
0x2da1   :  { %v3715_v51 = vpop.permute.xlu1 %3714 }
0x2da2   :  { %3717 = vst.msk [vmem:[#allocation16 + $0x8] sm:$0xff] %vm174_vm0, %v3715_v51  ;;  %4719 = vmatprep.mubr.msk.f32.mxu0 %vm174_vm0, %v3715_v51 }
0x2da5   :  { %v3705_v33 = vpop.permute.xlu1 %3704 }
0x2da6   :  { %3707 = vst.msk [vmem:[#allocation17] sm:$0xff] %vm174_vm0, %v3705_v33 }
0x2da9   :  { %v3700_v61 = vpop.permute.xlu1 %3699 }
0x2daa   :  { %3702 = vst.msk [vmem:[#allocation16] sm:$0xff] %vm174_vm0, %v3700_v61 }
0x2db0   :  { %v3693_v60 = vpop.permute.xlu0 %3692 }
0x2db1   :  { %v3695_v30 = vmul.f32 %v3693_v60, %v3690_v63 }
0x2db3   :  { %v3697_v50 = vadd.f32 %v3696_v3, %v3695_v30 }
0x2db5   :  { %3724 = vrot.lane.b32.xlu1 %v3697_v50, %s5283_s1  ;;  %3731 = vrot.lane.b32.xlu0 %v3697_v50, %s5271_s0 }
0x2e27   :  { %v3725_v7 = vpop.permute.xlu1 %3724  ;;  %v3732_v40 = vpop.permute.xlu0 %3731 }
0x2e28   :  { %3727 = vst.msk [vmem:[#allocation19 + $0x8] sm:$0xff] %vm174_vm0, %v3725_v7  ;;  %3744 = vrot.lane.b32.xlu0 %v3732_v40, %s5282_s27 }
0x2e2c   :  { %3719 = vrot.lane.b32.xlu0 %v3504_v52, %s5283_s1 }
0x2e30   :  { %3709 = vrot.lane.b32.xlu0 %v6421_v62, %s5283_s1 }
0x2e9a   :  { %v3745_v21 = vpop.permute.xlu0 %3744 }
0x2e9b   :  { %4720 = vmatmul.mubr.msk.f32.vlgmr.msra.gmra.mxu0 %vm174_vm0, %v3745_v21 }
0x2e9c   :  { %4724 = vmatprep.mubr.msk.f32.mxu0 %vm5281_vm1, %v5279_v0  ;;  %4723 = vmatpush3.msra.mxu0 %v3826_v14 }
0x2e9e   :  { %v3720_v31 = vpop.permute.xlu0 %3719 }
0x2e9f   :  { %3722 = vst.msk [vmem:[#allocation17 + $0x8] sm:$0xff] %vm174_vm0, %v3720_v31 }
0x2ea2   :  { %v3710_v29 = vpop.permute.xlu0 %3709 }
0x2ea3   :  { %3712 = vst.msk [vmem:[#allocation19] sm:$0xff] %vm174_vm0, %v3710_v29 }
0x2f5b   :  { %v4721_v62 = vpop.f32.mrf.mxu0 }
0x2f5c   :  { %v3822_v37 = vadd.f32 %v4721_v62, %v4166_v5 }
0x2f5d   :  { %v3816_v32 = vpop.f32.mrf.mxu0 }
0x2f5e   :  { %v3817_v41 = vadd.f32 %v4166_v5, %v3816_v32  ;;  %4725 = vmatmul.mubr.msk.f32.vlgmr.msra.gmra.mxu0 %vm3827_vm3, %v3822_v37 }
0x2f60   :  { %4730 = vmatmul.mubr.msk.f32.vlgmr.msra.gmra.mxu1 %vm3827_vm3, %v3817_v41 }
0x2f61   :  { %5206 = shalt.err (!%p5203_p2)
}
0x2f62   :  { %s5286_s13 = smov 128   ;;  %s5287_s9 = smov 8  }
0x2f63   :  { %4018 = dma.vmem_to_hbm [thread:$0]  %s4013_s23, 256, %s6536_s21, [#allocation18], %s5286_s13, %s5286_s13, %s5287_s9  }
0x2f64   :  { %s5215_s24 = scalar_lea.vmem %s4001_s10, 256  ;;  %p5220_p4 = scmp.lt.s32.totalorder %s4001_s10, %s4001_s10 }
0x2f65   :  { %p5216_p3 = scmp.ne.s32.totalorder %s4001_s10, %s5215_s24  ;;  %p5221_p5 = scmp.lt.s32.totalorder %s5215_s24, %s5215_s24 }
0x2f67   :  { %p5222_p6 = por %p5221_p5, %p5220_p4 }
0x2f69   :  { %p5223_p7 = pnand %p5222_p6, %p5216_p3 }
0x2f6b   :  { %5226 = shalt.err (!%p5223_p7)
}
0x2f6c   :  { %4006 = dma.vmem_to_hbm [thread:$0]  %s4001_s10, 256, %s6535_s20, [#allocation4], %s5286_s13, %s5286_s13, %s5287_s9  }
0x2f6d   :  { %s5288_s25 = smov [#allocation19]  }
0x2f6e   :  { %s4024_s26 = sshll.u32 %s5288_s25, 4  ;;  %s4025_s26 = int_to_ptr.vmem [resolvable:$true] %s4024_s26 }
0x2f6f   :  { %s5235_s4 = scalar_lea.vmem %s4025_s26, 256  ;;  %p5240_p9 = scmp.lt.s32.totalorder %s4025_s26, %s4025_s26 }
0x2f70   :  { %p5236_p8 = scmp.ne.s32.totalorder %s4025_s26, %s5235_s4  ;;  %p5241_p10 = scmp.lt.s32.totalorder %s5235_s4, %s5235_s4 }
0x2f72   :  { %p5242_p11 = por %p5241_p10, %p5240_p9 }
0x2f74   :  { %p5243_p12 = pnand %p5242_p11, %p5236_p8 }
0x2f76   :  { %5246 = shalt.err (!%p5243_p12)
}
0x2f77   :  { %4030 = dma.vmem_to_hbm [thread:$0]  %s4025_s26, 256, %s6537_s22, [#allocation18], %s5286_s13, %s5286_s13, %s5287_s9  }
0x2f78   :  { %v4171_v44 = vld [vmem:[%s6532_s17] ss:$0 sm:$0xff] }
0x301e   :  { %v3897_v0 = vpop.f32.mrf.mxu0 }
0x3020   :  { %v4726_v8 = vpop.f32.mrf.mxu0  ;;  %v3970_v1 = vpop.f32.mrf.mxu1 }
0x3021   :  { %v3971_v2 = vadd.f32 %v3970_v1, %v3897_v0 }
0x3022   :  { %v4731_v11 = vpop.f32.mrf.mxu1 }
0x3023   :  { %v3981_v4 = vadd.f32 %v4171_v44, %v3971_v2 }
0x3025   :  { %3983 = vst.msk [vmem:[%s6533_s18] sm:$0xff] %vm181_vm4, %v3981_v4  ;;  %v4172_v22 = vmul.f32 -1.442695, %v3981_v4 }
0x3027   :  { %4991 = vpow2.f32 %v4172_v22 }
0x3034   :  { %v4992_v9 = vpop.eup %4991 }
0x3035   :  { %v3987_v24 = vadd.f32 1.0, %v4992_v9 }
0x3037   :  { %4993 = vrcp.f32 %v3987_v24 }
0x3044   :  { %v4994_v16 = vpop.eup %4993 }
0x3045   :  { %3990 = vst.msk [vmem:[%s6534_s19] sm:$0xff] %vm181_vm4, %v4994_v16 }
0x3046   :  { %5265 = dma.done.wait [#allocation4], 256  }
0x3047   :  { %5266 = vsyncadd [#allocation4], 4294967040 }
0x3048   :  { %5267 = dma.done.wait [#allocation18], 512  }
0x3049   :  { %5268 = vsyncadd [#allocation18], 4294966784 }
0x304a   :  { %4044 = vsyncpa [#allocation3], 1 }
0x304b   :  { %4045 = vsyncpa [#allocation6], 1 }
0x304c   :  { %4046 = vsyncpa [#allocation9], 1 }
0x304d   :  { %4047 = vsyncpa [#allocation12], 1 }
0x304e   :  { %4048 = vsyncpa [#allocation15], 1 }
0x304f   :  { %4049 = vsyncpa [#allocation4], 1 }
0x3050   :  { %4050 = vsyncpa [#allocation18], 1 }

</bundles_post_ra>
